<compile_context>
chip_gen: v6e
topology: v6e:2x2x1
jax: 0.10.0
libtpu: 0.0.40
codegen_flags: <defaults>
</compile_context>

<pallas_src>
import functools

import jax
import jax.numpy as jnp
from jax.experimental import pallas as pl
from jax.experimental.pallas import tpu as pltpu


def _round_up(x, m):
    return ((x + m - 1) // m) * m


def _device_vmem_capacity_bytes(default=64 * 1024 * 1024):
    """Real per-core VMEM capacity; conservative 64 MiB (v7x) if unknown."""
    try:
        return int(pltpu.get_tpu_info().vmem_capacity_bytes)
    except Exception:
        return default


def _discriminator_kernel(x_ref, w1_ref, b1_ref, w2_ref, b2_ref, o_ref, *, n_valid):
    # x_ref : (TILE_B, FP) f32   flattened input rows (zero padded)
    # w1_ref: (FP, FP)     bf16  fc1 weight, (in, out) layout
    # b1_ref: (1, FP)      f32
    # w2_ref: (FP, NP)     bf16  fc2 weight, (in, out) layout
    # b2_ref: (1, NP)      f32
    # o_ref : (TILE_B, NP) f32   softmax probs (padded columns are exactly 0)
    x = x_ref[...].astype(jnp.bfloat16)            # VPU cast, feeds the MXU

    # fc1 + ReLU: canonical (M,K)x(K,N) MXU matmul with f32 accumulation.
    h = jnp.dot(x, w1_ref[...], preferred_element_type=jnp.float32)
    h = jnp.maximum(h + b1_ref[...], 0.0)

    # fc2 + ReLU.
    logits = jnp.dot(h.astype(jnp.bfloat16), w2_ref[...],
                     preferred_element_type=jnp.float32)
    logits = jnp.maximum(logits + b2_ref[...], 0.0)

    # Mask the lane-padding columns (>= n_valid) so the softmax ignores them.
    col = jax.lax.broadcasted_iota(jnp.int32, logits.shape, 1)
    logits = jnp.where(col < n_valid, logits, -jnp.inf)

    # Numerically stable softmax along dim 1; exact normalization (one scalar
    # per row, negligible cost, rows sum to 1 at f32 accuracy).
    m = jnp.max(logits, axis=1, keepdims=True)
    e = jnp.exp(logits - m)
    denom = jnp.sum(e, axis=1, keepdims=True)
    o_ref[...] = (e / denom).astype(o_ref.dtype)


def prepare_params(w1, b1, w2, b2, *, lane=128):
    """One-time parameter prep (call OUTSIDE the per-step hot path).

    Transposes the PyTorch (out, in) weights to (in, out) once so the kernel
    runs canonical (M,K)x(K,N) MXU contractions with no in-kernel transpose,
    casts them to bf16 (halves weight DMA; kernel accumulates in f32) and
    zero-pads feature/client dims to lane multiples so every block is
    (8,128)-tiled and the output is lane-dense.
    """
    F = w1.shape[1]
    N = w2.shape[0]
    FP = _round_up(max(F, lane), lane)
    NP = _round_up(max(N, lane), lane)

    w1p = jnp.zeros((FP, FP), jnp.bfloat16).at[:F, :F].set(
        jnp.asarray(w1, jnp.bfloat16).T)
    w2p = jnp.zeros((FP, NP), jnp.bfloat16).at[:F, :N].set(
        jnp.asarray(w2, jnp.bfloat16).T)
    b1p = jnp.zeros((1, FP), jnp.float32).at[0, :F].set(
        jnp.asarray(b1, jnp.float32))
    b2p = jnp.zeros((1, NP), jnp.float32).at[0, :N].set(
        jnp.asarray(b2, jnp.float32))
    return dict(w1=w1p, b1=b1p, w2=w2p, b2=b2p, F=F, N=N, FP=FP, NP=NP)


def _build_pallas_call(*, tile_b, BP, FP, NP, n_valid, vmem_limit, cost,
                       single_buffer_weights):
    """Construct the pallas_call for one forward pass."""
    if single_buffer_weights:
        # Constant index_map => the weight slab never changes; one VMEM buffer
        # is enough (no double-buffering of resident weights/biases).
        resident = dict(pipeline_mode=pl.Buffered(1))
    else:
        resident = {}

    in_specs = [
        pl.BlockSpec((tile_b, FP), lambda i: (i, 0)),          # x tile (pipelined)
        pl.BlockSpec((FP, FP), lambda i: (0, 0), **resident),  # w1, resident
        pl.BlockSpec((1, FP), lambda i: (0, 0), **resident),   # b1, resident
        pl.BlockSpec((FP, NP), lambda i: (0, 0), **resident),  # w2, resident
        pl.BlockSpec((1, NP), lambda i: (0, 0), **resident),   # b2, resident
    ]
    return pl.pallas_call(
        functools.partial(_discriminator_kernel, n_valid=n_valid),
        out_shape=jax.ShapeDtypeStruct((BP, NP), jnp.float32),
        grid=(BP // tile_b,),
        in_specs=in_specs,
        out_specs=pl.BlockSpec((tile_b, NP), lambda i: (i, 0)),
        compiler_params=pltpu.CompilerParams(
            dimension_semantics=("parallel",),
            vmem_limit_bytes=int(vmem_limit)),
        cost_estimate=cost,
    )


def discriminator_apply(params, x_nchw, *, tile_b=256):
    """Per-call forward pass. x_nchw: (B, C, H, W). Returns (B, num_clients)."""
    B = x_nchw.shape[0]
    F, N = params["F"], params["N"]
    FP, NP = params["FP"], params["NP"]
    assert x_nchw.shape[1] * x_nchw.shape[2] * x_nchw.shape[3] == F

    # Batch tiling: 256-row default fills the v6e/v7x 2x256 MXU; shrink for
    # small batches, and keep >= 2 grid steps whenever possible so both v7x
    # TensorCores are engaged on the "parallel" axis.
    tile_b = min(tile_b, _round_up(B, 8))
    if B > 8 and _round_up(B, tile_b) // tile_b < 2:
        tile_b = _round_up((B + 1) // 2, 8)
    BP = _round_up(B, tile_b)

    # torch-style flatten; keep f32 (the kernel casts to bf16 on the VPU, so
    # no extra HBM pass for a pre-cast copy of x). Pad only when needed.
    x2d = x_nchw.reshape(B, F)
    if x2d.dtype != jnp.float32:
        x2d = x2d.astype(jnp.float32)
    if BP != B or FP != F:
        x2d = jnp.pad(x2d, ((0, BP - B), (0, FP - F)))

    cost = pl.CostEstimate(
        flops=2 * BP * FP * FP + 2 * BP * FP * NP,
        transcendentals=BP * NP,
        bytes_accessed=(BP * FP * 4                        # x (f32)
                        + (FP * FP + FP * NP) * 2          # weights (bf16)
                        + (FP + NP) * 4                    # biases (f32)
                        + BP * NP * 4))                    # output (f32)

    # VMEM budget: resident weights (counted double-buffered so the fallback
    # path is also covered), double-buffered x/out tiles and f32 intermediates
    # plus headroom -- capped at the device's real capacity so the request is
    # valid on v7x (64 MiB/TC) as well as v5e/v6e (128 MiB).
    weight_bytes = (FP * FP + FP * NP) * 2 + (FP + NP) * 4
    act_bytes = 2 * (tile_b * FP * 4 + tile_b * NP * 4)
    needed = 2 * weight_bytes + act_bytes + tile_b * (FP + NP) * 4
    vmem_limit = min(_device_vmem_capacity_bytes(),
                     max(needed + (8 << 20), 32 << 20))

    args = (x2d, params["w1"], params["b1"], params["w2"], params["b2"])
    build = functools.partial(
        _build_pallas_call, tile_b=tile_b, BP=BP, FP=FP, NP=NP, n_valid=N,
        vmem_limit=vmem_limit, cost=cost)
    try:
        out_padded = build(single_buffer_weights=True)(*args)
    except Exception:
        # pipeline_mode=pl.Buffered(1) is not supported by every jax/Mosaic
        # version on pallas_call BlockSpecs; fall back to default buffering
        # (identical numerics, previously validated path).
        out_padded = build(single_buffer_weights=False)(*args)

    return out_padded[:B, :N]


def discriminator_forward(x_nchw, w1, b1, w2, b2):
    """Convenience wrapper taking raw PyTorch-layout params."""
    return discriminator_apply(prepare_params(w1, b1, w2, b2), x_nchw)


def _reference(x, w1, b1, w2, b2):
    """Pure-JAX reference with the same bf16-weight / f32-accumulate recipe."""
    B = x.shape[0]
    F = x.shape[1] * x.shape[2] * x.shape[3]
    x2d = x.reshape(B, F).astype(jnp.bfloat16)
    w1b = jnp.asarray(w1, jnp.bfloat16)
    w2b = jnp.asarray(w2, jnp.bfloat16)
    h = jnp.dot(x2d, w1b.T, preferred_element_type=jnp.float32) + b1
    h = jnp.maximum(h, 0.0)
    lg = jnp.dot(h.astype(jnp.bfloat16), w2b.T,
                 preferred_element_type=jnp.float32) + b2
    lg = jnp.maximum(lg, 0.0)
    return jax.nn.softmax(lg, axis=1)


if __name__ == "__main__":
    # Small shapes consistent with the forward pass: F = C*H*W = 1024.
    B, C, H, W = 2, 4, 16, 16
    Fdim = C * H * W
    num_clients = 10                 # padded to 128 lanes inside the kernel

    key = jax.random.PRNGKey(0)
    kx, kw1, kb1, kw2, kb2 = jax.random.split(key, 5)

    x = jax.random.normal(kx, (B, C, H, W), dtype=jnp.float32)
    # Deterministic synthetic parameters (PyTorch Linear shapes: (out, in)).
    w1 = jax.random.normal(kw1, (Fdim, Fdim), dtype=jnp.float32) * 0.05
    b1 = jax.random.normal(kb1, (Fdim,), dtype=jnp.float32) * 0.1
    w2 = jax.random.normal(kw2, (num_clients, Fdim), dtype=jnp.float32) * 0.05
    b2 = jax.random.normal(kb2, (num_clients,), dtype=jnp.float32) * 0.1

    out = discriminator_forward(x, w1, b1, w2, b2)
    out = jax.block_until_ready(out)

    ref = _reference(x, w1, b1, w2, b2)

    assert out.shape == (B, num_clients)
    assert bool(jnp.all(jnp.isfinite(out)))
    # Exact softmax normalization: rows sum to 1 at f32 accuracy.
    assert bool(jnp.all(jnp.abs(jnp.sum(out, axis=1) - 1.0) < 1e-3))
    # Matches the pure-JAX reference (tolerance covers bf16 MXU accumulation
    # order differences).
    assert bool(jnp.max(jnp.abs(out - ref)) < 2e-2)

    print("KERNEL_OK")
</pallas_src>

<mosaic_0001>
module attributes {stable_mosaic.version = 11 : i64} {
  func.func @_discriminator_kernel(%arg0: i32, %arg1: memref<8x1024xf32, #tpu.memory_space<vmem>>, %arg2: memref<1024x1024xbf16, #tpu.memory_space<vmem>>, %arg3: memref<1x1024xf32, #tpu.memory_space<vmem>>, %arg4: memref<1024x128xbf16, #tpu.memory_space<vmem>>, %arg5: memref<1x128xf32, #tpu.memory_space<vmem>>, %arg6: memref<8x128xf32, #tpu.memory_space<vmem>>) attributes {dimension_semantics = [#tpu.dimension_semantics<parallel>], iteration_bounds = array<i64: 1>, scalar_prefetch = 0 : i64, scratch_operands = 0 : i64, tpu.core_type = #tpu.core_type<tc>, window_params = [{transform_indices = @transform_0, window_bounds = array<i64: 8, 1024>}, {pipeline_mode = #tpu.pipeline_mode<synchronous>, transform_indices = @transform_1, window_bounds = array<i64: 1024, 1024>}, {pipeline_mode = #tpu.pipeline_mode<synchronous>, transform_indices = @transform_2, window_bounds = array<i64: 1, 1024>}, {pipeline_mode = #tpu.pipeline_mode<synchronous>, transform_indices = @transform_3, window_bounds = array<i64: 1024, 128>}, {pipeline_mode = #tpu.pipeline_mode<synchronous>, transform_indices = @transform_4, window_bounds = array<i64: 1, 128>}, {transform_indices = @transform_5, window_bounds = array<i64: 8, 128>}]} {
    %c0 = arith.constant 0 : index
    %c0_0 = arith.constant 0 : index
    %0 = vector.load %arg1[%c0, %c0_0] : memref<8x1024xf32, #tpu.memory_space<vmem>>, vector<8x1024xf32>
    %1 = arith.truncf %0 : vector<8x1024xf32> to vector<8x1024xbf16>
    %c0_1 = arith.constant 0 : index
    %c0_2 = arith.constant 0 : index
    %2 = vector.load %arg2[%c0_1, %c0_2] : memref<1024x1024xbf16, #tpu.memory_space<vmem>>, vector<1024x1024xbf16>
    %cst = arith.constant dense<0.000000e+00> : vector<8x1024xf32>
    %3 = tpu.matmul %1, %2, %cst {dimension_numbers = #tpu.dot_dimension_numbers<[1], [0], [0], [1], [0, 0, 1, 1], [], []>} : vector<8x1024xbf16>, vector<1024x1024xbf16>, vector<8x1024xf32> -> vector<8x1024xf32>
    %c0_3 = arith.constant 0 : index
    %c0_4 = arith.constant 0 : index
    %4 = vector.load %arg3[%c0_3, %c0_4] : memref<1x1024xf32, #tpu.memory_space<vmem>>, vector<1x1024xf32>
    %5 = vector.broadcast %4 : vector<1x1024xf32> to vector<8x1024xf32>
    %6 = arith.addf %3, %5 : vector<8x1024xf32>
    %cst_5 = arith.constant 0.000000e+00 : f32
    %7 = vector.broadcast %cst_5 : f32 to vector<8x1024xf32>
    %8 = arith.maximumf %6, %7 : vector<8x1024xf32>
    %9 = arith.truncf %8 : vector<8x1024xf32> to vector<8x1024xbf16>
    %c0_6 = arith.constant 0 : index
    %c0_7 = arith.constant 0 : index
    %10 = vector.load %arg4[%c0_6, %c0_7] : memref<1024x128xbf16, #tpu.memory_space<vmem>>, vector<1024x128xbf16>
    %cst_8 = arith.constant dense<0.000000e+00> : vector<8x128xf32>
    %11 = tpu.matmul %9, %10, %cst_8 {dimension_numbers = #tpu.dot_dimension_numbers<[1], [0], [0], [1], [0, 0, 1, 1], [], []>} : vector<8x1024xbf16>, vector<1024x128xbf16>, vector<8x128xf32> -> vector<8x128xf32>
    %c0_9 = arith.constant 0 : index
    %c0_10 = arith.constant 0 : index
    %12 = vector.load %arg5[%c0_9, %c0_10] : memref<1x128xf32, #tpu.memory_space<vmem>>, vector<1x128xf32>
    %13 = vector.broadcast %12 : vector<1x128xf32> to vector<8x128xf32>
    %14 = arith.addf %11, %13 : vector<8x128xf32>
    %cst_11 = arith.constant 0.000000e+00 : f32
    %15 = vector.broadcast %cst_11 : f32 to vector<8x128xf32>
    %16 = arith.maximumf %14, %15 : vector<8x128xf32>
    %17 = tpu.iota {dimensions = array<i32: 1>} : vector<8x128xi32>
    %c10_i32 = arith.constant 10 : i32
    %18 = vector.broadcast %c10_i32 : i32 to vector<8x128xi32>
    %19 = arith.cmpi slt, %17, %18 : vector<8x128xi32>
    %cst_12 = arith.constant 0xFF800000 : f32
    %20 = vector.broadcast %cst_12 : f32 to vector<8x128xf32>
    %21 = arith.select %19, %16, %20 : vector<8x128xi1>, vector<8x128xf32>
    %cst_13 = arith.constant dense<0xFF800000> : vector<8xf32>
    %22 = vector.multi_reduction <maximumf>, %21, %cst_13 [1] : vector<8x128xf32> to vector<8xf32>
    %23 = vector.shape_cast %22 : vector<8xf32> to vector<8x1xf32>
    %24 = vector.broadcast %23 : vector<8x1xf32> to vector<8x128xf32>
    %25 = arith.subf %21, %24 : vector<8x128xf32>
    %26 = math.exp %25 : vector<8x128xf32>
    %cst_14 = arith.constant dense<0.000000e+00> : vector<8xf32>
    %27 = vector.multi_reduction <add>, %26, %cst_14 [1] : vector<8x128xf32> to vector<8xf32>
    %28 = vector.shape_cast %27 : vector<8xf32> to vector<8x1xf32>
    %29 = vector.broadcast %28 : vector<8x1xf32> to vector<8x128xf32>
    %30 = arith.divf %26, %29 : vector<8x128xf32>
    %c0_15 = arith.constant 0 : index
    %c0_16 = arith.constant 0 : index
    %31 = vector.load %arg6[%c0_15, %c0_16] : memref<8x128xf32, #tpu.memory_space<vmem>>, vector<8x128xf32>
    tpu.vector_store %arg6[%c0_15, %c0_16], %30 {strides = array<i32>} : memref<8x128xf32, #tpu.memory_space<vmem>>, vector<8x128xf32>,
    return
  }
  func.func @transform_0(%arg0: i32) -> (i32, i32) {
    %c0_i32 = arith.constant 0 : i32
    %c0_i32_0 = arith.constant 0 : i32
    return %arg0, %c0_i32 : i32, i32
  }
  func.func @transform_1(%arg0: i32) -> (i32, i32) {
    %c0_i32 = arith.constant 0 : i32
    %c0_i32_0 = arith.constant 0 : i32
    %c0_i32_1 = arith.constant 0 : i32
    return %c0_i32, %c0_i32_0 : i32, i32
  }
  func.func @transform_2(%arg0: i32) -> (i32, i32) {
    %c0_i32 = arith.constant 0 : i32
    %c0_i32_0 = arith.constant 0 : i32
    %c0_i32_1 = arith.constant 0 : i32
    return %c0_i32, %c0_i32_0 : i32, i32
  }
  func.func @transform_3(%arg0: i32) -> (i32, i32) {
    %c0_i32 = arith.constant 0 : i32
    %c0_i32_0 = arith.constant 0 : i32
    %c0_i32_1 = arith.constant 0 : i32
    return %c0_i32, %c0_i32_0 : i32, i32
  }
  func.func @transform_4(%arg0: i32) -> (i32, i32) {
    %c0_i32 = arith.constant 0 : i32
    %c0_i32_0 = arith.constant 0 : i32
    %c0_i32_1 = arith.constant 0 : i32
    return %c0_i32, %c0_i32_0 : i32, i32
  }
  func.func @transform_5(%arg0: i32) -> (i32, i32) {
    %c0_i32 = arith.constant 0 : i32
    %c0_i32_0 = arith.constant 0 : i32
    return %arg0, %c0_i32 : i32, i32
  }
}

module attributes {stable_mosaic.version = 11 : i64} {
  func.func @_discriminator_kernel(%arg0: i32, %arg1: memref<8x1024xf32, #tpu.memory_space<vmem>>, %arg2: memref<1024x1024xbf16, #tpu.memory_space<vmem>>, %arg3: memref<1x1024xf32, #tpu.memory_space<vmem>>, %arg4: memref<1024x128xbf16, #tpu.memory_space<vmem>>, %arg5: memref<1x128xf32, #tpu.memory_space<vmem>>, %arg6: memref<8x128xf32, #tpu.memory_space<vmem>>) attributes {dimension_semantics = [#tpu.dimension_semantics<parallel>], iteration_bounds = array<i64: 1>, scalar_prefetch = 0 : i64, scratch_operands = 0 : i64, tpu.core_type = #tpu.core_type<tc>, window_params = [{transform_indices = @transform_0, window_bounds = array<i64: 8, 1024>}, {pipeline_mode = #tpu.pipeline_mode<synchronous>, transform_indices = @transform_1, window_bounds = array<i64: 1024, 1024>}, {pipeline_mode = #tpu.pipeline_mode<synchronous>, transform_indices = @transform_2, window_bounds = array<i64: 1, 1024>}, {pipeline_mode = #tpu.pipeline_mode<synchronous>, transform_indices = @transform_3, window_bounds = array<i64: 1024, 128>}, {pipeline_mode = #tpu.pipeline_mode<synchronous>, transform_indices = @transform_4, window_bounds = array<i64: 1, 128>}, {transform_indices = @transform_5, window_bounds = array<i64: 8, 128>}]} {
    %c0 = arith.constant 0 : index
    %c0_0 = arith.constant 0 : index
    %0 = vector.load %arg1[%c0, %c0_0] : memref<8x1024xf32, #tpu.memory_space<vmem>>, vector<8x1024xf32>
    %1 = arith.truncf %0 : vector<8x1024xf32> to vector<8x1024xbf16>
    %c0_1 = arith.constant 0 : index
    %c0_2 = arith.constant 0 : index
    %2 = vector.load %arg2[%c0_1, %c0_2] : memref<1024x1024xbf16, #tpu.memory_space<vmem>>, vector<1024x1024xbf16>
    %cst = arith.constant dense<0.000000e+00> : vector<8x1024xf32>
    %3 = tpu.matmul %1, %2, %cst {dimension_numbers = #tpu.dot_dimension_numbers<[1], [0], [0], [1], [0, 0, 1, 1], [], []>} : vector<8x1024xbf16>, vector<1024x1024xbf16>, vector<8x1024xf32> -> vector<8x1024xf32>
    %c0_3 = arith.constant 0 : index
    %c0_4 = arith.constant 0 : index
    %4 = vector.load %arg3[%c0_3, %c0_4] : memref<1x1024xf32, #tpu.memory_space<vmem>>, vector<1x1024xf32>
    %5 = vector.broadcast %4 : vector<1x1024xf32> to vector<8x1024xf32>
    %6 = arith.addf %3, %5 : vector<8x1024xf32>
    %cst_5 = arith.constant 0.000000e+00 : f32
    %7 = vector.broadcast %cst_5 : f32 to vector<8x1024xf32>
    %8 = arith.maximumf %6, %7 : vector<8x1024xf32>
    %9 = arith.truncf %8 : vector<8x1024xf32> to vector<8x1024xbf16>
    %c0_6 = arith.constant 0 : index
    %c0_7 = arith.constant 0 : index
    %10 = vector.load %arg4[%c0_6, %c0_7] : memref<1024x128xbf16, #tpu.memory_space<vmem>>, vector<1024x128xbf16>
    %cst_8 = arith.constant dense<0.000000e+00> : vector<8x128xf32>
    %11 = tpu.matmul %9, %10, %cst_8 {dimension_numbers = #tpu.dot_dimension_numbers<[1], [0], [0], [1], [0, 0, 1, 1], [], []>} : vector<8x1024xbf16>, vector<1024x128xbf16>, vector<8x128xf32> -> vector<8x128xf32>
    %c0_9 = arith.constant 0 : index
    %c0_10 = arith.constant 0 : index
    %12 = vector.load %arg5[%c0_9, %c0_10] : memref<1x128xf32, #tpu.memory_space<vmem>>, vector<1x128xf32>
    %13 = vector.broadcast %12 : vector<1x128xf32> to vector<8x128xf32>
    %14 = arith.addf %11, %13 : vector<8x128xf32>
    %cst_11 = arith.constant 0.000000e+00 : f32
    %15 = vector.broadcast %cst_11 : f32 to vector<8x128xf32>
    %16 = arith.maximumf %14, %15 : vector<8x128xf32>
    %17 = tpu.iota {dimensions = array<i32: 1>} : vector<8x128xi32>
    %c10_i32 = arith.constant 10 : i32
    %18 = vector.broadcast %c10_i32 : i32 to vector<8x128xi32>
    %19 = arith.cmpi slt, %17, %18 : vector<8x128xi32>
    %cst_12 = arith.constant 0xFF800000 : f32
    %20 = vector.broadcast %cst_12 : f32 to vector<8x128xf32>
    %21 = arith.select %19, %16, %20 : vector<8x128xi1>, vector<8x128xf32>
    %cst_13 = arith.constant dense<0xFF800000> : vector<8xf32>
    %22 = vector.multi_reduction <maximumf>, %21, %cst_13 [1] : vector<8x128xf32> to vector<8xf32>
    %23 = vector.shape_cast %22 : vector<8xf32> to vector<8x1xf32>
    %24 = vector.broadcast %23 : vector<8x1xf32> to vector<8x128xf32>
    %25 = arith.subf %21, %24 : vector<8x128xf32>
    %26 = math.exp %25 : vector<8x128xf32>
    %cst_14 = arith.constant dense<0.000000e+00> : vector<8xf32>
    %27 = vector.multi_reduction <add>, %26, %cst_14 [1] : vector<8x128xf32> to vector<8xf32>
    %28 = vector.shape_cast %27 : vector<8xf32> to vector<8x1xf32>
    %29 = vector.broadcast %28 : vector<8x1xf32> to vector<8x128xf32>
    %30 = arith.divf %26, %29 : vector<8x128xf32>
    %c0_15 = arith.constant 0 : index
    %c0_16 = arith.constant 0 : index
    %31 = vector.load %arg6[%c0_15, %c0_16] : memref<8x128xf32, #tpu.memory_space<vmem>>, vector<8x128xf32>
    tpu.vector_store %arg6[%c0_15, %c0_16], %30 {strides = array<i32>} : memref<8x128xf32, #tpu.memory_space<vmem>>, vector<8x128xf32>,
    return
  }
  func.func @transform_0(%arg0: i32) -> (i32, i32) {
    %c0_i32 = arith.constant 0 : i32
    %c0_i32_0 = arith.constant 0 : i32
    return %arg0, %c0_i32 : i32, i32
  }
  func.func @transform_1(%arg0: i32) -> (i32, i32) {
    %c0_i32 = arith.constant 0 : i32
    %c0_i32_0 = arith.constant 0 : i32
    %c0_i32_1 = arith.constant 0 : i32
    return %c0_i32, %c0_i32_0 : i32, i32
  }
  func.func @transform_2(%arg0: i32) -> (i32, i32) {
    %c0_i32 = arith.constant 0 : i32
    %c0_i32_0 = arith.constant 0 : i32
    %c0_i32_1 = arith.constant 0 : i32
    return %c0_i32, %c0_i32_0 : i32, i32
  }
  func.func @transform_3(%arg0: i32) -> (i32, i32) {
    %c0_i32 = arith.constant 0 : i32
    %c0_i32_0 = arith.constant 0 : i32
    %c0_i32_1 = arith.constant 0 : i32
    return %c0_i32, %c0_i32_0 : i32, i32
  }
  func.func @transform_4(%arg0: i32) -> (i32, i32) {
    %c0_i32 = arith.constant 0 : i32
    %c0_i32_0 = arith.constant 0 : i32
    %c0_i32_1 = arith.constant 0 : i32
    return %c0_i32, %c0_i32_0 : i32, i32
  }
  func.func @transform_5(%arg0: i32) -> (i32, i32) {
    %c0_i32 = arith.constant 0 : i32
    %c0_i32_0 = arith.constant 0 : i32
    return %arg0, %c0_i32 : i32, i32
  }
}

</mosaic_0001>

<bundles_post_ra>
// kernel: tpu_custom_call.1
= control target key start
LH: loop header
LB: loop body
LE: loop exit
PB: predicated region body
PF: predicated region fallthrough
CT: control target
= control target key end

     0   :  { %10 = vsyncpa [#allocation3], 0  ;;  %s5632_s0 = inlined_call_operand.hbm [shape: f32[8,1024], index: 0, kind: input, shape index: {}]   ;;  %s5633_s1 = inlined_call_operand.hbm [shape: bf16[1024,1024], index: 1, kind: input, shape index: {}]   ;;  %s5634_s2 = inlined_call_operand.hbm [shape: f32[1,1024], index: 2, kind: input, shape index: {}]   ;;  %s5635_s3 = inlined_call_operand.hbm [shape: bf16[1024,128], index: 3, kind: input, shape index: {}]   ;;  %s5636_s4 = inlined_call_operand.hbm [shape: f32[1,128], index: 4, kind: input, shape index: {}]   ;;  %s5637_s5 = inlined_call_operand.hbm [shape: f32[8,128], index: 5, kind: output, shape index: {}]  }
   0x1   :  { %11 = vsyncpa [#allocation6], 0 }
   0x2   :  { %12 = vsyncpa [#allocation9], 0 }
   0x3   :  { %13 = vsyncpa [#allocation4], 0  ;;  %s5469_s18 = smov [#allocation5]  }
   0x4   :  { %s29_s19 = sshll.u32 %s5469_s18, 4  ;;  %s30_s19 = int_to_ptr.vmem [resolvable:$true] %s29_s19 }
   0x5   :  { %s5349_s20 = scalar_lea.vmem %s30_s19, 65536  ;;  %p5354_p1 = scmp.lt.s32.totalorder %s30_s19, %s30_s19 }
   0x6   :  { %p5350_p0 = scmp.ne.s32.totalorder %s30_s19, %s5349_s20  ;;  %p5355_p2 = scmp.lt.s32.totalorder %s5349_s20, %s5349_s20 }
   0x8   :  { %p5356_p3 = por %p5355_p2, %p5354_p1 }
   0xa   :  { %p5357_p4 = pnand %p5356_p3, %p5350_p0 }
   0xc   :  { %5360 = shalt.err (!%p5357_p4)
}
   0xd   :  { %s5470_s21 = smov 512   ;;  %s5471_s22 = smov 32  }
   0xe   :  { %35 = dma.hbm_to_vmem [thread:$0]  %s5633_s1, 65536, %s30_s19, [#allocation6], %s5470_s21, %s5470_s21, %s5471_s22  }
   0xf   :  { %s5472_s25 = smov [#allocation8]  }
  0x10   :  { %s51_s26 = sshll.u32 %s5472_s25, 4  ;;  %s52_s26 = int_to_ptr.vmem [resolvable:$true] %s51_s26 }
  0x11   :  { %s5369_s27 = scalar_lea.vmem %s52_s26, 8192  ;;  %p5374_p6 = scmp.lt.s32.totalorder %s52_s26, %s52_s26 }
  0x12   :  { %p5370_p5 = scmp.ne.s32.totalorder %s52_s26, %s5369_s27  ;;  %p5375_p7 = scmp.lt.s32.totalorder %s5369_s27, %s5369_s27 }
  0x14   :  { %p5376_p8 = por %p5375_p7, %p5374_p6 }
  0x16   :  { %p5377_p9 = pnand %p5376_p8, %p5370_p5 }
  0x18   :  { %5380 = shalt.err (!%p5377_p9)
}
  0x19   :  { %s5473_s28 = smov 64   ;;  %s5474_s29 = smov 4  }
  0x1a   :  { %57 = dma.hbm_to_vmem [thread:$0]  %s5635_s3, 8192, %s52_s26, [#allocation9], %s5473_s28, %s5473_s28, %s5474_s29  }
  0x1b   :  { %s5475_s7 = smov [#allocation2]   ;;  %s5476_s9 = smov [#allocation7]  }
  0x1c   :  { %s20_s8 = sshll.u32 %s5475_s7, 4  ;;  %s42_s1 = sshll.u32 %s5476_s9, 4  ;;  %s21_s8 = int_to_ptr.vmem [resolvable:$true] %s20_s8  ;;  %s43_s1 = int_to_ptr.vmem [resolvable:$true] %s42_s1 }
  0x1d   :  { %s5389_s10 = scalar_lea.vmem %s21_s8, 1024  ;;  %p5394_p11 = scmp.lt.s32.totalorder %s21_s8, %s21_s8 }
  0x1e   :  { %p5390_p10 = scmp.ne.s32.totalorder %s21_s8, %s5389_s10  ;;  %p5395_p12 = scmp.lt.s32.totalorder %s5389_s10, %s5389_s10 }
  0x20   :  { %p5396_p13 = por %p5395_p12, %p5394_p11 }
  0x22   :  { %p5397_p0 = pnand %p5396_p13, %p5390_p10 }
  0x24   :  { %5400 = shalt.err (!%p5397_p0)
}
  0x25   :  { %23 = dma.hbm_to_vmem [thread:$0]  %s5632_s0, 1024, %s21_s8, [#allocation3]  }
  0x26   :  { %s5409_s13 = scalar_lea.vmem %s43_s1, 128  ;;  %p5414_p2 = scmp.lt.s32.totalorder %s43_s1, %s43_s1 }
  0x27   :  { %p5410_p1 = scmp.ne.s32.totalorder %s43_s1, %s5409_s13  ;;  %p5415_p3 = scmp.lt.s32.totalorder %s5409_s13, %s5409_s13 }
  0x29   :  { %p5416_p4 = por %p5415_p3, %p5414_p2 }
  0x2b   :  { %p5417_p5 = pnand %p5416_p4, %p5410_p1 }
  0x2d   :  { %5420 = shalt.err (!%p5417_p5)
}
  0x2e   :  { %45 = dma.hbm_to_vmem [thread:$0]  %s5634_s2, 128, %s43_s1, [#allocation6]  }
  0x2f   :  { %s5477_s15 = smov [#allocation10]  }
  0x30   :  { %s64_s16 = sshll.u32 %s5477_s15, 4  ;;  %s65_s16 = int_to_ptr.vmem [resolvable:$true] %s64_s16 }
  0x31   :  { %s5429_s17 = scalar_lea.vmem %s65_s16, 16  ;;  %s5433_s18 = scalar_lea.vmem %s65_s16, 32 }
  0x32   :  { %p5430_p6 = scmp.ne.s32.totalorder %s65_s16, %s5429_s17  ;;  %p5434_p7 = scmp.lt.s32.totalorder %s65_s16, %s65_s16 }
  0x33   :  { %p5435_p8 = scmp.lt.s32.totalorder %s5433_s18, %s5429_s17 }
  0x35   :  { %p5436_p9 = por %p5435_p8, %p5434_p7 }
  0x37   :  { %p5437_p10 = pnand %p5436_p9, %p5430_p6 }
  0x39   :  { %5440 = shalt.err (!%p5437_p10)
}
  0x3a   :  { %67 = dma.hbm_to_vmem [thread:$0]  %s5636_s4, 16, %s65_s16, [#allocation9]  }
  0x3b   :  { %5461 = dma.done.wait [#allocation3], 1024  }
  0x3c   :  { %5462 = vsyncadd [#allocation3], 4294966272 }
  0x3d   :  { %5463 = dma.done.wait [#allocation6], 65664  }
  0x3e   :  { %5464 = vsyncadd [#allocation6], 4294901632 }
  0x3f   :  { %5465 = dma.done.wait [#allocation9], 8208  }
  0x40   :  { %5466 = vsyncadd [#allocation9], 4294959088  ;;  %v156_v0 = vld [vmem:[#allocation5 + $0x1c0] sm:$0xff]  ;;  %v85_v53 = vld [vmem:[#allocation2 + $0x8] sm:$0xff]  ;;  %s5478_s2 = smov [#allocation11]  }
  0x41   :  { %v160_v1 = vld [vmem:[#allocation5 + $0x1e0] sm:$0xff]  ;;  %v87_v54 = vld [vmem:[#allocation2 + $0x18] sm:$0xff]  ;;  %v5524_v58 = vpack.c.bf16 %v85_v53, %v85_v53  ;;  %s4586_s4 = sshll.u32 %s5478_s2, 4  ;;  %s4587_s4 = int_to_ptr.vmem [resolvable:$true] %s4586_s4 }
  0x42   :  { %v284_v2 = vld [vmem:[#allocation5 + $0x5c0] sm:$0xff]  ;;  %v4654_v3 = vcombine.high %v156_v0, %v160_v1  ;;  %v4653_v5 = vcombine.low %v156_v0, %v160_v1  ;;  %v5526_v59 = vpack.c.bf16 %v87_v54, %v87_v54  ;;  %s5441_s20 = scalar_lea.vmem %s4587_s4, 128  ;;  %p5446_p12 = scmp.lt.s32.totalorder %s4587_s4, %s4587_s4 }
  0x43   :  { %v288_v4 = vld [vmem:[#allocation5 + $0x5e0] sm:$0xff]  ;;  %3246 = vmatprep.mubr.bf16.mxu0 %v5524_v58  ;;  %p5442_p11 = scmp.ne.s32.totalorder %s4587_s4, %s5441_s20  ;;  %p5447_p13 = scmp.lt.s32.totalorder %s5441_s20, %s5441_s20 }
  0x44   :  { %v148_v6 = vld [vmem:[#allocation5 + $0x180] sm:$0xff]  ;;  %v4782_v8 = vcombine.high %v284_v2, %v288_v4  ;;  %v4781_v9 = vcombine.low %v284_v2, %v288_v4  ;;  %3214 = vmatprep.subr.bf16.mxu0 %v4654_v3  ;;  %3287 = vmatprep.mubr.bf16.mxu1 %v5526_v59 }
  0x45   :  { %v152_v7 = vld [vmem:[#allocation5 + $0x1a0] sm:$0xff]  ;;  %3215 = vmatpush1.bf16.msra.mxu0 %v4653_v5  ;;  %p5448_p0 = por %p5447_p13, %p5446_p12 }
  0x46   :  { %v4646_v10 = vcombine.high %v148_v6, %v152_v7  ;;  %v276_v11 = vld [vmem:[#allocation5 + $0x580] sm:$0xff]  ;;  %3255 = vmatprep.subr.bf16.mxu1 %v4782_v8  ;;  %v4645_v18 = vcombine.low %v148_v6, %v152_v7 }
  0x47   :  { %v280_v12 = vld [vmem:[#allocation5 + $0x5a0] sm:$0xff]  ;;  %3256 = vmatpush1.bf16.msra.mxu1 %v4781_v9  ;;  %p5449_p1 = pnand %p5448_p0, %p5442_p11 }
  0x48   :  { %v140_v13 = vld [vmem:[#allocation5 + $0x140] sm:$0xff]  ;;  %v4774_v14 = vcombine.high %v276_v11, %v280_v12  ;;  %3216 = vmatprep.subr.bf16.mxu0 %v4646_v10  ;;  %v4773_v19 = vcombine.low %v276_v11, %v280_v12 }
  0x49   :  { %v144_v15 = vld [vmem:[#allocation5 + $0x160] sm:$0xff]  ;;  %3217 = vmatpush1.bf16.msra.mxu0 %v4645_v18 }
  0x4a   :  { %v268_v16 = vld [vmem:[#allocation5 + $0x540] sm:$0xff]  ;;  %v4638_v20 = vcombine.high %v140_v13, %v144_v15  ;;  %3257 = vmatprep.subr.bf16.mxu1 %v4774_v14  ;;  %v4637_v26 = vcombine.low %v140_v13, %v144_v15 }
  0x4b   :  { %v272_v17 = vld [vmem:[#allocation5 + $0x560] sm:$0xff]  ;;  %3258 = vmatpush1.bf16.msra.mxu1 %v4773_v19 }
  0x4c   :  { %v4766_v21 = vcombine.high %v268_v16, %v272_v17  ;;  %v132_v22 = vld [vmem:[#allocation5 + $0x100] sm:$0xff]  ;;  %3218 = vmatprep.subr.bf16.mxu0 %v4638_v20  ;;  %v4765_v27 = vcombine.low %v268_v16, %v272_v17 }
  0x4d   :  { %v136_v23 = vld [vmem:[#allocation5 + $0x120] sm:$0xff]  ;;  %3219 = vmatpush1.bf16.msra.mxu0 %v4637_v26 }
  0x4e   :  { %v260_v24 = vld [vmem:[#allocation5 + $0x500] sm:$0xff]  ;;  %v4630_v28 = vcombine.high %v132_v22, %v136_v23  ;;  %3259 = vmatprep.subr.bf16.mxu1 %v4766_v21  ;;  %v4629_v34 = vcombine.low %v132_v22, %v136_v23 }
  0x4f   :  { %v264_v25 = vld [vmem:[#allocation5 + $0x520] sm:$0xff]  ;;  %3260 = vmatpush1.bf16.msra.mxu1 %v4765_v27 }
  0x50   :  { %v4758_v29 = vcombine.high %v260_v24, %v264_v25  ;;  %v124_v30 = vld [vmem:[#allocation5 + $0xc0] sm:$0xff]  ;;  %3220 = vmatprep.subr.bf16.mxu0 %v4630_v28  ;;  %v4757_v35 = vcombine.low %v260_v24, %v264_v25 }
  0x51   :  { %v128_v31 = vld [vmem:[#allocation5 + $0xe0] sm:$0xff]  ;;  %3221 = vmatpush1.bf16.msra.mxu0 %v4629_v34 }
  0x52   :  { %v252_v32 = vld [vmem:[#allocation5 + $0x4c0] sm:$0xff]  ;;  %v4622_v36 = vcombine.high %v124_v30, %v128_v31  ;;  %3261 = vmatprep.subr.bf16.mxu1 %v4758_v29  ;;  %v4621_v42 = vcombine.low %v124_v30, %v128_v31 }
  0x53   :  { %v256_v33 = vld [vmem:[#allocation5 + $0x4e0] sm:$0xff]  ;;  %3262 = vmatpush1.bf16.msra.mxu1 %v4757_v35 }
  0x54   :  { %v4750_v37 = vcombine.high %v252_v32, %v256_v33  ;;  %v116_v38 = vld [vmem:[#allocation5 + $0x80] sm:$0xff]  ;;  %3222 = vmatprep.subr.bf16.mxu0 %v4622_v36  ;;  %v4749_v43 = vcombine.low %v252_v32, %v256_v33 }
  0x55   :  { %v120_v39 = vld [vmem:[#allocation5 + $0xa0] sm:$0xff]  ;;  %3223 = vmatpush1.bf16.msra.mxu0 %v4621_v42 }
  0x56   :  { %v244_v40 = vld [vmem:[#allocation5 + $0x480] sm:$0xff]  ;;  %v4614_v44 = vcombine.high %v116_v38, %v120_v39  ;;  %3263 = vmatprep.subr.bf16.mxu1 %v4750_v37  ;;  %v4613_v50 = vcombine.low %v116_v38, %v120_v39 }
  0x57   :  { %v248_v41 = vld [vmem:[#allocation5 + $0x4a0] sm:$0xff]  ;;  %3264 = vmatpush1.bf16.msra.mxu1 %v4749_v43 }
  0x58   :  { %v4742_v45 = vcombine.high %v244_v40, %v248_v41  ;;  %v108_v46 = vld [vmem:[#allocation5 + $0x40] sm:$0xff]  ;;  %3224 = vmatprep.subr.bf16.mxu0 %v4614_v44  ;;  %v4741_v51 = vcombine.low %v244_v40, %v248_v41 }
  0x59   :  { %v112_v47 = vld [vmem:[#allocation5 + $0x60] sm:$0xff]  ;;  %3225 = vmatpush1.bf16.msra.mxu0 %v4613_v50 }
  0x5a   :  { %v236_v48 = vld [vmem:[#allocation5 + $0x440] sm:$0xff]  ;;  %v4606_v52 = vcombine.high %v108_v46, %v112_v47  ;;  %3265 = vmatprep.subr.bf16.mxu1 %v4742_v45  ;;  %v4605_v62 = vcombine.low %v108_v46, %v112_v47 }
  0x5b   :  { %v240_v49 = vld [vmem:[#allocation5 + $0x460] sm:$0xff]  ;;  %3266 = vmatpush1.bf16.msra.mxu1 %v4741_v51 }
  0x5c   :  { %v4734_v55 = vcombine.high %v236_v48, %v240_v49  ;;  %v100_v56 = vld [vmem:[#allocation5] sm:$0xff]  ;;  %3226 = vmatprep.subr.bf16.mxu0 %v4606_v52  ;;  %v4733_v63 = vcombine.low %v236_v48, %v240_v49 }
  0x5d   :  { %v104_v57 = vld [vmem:[#allocation5 + $0x20] sm:$0xff]  ;;  %3227 = vmatpush1.bf16.msra.mxu0 %v4605_v62 }
  0x5e   :  { %v228_v60 = vld [vmem:[#allocation5 + $0x400] sm:$0xff]  ;;  %v4598_v0 = vcombine.high %v100_v56, %v104_v57  ;;  %3267 = vmatprep.subr.bf16.mxu1 %v4734_v55  ;;  %v4597_v6 = vcombine.low %v100_v56, %v104_v57 }
  0x5f   :  { %v232_v61 = vld [vmem:[#allocation5 + $0x420] sm:$0xff]  ;;  %3268 = vmatpush1.bf16.msra.mxu1 %v4733_v63 }
  0x60   :  { %v4726_v1 = vcombine.high %v228_v60, %v232_v61  ;;  %v220_v2 = vld [vmem:[#allocation5 + $0x3c0] sm:$0xff]  ;;  %3228 = vmatprep.subr.bf16.mxu0 %v4598_v0  ;;  %v4725_v7 = vcombine.low %v228_v60, %v232_v61 }
  0x61   :  { %v224_v3 = vld [vmem:[#allocation5 + $0x3e0] sm:$0xff]  ;;  %3229 = vmatpush1.bf16.msra.mxu0 %v4597_v6 }
  0x62   :  { %v348_v4 = vld [vmem:[#allocation5 + $0x7c0] sm:$0xff]  ;;  %v4718_v8 = vcombine.high %v220_v2, %v224_v3  ;;  %3269 = vmatprep.subr.bf16.mxu1 %v4726_v1  ;;  %v4717_v14 = vcombine.low %v220_v2, %v224_v3 }
  0x63   :  { %v352_v5 = vld [vmem:[#allocation5 + $0x7e0] sm:$0xff]  ;;  %3270 = vmatpush1.bf16.msra.mxu1 %v4725_v7 }
  0x64   :  { %v4846_v9 = vcombine.high %v348_v4, %v352_v5  ;;  %v212_v10 = vld [vmem:[#allocation5 + $0x380] sm:$0xff]  ;;  %3230 = vmatprep.subr.bf16.mxu0 %v4718_v8  ;;  %v4845_v15 = vcombine.low %v348_v4, %v352_v5 }
  0x65   :  { %v216_v11 = vld [vmem:[#allocation5 + $0x3a0] sm:$0xff]  ;;  %3231 = vmatpush2.bf16.msra.mxu0 %v4717_v14 }
  0x66   :  { %v340_v12 = vld [vmem:[#allocation5 + $0x780] sm:$0xff]  ;;  %v4710_v16 = vcombine.high %v212_v10, %v216_v11  ;;  %3271 = vmatprep.subr.bf16.mxu1 %v4846_v9  ;;  %v4709_v22 = vcombine.low %v212_v10, %v216_v11  ;;  %v86_v11 = vld [vmem:[#allocation2 + $0x10] sm:$0xff] }
  0x67   :  { %v344_v13 = vld [vmem:[#allocation5 + $0x7a0] sm:$0xff]  ;;  %3272 = vmatpush2.bf16.msra.mxu1 %v4845_v15 }
  0x68   :  { %v4838_v17 = vcombine.high %v340_v12, %v344_v13  ;;  %v204_v18 = vld [vmem:[#allocation5 + $0x340] sm:$0xff]  ;;  %3232 = vmatprep.subr.bf16.mxu0 %v4710_v16  ;;  %v4837_v23 = vcombine.low %v340_v12, %v344_v13 }
  0x69   :  { %v208_v19 = vld [vmem:[#allocation5 + $0x360] sm:$0xff]  ;;  %3233 = vmatpush2.bf16.msra.mxu0 %v4709_v22  ;;  %v91_v22 = vld [vmem:[#allocation2 + $0x38] sm:$0xff] }
  0x6a   :  { %v332_v20 = vld [vmem:[#allocation5 + $0x740] sm:$0xff]  ;;  %v4702_v24 = vcombine.high %v204_v18, %v208_v19  ;;  %3273 = vmatprep.subr.bf16.mxu1 %v4838_v17  ;;  %v4701_v30 = vcombine.low %v204_v18, %v208_v19  ;;  %v89_v19 = vld [vmem:[#allocation2 + $0x28] sm:$0xff] }
  0x6b   :  { %v336_v21 = vld [vmem:[#allocation5 + $0x760] sm:$0xff]  ;;  %3274 = vmatpush2.bf16.msra.mxu1 %v4837_v23 }
  0x6c   :  { %v4830_v25 = vcombine.high %v332_v20, %v336_v21  ;;  %v196_v26 = vld [vmem:[#allocation5 + $0x300] sm:$0xff]  ;;  %3234 = vmatprep.subr.bf16.mxu0 %v4702_v24  ;;  %v4829_v31 = vcombine.low %v332_v20, %v336_v21  ;;  %v5532_v20 = vpack.c.bf16 %v86_v11, %v86_v11 }
  0x6d   :  { %v200_v27 = vld [vmem:[#allocation5 + $0x320] sm:$0xff]  ;;  %3235 = vmatpush2.bf16.msra.mxu0 %v4701_v30 }
  0x6e   :  { %v324_v28 = vld [vmem:[#allocation5 + $0x700] sm:$0xff]  ;;  %v4694_v32 = vcombine.high %v196_v26, %v200_v27  ;;  %3275 = vmatprep.subr.bf16.mxu1 %v4830_v25  ;;  %v4693_v38 = vcombine.low %v196_v26, %v200_v27 }
  0x6f   :  { %v328_v29 = vld [vmem:[#allocation5 + $0x720] sm:$0xff]  ;;  %3276 = vmatpush2.bf16.msra.mxu1 %v4829_v31  ;;  %v5537_v31 = vpack.c.bf16 %v91_v22, %v91_v22 }
  0x70   :  { %v4822_v33 = vcombine.high %v324_v28, %v328_v29  ;;  %v188_v34 = vld [vmem:[#allocation5 + $0x2c0] sm:$0xff]  ;;  %3236 = vmatprep.subr.bf16.mxu0 %v4694_v32  ;;  %v4821_v39 = vcombine.low %v324_v28, %v328_v29  ;;  %v5534_v28 = vpack.c.bf16 %v89_v19, %v89_v19 }
  0x71   :  { %v192_v35 = vld [vmem:[#allocation5 + $0x2e0] sm:$0xff]  ;;  %3237 = vmatpush2.bf16.msra.mxu0 %v4693_v38 }
  0x72   :  { %v316_v36 = vld [vmem:[#allocation5 + $0x6c0] sm:$0xff]  ;;  %v4686_v40 = vcombine.high %v188_v34, %v192_v35  ;;  %3277 = vmatprep.subr.bf16.mxu1 %v4822_v33  ;;  %v4685_v46 = vcombine.low %v188_v34, %v192_v35 }
  0x73   :  { %v320_v37 = vld [vmem:[#allocation5 + $0x6e0] sm:$0xff]  ;;  %3278 = vmatpush2.bf16.msra.mxu1 %v4821_v39 }
  0x74   :  { %v4814_v41 = vcombine.high %v316_v36, %v320_v37  ;;  %v180_v42 = vld [vmem:[#allocation5 + $0x280] sm:$0xff]  ;;  %3238 = vmatprep.subr.bf16.mxu0 %v4686_v40  ;;  %v4813_v47 = vcombine.low %v316_v36, %v320_v37 }
  0x75   :  { %v184_v43 = vld [vmem:[#allocation5 + $0x2a0] sm:$0xff]  ;;  %3239 = vmatpush2.bf16.msra.mxu0 %v4685_v46 }
  0x76   :  { %v308_v44 = vld [vmem:[#allocation5 + $0x680] sm:$0xff]  ;;  %v4678_v48 = vcombine.high %v180_v42, %v184_v43  ;;  %3279 = vmatprep.subr.bf16.mxu1 %v4814_v41  ;;  %v4677_v54 = vcombine.low %v180_v42, %v184_v43 }
  0x77   :  { %v312_v45 = vld [vmem:[#allocation5 + $0x6a0] sm:$0xff]  ;;  %3280 = vmatpush2.bf16.msra.mxu1 %v4813_v47 }
  0x78   :  { %v4806_v49 = vcombine.high %v308_v44, %v312_v45  ;;  %v172_v50 = vld [vmem:[#allocation5 + $0x240] sm:$0xff]  ;;  %3240 = vmatprep.subr.bf16.mxu0 %v4678_v48  ;;  %v4805_v55 = vcombine.low %v308_v44, %v312_v45 }
  0x79   :  { %v176_v51 = vld [vmem:[#allocation5 + $0x260] sm:$0xff]  ;;  %3241 = vmatpush2.bf16.msra.mxu0 %v4677_v54 }
  0x7a   :  { %v300_v52 = vld [vmem:[#allocation5 + $0x640] sm:$0xff]  ;;  %v4670_v56 = vcombine.high %v172_v50, %v176_v51  ;;  %3281 = vmatprep.subr.bf16.mxu1 %v4806_v49  ;;  %v4669_v0 = vcombine.low %v172_v50, %v176_v51 }
  0x7b   :  { %v304_v53 = vld [vmem:[#allocation5 + $0x660] sm:$0xff]  ;;  %3282 = vmatpush2.bf16.msra.mxu1 %v4805_v55 }
  0x7c   :  { %v4798_v57 = vcombine.high %v300_v52, %v304_v53  ;;  %v164_v60 = vld [vmem:[#allocation5 + $0x200] sm:$0xff]  ;;  %3242 = vmatprep.subr.bf16.mxu0 %v4670_v56  ;;  %v4797_v1 = vcombine.low %v300_v52, %v304_v53 }
  0x7d   :  { %v168_v61 = vld [vmem:[#allocation5 + $0x220] sm:$0xff]  ;;  %3243 = vmatpush2.bf16.msra.mxu0 %v4669_v0 }
  0x7e   :  { %v292_v62 = vld [vmem:[#allocation5 + $0x600] sm:$0xff]  ;;  %v4662_v2 = vcombine.high %v164_v60, %v168_v61  ;;  %3283 = vmatprep.subr.bf16.mxu1 %v4798_v57  ;;  %v4661_v8 = vcombine.low %v164_v60, %v168_v61 }
  0x7f   :  { %v296_v63 = vld [vmem:[#allocation5 + $0x620] sm:$0xff]  ;;  %3284 = vmatpush2.bf16.msra.mxu1 %v4797_v1 }
  0x80   :  { %v4790_v3 = vcombine.high %v292_v62, %v296_v63  ;;  %v412_v4 = vld [vmem:[#allocation5 + $0x9c0] sm:$0xff]  ;;  %3244 = vmatprep.subr.bf16.mxu0 %v4662_v2  ;;  %v4789_v10 = vcombine.low %v292_v62, %v296_v63 }
  0x81   :  { %v416_v5 = vld [vmem:[#allocation5 + $0x9e0] sm:$0xff]  ;;  %3245 = vmatpush2.bf16.msra.mxu0 %v4661_v8 }
  0x82   :  { %v540_v6 = vld [vmem:[#allocation5 + $0xdc0] sm:$0xff]  ;;  %v4910_v12 = vcombine.high %v412_v4, %v416_v5  ;;  %3285 = vmatprep.subr.bf16.mxu1 %v4790_v3  ;;  %v4909_v21 = vcombine.low %v412_v4, %v416_v5 }
  0x83   :  { %v544_v7 = vld [vmem:[#allocation5 + $0xde0] sm:$0xff]  ;;  %3286 = vmatpush2.bf16.msra.mxu1 %v4789_v10 }
  0x84   :  { %v84_v9 = vld [vmem:[#allocation2] sm:$0xff]  ;;  %v5038_v13 = vcombine.high %v540_v6, %v544_v7  ;;  %3296 = vmatprep.subr.bf16.mxu0 %v4910_v12  ;;  %v5037_v23 = vcombine.low %v540_v6, %v544_v7 }
  0x85   :  { %v404_v14 = vld [vmem:[#allocation5 + $0x980] sm:$0xff]  ;;  %v5530_v16 = vpack.c.bf16 %v84_v9, %v84_v9 }
  0x86   :  { %v408_v15 = vld [vmem:[#allocation5 + $0x9a0] sm:$0xff]  ;;  %3337 = vmatprep.subr.bf16.mxu1 %v5038_v13  ;;  %3288 = vmatmul.mubr.bf16.vlgmr.msra.gmra.mxu1 %v5532_v20 }
  0x87   :  { %v532_v17 = vld [vmem:[#allocation5 + $0xd80] sm:$0xff]  ;;  %v4902_v24 = vcombine.high %v404_v14, %v408_v15  ;;  %3247 = vmatmul.mubr.bf16.vlgmr.msra.gmra.mxu0 %v5530_v16  ;;  %v4901_v32 = vcombine.low %v404_v14, %v408_v15  ;;  %3338 = vmatpush1.bf16.msra.mxu1 %v5037_v23 }
  0x88   :  { %v536_v18 = vld [vmem:[#allocation5 + $0xda0] sm:$0xff]  ;;  %3297 = vmatpush1.bf16.msra.mxu0 %v4909_v21  ;;  %3328 = vmatprep.mubr.bf16.mxu0 %v5534_v28 }
  0x89   :  { %v5030_v25 = vcombine.high %v532_v17, %v536_v18  ;;  %v396_v26 = vld [vmem:[#allocation5 + $0x940] sm:$0xff]  ;;  %3298 = vmatprep.subr.bf16.mxu0 %v4902_v24  ;;  %v5029_v33 = vcombine.low %v532_v17, %v536_v18  ;;  %3369 = vmatprep.mubr.bf16.mxu1 %v5537_v31 }
  0x8a   :  { %v400_v27 = vld [vmem:[#allocation5 + $0x960] sm:$0xff] }
  0x8b   :  { %v524_v29 = vld [vmem:[#allocation5 + $0xd40] sm:$0xff]  ;;  %v4894_v34 = vcombine.high %v396_v26, %v400_v27  ;;  %3339 = vmatprep.subr.bf16.mxu1 %v5030_v25  ;;  %v4893_v40 = vcombine.low %v396_v26, %v400_v27 }
  0x8c   :  { %v528_v30 = vld [vmem:[#allocation5 + $0xd60] sm:$0xff]  ;;  %3299 = vmatpush1.bf16.msra.mxu0 %v4901_v32  ;;  %3340 = vmatpush1.bf16.msra.mxu1 %v5029_v33 }
  0x8d   :  { %v388_v35 = vld [vmem:[#allocation5 + $0x900] sm:$0xff]  ;;  %v5022_v38 = vcombine.high %v524_v29, %v528_v30  ;;  %3300 = vmatprep.subr.bf16.mxu0 %v4894_v34  ;;  %v5021_v41 = vcombine.low %v524_v29, %v528_v30 }
  0x8e   :  { %v392_v36 = vld [vmem:[#allocation5 + $0x920] sm:$0xff] }
  0x8f   :  { %v516_v37 = vld [vmem:[#allocation5 + $0xd00] sm:$0xff]  ;;  %v4886_v42 = vcombine.high %v388_v35, %v392_v36  ;;  %3341 = vmatprep.subr.bf16.mxu1 %v5022_v38  ;;  %v4885_v48 = vcombine.low %v388_v35, %v392_v36 }
  0x90   :  { %v520_v39 = vld [vmem:[#allocation5 + $0xd20] sm:$0xff]  ;;  %3301 = vmatpush1.bf16.msra.mxu0 %v4893_v40  ;;  %3342 = vmatpush1.bf16.msra.mxu1 %v5021_v41 }
  0x91   :  { %v380_v43 = vld [vmem:[#allocation5 + $0x8c0] sm:$0xff]  ;;  %v5014_v46 = vcombine.high %v516_v37, %v520_v39  ;;  %3302 = vmatprep.subr.bf16.mxu0 %v4886_v42  ;;  %v5013_v49 = vcombine.low %v516_v37, %v520_v39 }
  0x92   :  { %v384_v44 = vld [vmem:[#allocation5 + $0x8e0] sm:$0xff] }
  0x93   :  { %v508_v45 = vld [vmem:[#allocation5 + $0xcc0] sm:$0xff]  ;;  %v4878_v50 = vcombine.high %v380_v43, %v384_v44  ;;  %3343 = vmatprep.subr.bf16.mxu1 %v5014_v46  ;;  %v4877_v56 = vcombine.low %v380_v43, %v384_v44 }
  0x94   :  { %v512_v47 = vld [vmem:[#allocation5 + $0xce0] sm:$0xff]  ;;  %3303 = vmatpush1.bf16.msra.mxu0 %v4885_v48  ;;  %3344 = vmatpush1.bf16.msra.mxu1 %v5013_v49 }
  0x95   :  { %v372_v51 = vld [vmem:[#allocation5 + $0x880] sm:$0xff]  ;;  %v5006_v54 = vcombine.high %v508_v45, %v512_v47  ;;  %3304 = vmatprep.subr.bf16.mxu0 %v4878_v50  ;;  %v5005_v57 = vcombine.low %v508_v45, %v512_v47 }
  0x96   :  { %v376_v52 = vld [vmem:[#allocation5 + $0x8a0] sm:$0xff] }
  0x97   :  { %v500_v53 = vld [vmem:[#allocation5 + $0xc80] sm:$0xff]  ;;  %v4870_v60 = vcombine.high %v372_v51, %v376_v52  ;;  %3345 = vmatprep.subr.bf16.mxu1 %v5006_v54  ;;  %v4869_v2 = vcombine.low %v372_v51, %v376_v52 }
  0x98   :  { %v504_v55 = vld [vmem:[#allocation5 + $0xca0] sm:$0xff]  ;;  %3305 = vmatpush1.bf16.msra.mxu0 %v4877_v56  ;;  %3346 = vmatpush1.bf16.msra.mxu1 %v5005_v57 }
  0x99   :  { %v364_v61 = vld [vmem:[#allocation5 + $0x840] sm:$0xff]  ;;  %v4998_v0 = vcombine.high %v500_v53, %v504_v55  ;;  %3306 = vmatprep.subr.bf16.mxu0 %v4870_v60  ;;  %v4997_v3 = vcombine.low %v500_v53, %v504_v55 }
  0x9a   :  { %v368_v62 = vld [vmem:[#allocation5 + $0x860] sm:$0xff] }
  0x9b   :  { %v492_v63 = vld [vmem:[#allocation5 + $0xc40] sm:$0xff]  ;;  %v4862_v4 = vcombine.high %v364_v61, %v368_v62  ;;  %3347 = vmatprep.subr.bf16.mxu1 %v4998_v0  ;;  %v4861_v10 = vcombine.low %v364_v61, %v368_v62 }
  0x9c   :  { %v496_v1 = vld [vmem:[#allocation5 + $0xc60] sm:$0xff]  ;;  %3307 = vmatpush1.bf16.msra.mxu0 %v4869_v2  ;;  %3348 = vmatpush1.bf16.msra.mxu1 %v4997_v3 }
  0x9d   :  { %v356_v5 = vld [vmem:[#allocation5 + $0x800] sm:$0xff]  ;;  %v4990_v8 = vcombine.high %v492_v63, %v496_v1  ;;  %3308 = vmatprep.subr.bf16.mxu0 %v4862_v4  ;;  %v4989_v11 = vcombine.low %v492_v63, %v496_v1 }
  0x9e   :  { %v360_v6 = vld [vmem:[#allocation5 + $0x820] sm:$0xff] }
  0x9f   :  { %v484_v7 = vld [vmem:[#allocation5 + $0xc00] sm:$0xff]  ;;  %v4854_v12 = vcombine.high %v356_v5, %v360_v6  ;;  %3349 = vmatprep.subr.bf16.mxu1 %v4990_v8  ;;  %v4853_v19 = vcombine.low %v356_v5, %v360_v6 }
  0xa0   :  { %v488_v9 = vld [vmem:[#allocation5 + $0xc20] sm:$0xff]  ;;  %3309 = vmatpush1.bf16.msra.mxu0 %v4861_v10  ;;  %3350 = vmatpush1.bf16.msra.mxu1 %v4989_v11 }
  0xa1   :  { %v476_v13 = vld [vmem:[#allocation5 + $0xbc0] sm:$0xff]  ;;  %v4982_v17 = vcombine.high %v484_v7, %v488_v9  ;;  %3310 = vmatprep.subr.bf16.mxu0 %v4854_v12  ;;  %v4981_v21 = vcombine.low %v484_v7, %v488_v9 }
  0xa2   :  { %v480_v14 = vld [vmem:[#allocation5 + $0xbe0] sm:$0xff] }
  0xa3   :  { %v604_v15 = vld [vmem:[#allocation5 + $0xfc0] sm:$0xff]  ;;  %v4974_v22 = vcombine.high %v476_v13, %v480_v14  ;;  %3351 = vmatprep.subr.bf16.mxu1 %v4982_v17  ;;  %v4973_v29 = vcombine.low %v476_v13, %v480_v14 }
  0xa4   :  { %v608_v18 = vld [vmem:[#allocation5 + $0xfe0] sm:$0xff]  ;;  %3311 = vmatpush1.bf16.msra.mxu0 %v4853_v19  ;;  %3352 = vmatpush1.bf16.msra.mxu1 %v4981_v21  ;;  %v157_v21 = vld [vmem:[#allocation5 + $0x1c8] sm:$0xff] }
  0xa5   :  { %v468_v23 = vld [vmem:[#allocation5 + $0xb80] sm:$0xff]  ;;  %v5102_v26 = vcombine.high %v604_v15, %v608_v18  ;;  %3312 = vmatprep.subr.bf16.mxu0 %v4974_v22  ;;  %v5101_v30 = vcombine.low %v604_v15, %v608_v18  ;;  %v161_v22 = vld [vmem:[#allocation5 + $0x1e8] sm:$0xff] }
  0xa6   :  { %v472_v24 = vld [vmem:[#allocation5 + $0xba0] sm:$0xff] }
  0xa7   :  { %v596_v25 = vld [vmem:[#allocation5 + $0xf80] sm:$0xff]  ;;  %v4966_v32 = vcombine.high %v468_v23, %v472_v24  ;;  %3353 = vmatprep.subr.bf16.mxu1 %v5102_v26  ;;  %v4965_v38 = vcombine.low %v468_v23, %v472_v24  ;;  %v285_v23 = vld [vmem:[#allocation5 + $0x5c8] sm:$0xff] }
  0xa8   :  { %v600_v27 = vld [vmem:[#allocation5 + $0xfa0] sm:$0xff]  ;;  %3313 = vmatpush2.bf16.msra.mxu0 %v4973_v29  ;;  %3354 = vmatpush2.bf16.msra.mxu1 %v5101_v30  ;;  %v289_v26 = vld [vmem:[#allocation5 + $0x5e8] sm:$0xff] }
  0xa9   :  { %v460_v33 = vld [vmem:[#allocation5 + $0xb40] sm:$0xff]  ;;  %v5094_v36 = vcombine.high %v596_v25, %v600_v27  ;;  %3314 = vmatprep.subr.bf16.mxu0 %v4966_v32  ;;  %v5093_v39 = vcombine.low %v596_v25, %v600_v27  ;;  %v90_v27 = vld [vmem:[#allocation2 + $0x30] sm:$0xff]  ;;  %v4656_v32 = vcombine.high %v157_v21, %v161_v22 }
  0xaa   :  { %v464_v34 = vld [vmem:[#allocation5 + $0xb60] sm:$0xff] }
  0xab   :  { %v588_v35 = vld [vmem:[#allocation5 + $0xf40] sm:$0xff]  ;;  %v4958_v40 = vcombine.high %v460_v33, %v464_v34  ;;  %3355 = vmatprep.subr.bf16.mxu1 %v5094_v36  ;;  %v4957_v46 = vcombine.low %v460_v33, %v464_v34  ;;  %v149_v33 = vld [vmem:[#allocation5 + $0x188] sm:$0xff]  ;;  %v4784_v36 = vcombine.high %v285_v23, %v289_v26 }
  0xac   :  { %v592_v37 = vld [vmem:[#allocation5 + $0xf60] sm:$0xff]  ;;  %3315 = vmatpush2.bf16.msra.mxu0 %v4965_v38  ;;  %3356 = vmatpush2.bf16.msra.mxu1 %v5093_v39  ;;  %v153_v34 = vld [vmem:[#allocation5 + $0x1a8] sm:$0xff]  ;;  %v5544_v39 = vpack.c.bf16 %v90_v27, %v90_v27 }
  0xad   :  { %v452_v41 = vld [vmem:[#allocation5 + $0xb00] sm:$0xff]  ;;  %v5086_v44 = vcombine.high %v588_v35, %v592_v37  ;;  %3316 = vmatprep.subr.bf16.mxu0 %v4958_v40  ;;  %v5085_v47 = vcombine.low %v588_v35, %v592_v37  ;;  %v277_v35 = vld [vmem:[#allocation5 + $0x588] sm:$0xff]  ;;  %v4655_v40 = vcombine.low %v157_v21, %v161_v22 }
  0xae   :  { %v456_v42 = vld [vmem:[#allocation5 + $0xb20] sm:$0xff]  ;;  %v281_v37 = vld [vmem:[#allocation5 + $0x5a8] sm:$0xff] }
  0xaf   :  { %v580_v43 = vld [vmem:[#allocation5 + $0xf00] sm:$0xff]  ;;  %v4950_v48 = vcombine.high %v452_v41, %v456_v42  ;;  %3357 = vmatprep.subr.bf16.mxu1 %v5086_v44  ;;  %v4949_v54 = vcombine.low %v452_v41, %v456_v42  ;;  %v4783_v41 = vcombine.low %v285_v23, %v289_v26  ;;  %v4648_v42 = vcombine.high %v149_v33, %v153_v34  ;;  %v229_v26 = vld [vmem:[#allocation5 + $0x408] sm:$0xff] }
  0xb0   :  { %v584_v45 = vld [vmem:[#allocation5 + $0xf20] sm:$0xff]  ;;  %3317 = vmatpush2.bf16.msra.mxu0 %v4957_v46  ;;  %3358 = vmatpush2.bf16.msra.mxu1 %v5085_v47  ;;  %v4776_v44 = vcombine.high %v277_v35, %v281_v37  ;;  %v269_v46 = vld [vmem:[#allocation5 + $0x548] sm:$0xff] }
  0xb1   :  { %v444_v49 = vld [vmem:[#allocation5 + $0xac0] sm:$0xff]  ;;  %v5078_v52 = vcombine.high %v580_v43, %v584_v45  ;;  %3318 = vmatprep.subr.bf16.mxu0 %v4950_v48  ;;  %v5077_v55 = vcombine.low %v580_v43, %v584_v45  ;;  %v141_v43 = vld [vmem:[#allocation5 + $0x148] sm:$0xff]  ;;  %v4647_v48 = vcombine.low %v149_v33, %v153_v34 }
  0xb2   :  { %v448_v50 = vld [vmem:[#allocation5 + $0xae0] sm:$0xff]  ;;  %v145_v45 = vld [vmem:[#allocation5 + $0x168] sm:$0xff] }
  0xb3   :  { %v572_v51 = vld [vmem:[#allocation5 + $0xec0] sm:$0xff]  ;;  %v4942_v56 = vcombine.high %v444_v49, %v448_v50  ;;  %3359 = vmatprep.subr.bf16.mxu1 %v5078_v52  ;;  %v4941_v0 = vcombine.low %v444_v49, %v448_v50  ;;  %v273_v47 = vld [vmem:[#allocation5 + $0x568] sm:$0xff]  ;;  %v4775_v49 = vcombine.low %v277_v35, %v281_v37  ;;  %v4640_v50 = vcombine.high %v141_v43, %v145_v45 }
  0xb4   :  { %v576_v53 = vld [vmem:[#allocation5 + $0xee0] sm:$0xff]  ;;  %3319 = vmatpush2.bf16.msra.mxu0 %v4949_v54  ;;  %3360 = vmatpush2.bf16.msra.mxu1 %v5077_v55  ;;  %v133_v52 = vld [vmem:[#allocation5 + $0x108] sm:$0xff] }
  0xb5   :  { %v436_v57 = vld [vmem:[#allocation5 + $0xa80] sm:$0xff]  ;;  %v5070_v62 = vcombine.high %v572_v51, %v576_v53  ;;  %3320 = vmatprep.subr.bf16.mxu0 %v4942_v56  ;;  %v5069_v1 = vcombine.low %v572_v51, %v576_v53  ;;  %v4768_v51 = vcombine.high %v269_v46, %v273_v47  ;;  %v137_v53 = vld [vmem:[#allocation5 + $0x128] sm:$0xff]  ;;  %v4639_v56 = vcombine.low %v141_v43, %v145_v45 }
  0xb6   :  { %v440_v60 = vld [vmem:[#allocation5 + $0xaa0] sm:$0xff]  ;;  %v261_v54 = vld [vmem:[#allocation5 + $0x508] sm:$0xff] }
  0xb7   :  { %v564_v61 = vld [vmem:[#allocation5 + $0xe80] sm:$0xff]  ;;  %v4934_v2 = vcombine.high %v436_v57, %v440_v60  ;;  %3361 = vmatprep.subr.bf16.mxu1 %v5070_v62  ;;  %v4933_v8 = vcombine.low %v436_v57, %v440_v60  ;;  %v265_v55 = vld [vmem:[#allocation5 + $0x528] sm:$0xff]  ;;  %v4767_v57 = vcombine.low %v269_v46, %v273_v47  ;;  %v4632_v60 = vcombine.high %v133_v52, %v137_v53 }
  0xb8   :  { %v568_v63 = vld [vmem:[#allocation5 + $0xea0] sm:$0xff]  ;;  %3321 = vmatpush2.bf16.msra.mxu0 %v4941_v0  ;;  %3362 = vmatpush2.bf16.msra.mxu1 %v5069_v1  ;;  %v125_v62 = vld [vmem:[#allocation5 + $0xc8] sm:$0xff] }
  0xb9   :  { %v428_v3 = vld [vmem:[#allocation5 + $0xa40] sm:$0xff]  ;;  %v5062_v6 = vcombine.high %v564_v61, %v568_v63  ;;  %3322 = vmatprep.subr.bf16.mxu0 %v4934_v2  ;;  %v5061_v9 = vcombine.low %v564_v61, %v568_v63  ;;  %v4760_v61 = vcombine.high %v261_v54, %v265_v55  ;;  %v129_v63 = vld [vmem:[#allocation5 + $0xe8] sm:$0xff]  ;;  %v4631_v2 = vcombine.low %v133_v52, %v137_v53 }
  0xba   :  { %v432_v4 = vld [vmem:[#allocation5 + $0xa60] sm:$0xff]  ;;  %v253_v0 = vld [vmem:[#allocation5 + $0x4c8] sm:$0xff] }
  0xbb   :  { %v556_v5 = vld [vmem:[#allocation5 + $0xe40] sm:$0xff]  ;;  %v4926_v10 = vcombine.high %v428_v3, %v432_v4  ;;  %3363 = vmatprep.subr.bf16.mxu1 %v5062_v6  ;;  %v4925_v17 = vcombine.low %v428_v3, %v432_v4  ;;  %v257_v1 = vld [vmem:[#allocation5 + $0x4e8] sm:$0xff]  ;;  %v4759_v3 = vcombine.low %v261_v54, %v265_v55  ;;  %v4624_v4 = vcombine.high %v125_v62, %v129_v63 }
  0xbc   :  { %v560_v7 = vld [vmem:[#allocation5 + $0xe60] sm:$0xff]  ;;  %3323 = vmatpush2.bf16.msra.mxu0 %v4933_v8  ;;  %3364 = vmatpush2.bf16.msra.mxu1 %v5061_v9  ;;  %v117_v6 = vld [vmem:[#allocation5 + $0x88] sm:$0xff] }
  0xbd   :  { %v420_v11 = vld [vmem:[#allocation5 + $0xa00] sm:$0xff]  ;;  %v5054_v14 = vcombine.high %v556_v5, %v560_v7  ;;  %3324 = vmatprep.subr.bf16.mxu0 %v4926_v10  ;;  %v5053_v18 = vcombine.low %v556_v5, %v560_v7  ;;  %v4752_v5 = vcombine.high %v253_v0, %v257_v1  ;;  %v121_v7 = vld [vmem:[#allocation5 + $0xa8] sm:$0xff]  ;;  %v4623_v10 = vcombine.low %v125_v62, %v129_v63 }
  0xbe   :  { %v424_v12 = vld [vmem:[#allocation5 + $0xa20] sm:$0xff]  ;;  %v245_v8 = vld [vmem:[#allocation5 + $0x488] sm:$0xff] }
  0xbf   :  { %v548_v13 = vld [vmem:[#allocation5 + $0xe00] sm:$0xff]  ;;  %v4918_v19 = vcombine.high %v420_v11, %v424_v12  ;;  %3365 = vmatprep.subr.bf16.mxu1 %v5054_v14  ;;  %v4917_v29 = vcombine.low %v420_v11, %v424_v12  ;;  %v249_v9 = vld [vmem:[#allocation5 + $0x4a8] sm:$0xff]  ;;  %v4751_v11 = vcombine.low %v253_v0, %v257_v1  ;;  %v4616_v12 = vcombine.high %v117_v6, %v121_v7 }
  0xc0   :  { %v552_v15 = vld [vmem:[#allocation5 + $0xe20] sm:$0xff]  ;;  %3325 = vmatpush2.bf16.msra.mxu0 %v4925_v17  ;;  %3366 = vmatpush2.bf16.msra.mxu1 %v5053_v18  ;;  %v109_v14 = vld [vmem:[#allocation5 + $0x48] sm:$0xff]  ;;  %v4743_v21 = vcombine.low %v245_v8, %v249_v9 }
  0xc1   :  { %v5046_v24 = vcombine.high %v548_v13, %v552_v15  ;;  %v88_v25 = vld [vmem:[#allocation2 + $0x20] sm:$0xff]  ;;  %3326 = vmatprep.subr.bf16.mxu0 %v4918_v19  ;;  %v5045_v30 = vcombine.low %v548_v13, %v552_v15  ;;  %v4744_v13 = vcombine.high %v245_v8, %v249_v9  ;;  %v113_v15 = vld [vmem:[#allocation5 + $0x68] sm:$0xff]  ;;  %v4615_v19 = vcombine.low %v117_v6, %v121_v7 }
  0xc2   :  { %v5542_v38 = vpack.c.bf16 %v88_v25, %v88_v25  ;;  %v237_v17 = vld [vmem:[#allocation5 + $0x448] sm:$0xff]  ;;  %v4608_v22 = vcombine.high %v109_v14, %v113_v15 }
  0xc3   :  { %3367 = vmatprep.subr.bf16.mxu1 %v5046_v24  ;;  %v241_v18 = vld [vmem:[#allocation5 + $0x468] sm:$0xff] }
  0xc4   :  { %3327 = vmatpush2.bf16.msra.mxu0 %v4917_v29  ;;  %3368 = vmatpush2.bf16.msra.mxu1 %v5045_v30  ;;  %v4736_v23 = vcombine.high %v237_v17, %v241_v18  ;;  %v101_v24 = vld [vmem:[#allocation5 + $0x8] sm:$0xff]  ;;  %v4607_v29 = vcombine.low %v109_v14, %v113_v15  ;;  %v4735_v30 = vcombine.low %v237_v17, %v241_v18 }
  0xc5   :  { %3378 = vmatprep.subr.bf16.mxu0 %v4656_v32  ;;  %3419 = vmatprep.subr.bf16.mxu1 %v4784_v36  ;;  %v105_v25 = vld [vmem:[#allocation5 + $0x28] sm:$0xff] }
  0xc6   :  { %v233_v27 = vld [vmem:[#allocation5 + $0x428] sm:$0xff]  ;;  %v4600_v32 = vcombine.high %v101_v24, %v105_v25 }
  0xc7   :  { %3329 = vmatmul.mubr.bf16.vlgmr.msra.gmra.mxu0 %v5542_v38  ;;  %3370 = vmatmul.mubr.bf16.vlgmr.msra.gmra.mxu1 %v5544_v39  ;;  %v4728_v33 = vcombine.high %v229_v26, %v233_v27  ;;  %v221_v34 = vld [vmem:[#allocation5 + $0x3c8] sm:$0xff] }
  0xc8   :  { %3379 = vmatpush1.bf16.msra.mxu0 %v4655_v40  ;;  %3420 = vmatpush1.bf16.msra.mxu1 %v4783_v41  ;;  %v225_v35 = vld [vmem:[#allocation5 + $0x3e8] sm:$0xff]  ;;  %v4599_v40 = vcombine.low %v101_v24, %v105_v25  ;;  %v4727_v41 = vcombine.low %v229_v26, %v233_v27 }
  0xc9   :  { %3380 = vmatprep.subr.bf16.mxu0 %v4648_v42  ;;  %3421 = vmatprep.subr.bf16.mxu1 %v4776_v44  ;;  %v349_v36 = vld [vmem:[#allocation5 + $0x7c8] sm:$0xff]  ;;  %v4720_v42 = vcombine.high %v221_v34, %v225_v35 }
  0xca   :  { %3410 = vmatprep.mubr.bf16.mxu0 %v5524_v58  ;;  %3451 = vmatprep.mubr.bf16.mxu1 %v5526_v59  ;;  %v353_v37 = vld [vmem:[#allocation5 + $0x7e8] sm:$0xff] }
  0xcb   :  { %v4848_v43 = vcombine.high %v349_v36, %v353_v37  ;;  %v213_v44 = vld [vmem:[#allocation5 + $0x388] sm:$0xff] }
  0xcc   :  { %3381 = vmatpush1.bf16.msra.mxu0 %v4647_v48  ;;  %3422 = vmatpush1.bf16.msra.mxu1 %v4775_v49  ;;  %v217_v45 = vld [vmem:[#allocation5 + $0x3a8] sm:$0xff]  ;;  %v4719_v48 = vcombine.low %v221_v34, %v225_v35  ;;  %v4847_v49 = vcombine.low %v349_v36, %v353_v37 }
  0xcd   :  { %3382 = vmatprep.subr.bf16.mxu0 %v4640_v50  ;;  %3423 = vmatprep.subr.bf16.mxu1 %v4768_v51  ;;  %v341_v46 = vld [vmem:[#allocation5 + $0x788] sm:$0xff]  ;;  %v4712_v50 = vcombine.high %v213_v44, %v217_v45 }
  0xce   :  { %v345_v47 = vld [vmem:[#allocation5 + $0x7a8] sm:$0xff] }
  0xcf   :  { %v4840_v51 = vcombine.high %v341_v46, %v345_v47  ;;  %v205_v52 = vld [vmem:[#allocation5 + $0x348] sm:$0xff] }
  0xd0   :  { %3383 = vmatpush1.bf16.msra.mxu0 %v4639_v56  ;;  %3424 = vmatpush1.bf16.msra.mxu1 %v4767_v57  ;;  %v209_v53 = vld [vmem:[#allocation5 + $0x368] sm:$0xff]  ;;  %v4711_v56 = vcombine.low %v213_v44, %v217_v45  ;;  %v4839_v57 = vcombine.low %v341_v46, %v345_v47 }
  0xd1   :  { %3384 = vmatprep.subr.bf16.mxu0 %v4632_v60  ;;  %3425 = vmatprep.subr.bf16.mxu1 %v4760_v61  ;;  %v333_v54 = vld [vmem:[#allocation5 + $0x748] sm:$0xff]  ;;  %v4704_v60 = vcombine.high %v205_v52, %v209_v53 }
  0xd2   :  { %v337_v55 = vld [vmem:[#allocation5 + $0x768] sm:$0xff] }
  0xd3   :  { %v4832_v61 = vcombine.high %v333_v54, %v337_v55  ;;  %v197_v62 = vld [vmem:[#allocation5 + $0x308] sm:$0xff] }
  0xd4   :  { %3385 = vmatpush1.bf16.msra.mxu0 %v4631_v2  ;;  %3426 = vmatpush1.bf16.msra.mxu1 %v4759_v3  ;;  %v201_v63 = vld [vmem:[#allocation5 + $0x328] sm:$0xff]  ;;  %v4703_v2 = vcombine.low %v205_v52, %v209_v53  ;;  %v4831_v3 = vcombine.low %v333_v54, %v337_v55 }
  0xd5   :  { %3386 = vmatprep.subr.bf16.mxu0 %v4624_v4  ;;  %3427 = vmatprep.subr.bf16.mxu1 %v4752_v5  ;;  %v325_v0 = vld [vmem:[#allocation5 + $0x708] sm:$0xff]  ;;  %v4696_v4 = vcombine.high %v197_v62, %v201_v63 }
  0xd6   :  { %v329_v1 = vld [vmem:[#allocation5 + $0x728] sm:$0xff] }
  0xd7   :  { %v4824_v5 = vcombine.high %v325_v0, %v329_v1  ;;  %v189_v6 = vld [vmem:[#allocation5 + $0x2c8] sm:$0xff] }
  0xd8   :  { %3387 = vmatpush1.bf16.msra.mxu0 %v4623_v10  ;;  %3428 = vmatpush1.bf16.msra.mxu1 %v4751_v11  ;;  %v193_v7 = vld [vmem:[#allocation5 + $0x2e8] sm:$0xff]  ;;  %v4695_v10 = vcombine.low %v197_v62, %v201_v63  ;;  %v4823_v11 = vcombine.low %v325_v0, %v329_v1 }
  0xd9   :  { %3388 = vmatprep.subr.bf16.mxu0 %v4616_v12  ;;  %3429 = vmatprep.subr.bf16.mxu1 %v4744_v13  ;;  %v317_v8 = vld [vmem:[#allocation5 + $0x6c8] sm:$0xff]  ;;  %v4688_v12 = vcombine.high %v189_v6, %v193_v7 }
  0xda   :  { %v321_v9 = vld [vmem:[#allocation5 + $0x6e8] sm:$0xff] }
  0xdb   :  { %v4816_v13 = vcombine.high %v317_v8, %v321_v9  ;;  %v181_v14 = vld [vmem:[#allocation5 + $0x288] sm:$0xff] }
  0xdc   :  { %3389 = vmatpush1.bf16.msra.mxu0 %v4615_v19  ;;  %3430 = vmatpush1.bf16.msra.mxu1 %v4743_v21  ;;  %v185_v15 = vld [vmem:[#allocation5 + $0x2a8] sm:$0xff]  ;;  %v4687_v19 = vcombine.low %v189_v6, %v193_v7  ;;  %v4815_v21 = vcombine.low %v317_v8, %v321_v9 }
  0xdd   :  { %3390 = vmatprep.subr.bf16.mxu0 %v4608_v22  ;;  %3431 = vmatprep.subr.bf16.mxu1 %v4736_v23  ;;  %v309_v17 = vld [vmem:[#allocation5 + $0x688] sm:$0xff]  ;;  %v4680_v22 = vcombine.high %v181_v14, %v185_v15 }
  0xde   :  { %v313_v18 = vld [vmem:[#allocation5 + $0x6a8] sm:$0xff] }
  0xdf   :  { %v4808_v23 = vcombine.high %v309_v17, %v313_v18  ;;  %v173_v24 = vld [vmem:[#allocation5 + $0x248] sm:$0xff] }
  0xe0   :  { %3391 = vmatpush1.bf16.msra.mxu0 %v4607_v29  ;;  %3432 = vmatpush1.bf16.msra.mxu1 %v4735_v30  ;;  %v177_v25 = vld [vmem:[#allocation5 + $0x268] sm:$0xff]  ;;  %v4679_v29 = vcombine.low %v181_v14, %v185_v15  ;;  %v4807_v30 = vcombine.low %v309_v17, %v313_v18 }
  0xe1   :  { %3392 = vmatprep.subr.bf16.mxu0 %v4600_v32  ;;  %3433 = vmatprep.subr.bf16.mxu1 %v4728_v33  ;;  %v301_v26 = vld [vmem:[#allocation5 + $0x648] sm:$0xff]  ;;  %v4672_v32 = vcombine.high %v173_v24, %v177_v25 }
  0xe2   :  { %v305_v27 = vld [vmem:[#allocation5 + $0x668] sm:$0xff] }
  0xe3   :  { %v4800_v33 = vcombine.high %v301_v26, %v305_v27  ;;  %v165_v34 = vld [vmem:[#allocation5 + $0x208] sm:$0xff] }
  0xe4   :  { %3393 = vmatpush1.bf16.msra.mxu0 %v4599_v40  ;;  %3434 = vmatpush1.bf16.msra.mxu1 %v4727_v41  ;;  %v169_v35 = vld [vmem:[#allocation5 + $0x228] sm:$0xff]  ;;  %v4671_v40 = vcombine.low %v173_v24, %v177_v25  ;;  %v4799_v41 = vcombine.low %v301_v26, %v305_v27 }
  0xe5   :  { %3394 = vmatprep.subr.bf16.mxu0 %v4720_v42  ;;  %3435 = vmatprep.subr.bf16.mxu1 %v4848_v43  ;;  %v293_v36 = vld [vmem:[#allocation5 + $0x608] sm:$0xff]  ;;  %v4664_v42 = vcombine.high %v165_v34, %v169_v35 }
  0xe6   :  { %v297_v37 = vld [vmem:[#allocation5 + $0x628] sm:$0xff] }
  0xe7   :  { %v4792_v43 = vcombine.high %v293_v36, %v297_v37  ;;  %v413_v44 = vld [vmem:[#allocation5 + $0x9c8] sm:$0xff] }
  0xe8   :  { %3395 = vmatpush2.bf16.msra.mxu0 %v4719_v48  ;;  %3436 = vmatpush2.bf16.msra.mxu1 %v4847_v49  ;;  %v417_v45 = vld [vmem:[#allocation5 + $0x9e8] sm:$0xff]  ;;  %v4663_v48 = vcombine.low %v165_v34, %v169_v35  ;;  %v4791_v49 = vcombine.low %v293_v36, %v297_v37 }
  0xe9   :  { %3396 = vmatprep.subr.bf16.mxu0 %v4712_v50  ;;  %3437 = vmatprep.subr.bf16.mxu1 %v4840_v51  ;;  %v541_v46 = vld [vmem:[#allocation5 + $0xdc8] sm:$0xff]  ;;  %v4912_v50 = vcombine.high %v413_v44, %v417_v45 }
  0xea   :  { %v545_v47 = vld [vmem:[#allocation5 + $0xde8] sm:$0xff] }
  0xeb   :  { %v5040_v51 = vcombine.high %v541_v46, %v545_v47  ;;  %v405_v52 = vld [vmem:[#allocation5 + $0x988] sm:$0xff] }
  0xec   :  { %3397 = vmatpush2.bf16.msra.mxu0 %v4711_v56  ;;  %3438 = vmatpush2.bf16.msra.mxu1 %v4839_v57  ;;  %v409_v53 = vld [vmem:[#allocation5 + $0x9a8] sm:$0xff]  ;;  %v4911_v56 = vcombine.low %v413_v44, %v417_v45  ;;  %v5039_v57 = vcombine.low %v541_v46, %v545_v47 }
  0xed   :  { %3398 = vmatprep.subr.bf16.mxu0 %v4704_v60  ;;  %3439 = vmatprep.subr.bf16.mxu1 %v4832_v61  ;;  %v533_v54 = vld [vmem:[#allocation5 + $0xd88] sm:$0xff]  ;;  %v4904_v60 = vcombine.high %v405_v52, %v409_v53 }
  0xee   :  { %v537_v55 = vld [vmem:[#allocation5 + $0xda8] sm:$0xff] }
  0xef   :  { %v5032_v61 = vcombine.high %v533_v54, %v537_v55  ;;  %v397_v62 = vld [vmem:[#allocation5 + $0x948] sm:$0xff] }
  0xf0   :  { %3399 = vmatpush2.bf16.msra.mxu0 %v4703_v2  ;;  %3440 = vmatpush2.bf16.msra.mxu1 %v4831_v3  ;;  %v401_v63 = vld [vmem:[#allocation5 + $0x968] sm:$0xff]  ;;  %v4903_v2 = vcombine.low %v405_v52, %v409_v53  ;;  %v5031_v3 = vcombine.low %v533_v54, %v537_v55 }
  0xf1   :  { %3400 = vmatprep.subr.bf16.mxu0 %v4696_v4  ;;  %3441 = vmatprep.subr.bf16.mxu1 %v4824_v5  ;;  %v525_v0 = vld [vmem:[#allocation5 + $0xd48] sm:$0xff]  ;;  %v4896_v4 = vcombine.high %v397_v62, %v401_v63 }
  0xf2   :  { %v529_v1 = vld [vmem:[#allocation5 + $0xd68] sm:$0xff] }
  0xf3   :  { %v5024_v5 = vcombine.high %v525_v0, %v529_v1  ;;  %v389_v6 = vld [vmem:[#allocation5 + $0x908] sm:$0xff] }
  0xf4   :  { %3401 = vmatpush2.bf16.msra.mxu0 %v4695_v10  ;;  %3442 = vmatpush2.bf16.msra.mxu1 %v4823_v11  ;;  %v393_v7 = vld [vmem:[#allocation5 + $0x928] sm:$0xff]  ;;  %v4895_v10 = vcombine.low %v397_v62, %v401_v63  ;;  %v5023_v11 = vcombine.low %v525_v0, %v529_v1 }
  0xf5   :  { %3402 = vmatprep.subr.bf16.mxu0 %v4688_v12  ;;  %3443 = vmatprep.subr.bf16.mxu1 %v4816_v13  ;;  %v517_v8 = vld [vmem:[#allocation5 + $0xd08] sm:$0xff]  ;;  %v4888_v12 = vcombine.high %v389_v6, %v393_v7 }
  0xf6   :  { %v521_v9 = vld [vmem:[#allocation5 + $0xd28] sm:$0xff] }
  0xf7   :  { %v5016_v13 = vcombine.high %v517_v8, %v521_v9  ;;  %v381_v14 = vld [vmem:[#allocation5 + $0x8c8] sm:$0xff] }
  0xf8   :  { %3403 = vmatpush2.bf16.msra.mxu0 %v4687_v19  ;;  %3444 = vmatpush2.bf16.msra.mxu1 %v4815_v21  ;;  %v385_v15 = vld [vmem:[#allocation5 + $0x8e8] sm:$0xff]  ;;  %v4887_v19 = vcombine.low %v389_v6, %v393_v7  ;;  %v5015_v21 = vcombine.low %v517_v8, %v521_v9 }
  0xf9   :  { %3404 = vmatprep.subr.bf16.mxu0 %v4680_v22  ;;  %3445 = vmatprep.subr.bf16.mxu1 %v4808_v23  ;;  %v509_v17 = vld [vmem:[#allocation5 + $0xcc8] sm:$0xff]  ;;  %v4880_v22 = vcombine.high %v381_v14, %v385_v15 }
  0xfa   :  { %v513_v18 = vld [vmem:[#allocation5 + $0xce8] sm:$0xff] }
  0xfb   :  { %v5008_v23 = vcombine.high %v509_v17, %v513_v18  ;;  %v373_v24 = vld [vmem:[#allocation5 + $0x888] sm:$0xff] }
  0xfc   :  { %3405 = vmatpush2.bf16.msra.mxu0 %v4679_v29  ;;  %3446 = vmatpush2.bf16.msra.mxu1 %v4807_v30  ;;  %v377_v25 = vld [vmem:[#allocation5 + $0x8a8] sm:$0xff]  ;;  %v4879_v29 = vcombine.low %v381_v14, %v385_v15  ;;  %v5007_v30 = vcombine.low %v509_v17, %v513_v18 }
  0xfd   :  { %3406 = vmatprep.subr.bf16.mxu0 %v4672_v32  ;;  %3447 = vmatprep.subr.bf16.mxu1 %v4800_v33  ;;  %v501_v26 = vld [vmem:[#allocation5 + $0xc88] sm:$0xff]  ;;  %v4872_v32 = vcombine.high %v373_v24, %v377_v25 }
  0xfe   :  { %v505_v27 = vld [vmem:[#allocation5 + $0xca8] sm:$0xff] }
  0xff   :  { %v5000_v33 = vcombine.high %v501_v26, %v505_v27  ;;  %v365_v34 = vld [vmem:[#allocation5 + $0x848] sm:$0xff] }
 0x100   :  { %3407 = vmatpush2.bf16.msra.mxu0 %v4671_v40  ;;  %3448 = vmatpush2.bf16.msra.mxu1 %v4799_v41  ;;  %v369_v35 = vld [vmem:[#allocation5 + $0x868] sm:$0xff]  ;;  %v4871_v40 = vcombine.low %v373_v24, %v377_v25  ;;  %v4999_v41 = vcombine.low %v501_v26, %v505_v27 }
 0x101   :  { %3408 = vmatprep.subr.bf16.mxu0 %v4664_v42  ;;  %3449 = vmatprep.subr.bf16.mxu1 %v4792_v43  ;;  %v493_v36 = vld [vmem:[#allocation5 + $0xc48] sm:$0xff]  ;;  %v4864_v42 = vcombine.high %v365_v34, %v369_v35 }
 0x102   :  { %v497_v37 = vld [vmem:[#allocation5 + $0xc68] sm:$0xff] }
 0x103   :  { %v4992_v43 = vcombine.high %v493_v36, %v497_v37  ;;  %v357_v44 = vld [vmem:[#allocation5 + $0x808] sm:$0xff] }
 0x104   :  { %3409 = vmatpush2.bf16.msra.mxu0 %v4663_v48  ;;  %3450 = vmatpush2.bf16.msra.mxu1 %v4791_v49  ;;  %v361_v45 = vld [vmem:[#allocation5 + $0x828] sm:$0xff]  ;;  %v4863_v48 = vcombine.low %v365_v34, %v369_v35  ;;  %v4991_v49 = vcombine.low %v493_v36, %v497_v37 }
 0x105   :  { %3460 = vmatprep.subr.bf16.mxu0 %v4912_v50  ;;  %3501 = vmatprep.subr.bf16.mxu1 %v5040_v51  ;;  %v485_v46 = vld [vmem:[#allocation5 + $0xc08] sm:$0xff]  ;;  %v4856_v50 = vcombine.high %v357_v44, %v361_v45 }
 0x106   :  { %v489_v47 = vld [vmem:[#allocation5 + $0xc28] sm:$0xff] }
 0x107   :  { %3411 = vmatmul.mubr.bf16.vlgmr.msra.gmra.mxu0 %v5530_v16  ;;  %3452 = vmatmul.mubr.bf16.vlgmr.msra.gmra.mxu1 %v5532_v20  ;;  %v4984_v51 = vcombine.high %v485_v46, %v489_v47  ;;  %v477_v52 = vld [vmem:[#allocation5 + $0xbc8] sm:$0xff] }
 0x108   :  { %3461 = vmatpush1.bf16.msra.mxu0 %v4911_v56  ;;  %3502 = vmatpush1.bf16.msra.mxu1 %v5039_v57  ;;  %v481_v53 = vld [vmem:[#allocation5 + $0xbe8] sm:$0xff]  ;;  %v4855_v56 = vcombine.low %v357_v44, %v361_v45  ;;  %v4983_v57 = vcombine.low %v485_v46, %v489_v47 }
 0x109   :  { %3462 = vmatprep.subr.bf16.mxu0 %v4904_v60  ;;  %3503 = vmatprep.subr.bf16.mxu1 %v5032_v61  ;;  %v605_v54 = vld [vmem:[#allocation5 + $0xfc8] sm:$0xff]  ;;  %v4976_v60 = vcombine.high %v477_v52, %v481_v53 }
 0x10a   :  { %3492 = vmatprep.mubr.bf16.mxu0 %v5534_v28  ;;  %3533 = vmatprep.mubr.bf16.mxu1 %v5537_v31  ;;  %v609_v55 = vld [vmem:[#allocation5 + $0xfe8] sm:$0xff] }
 0x10b   :  { %v5104_v61 = vcombine.high %v605_v54, %v609_v55  ;;  %v469_v62 = vld [vmem:[#allocation5 + $0xb88] sm:$0xff] }
 0x10c   :  { %3463 = vmatpush1.bf16.msra.mxu0 %v4903_v2  ;;  %3504 = vmatpush1.bf16.msra.mxu1 %v5031_v3  ;;  %v473_v63 = vld [vmem:[#allocation5 + $0xba8] sm:$0xff]  ;;  %v4975_v2 = vcombine.low %v477_v52, %v481_v53  ;;  %v5103_v3 = vcombine.low %v605_v54, %v609_v55 }
 0x10d   :  { %3464 = vmatprep.subr.bf16.mxu0 %v4896_v4  ;;  %3505 = vmatprep.subr.bf16.mxu1 %v5024_v5  ;;  %v597_v0 = vld [vmem:[#allocation5 + $0xf88] sm:$0xff]  ;;  %v4968_v4 = vcombine.high %v469_v62, %v473_v63 }
 0x10e   :  { %v601_v1 = vld [vmem:[#allocation5 + $0xfa8] sm:$0xff] }
 0x10f   :  { %v5096_v5 = vcombine.high %v597_v0, %v601_v1  ;;  %v461_v6 = vld [vmem:[#allocation5 + $0xb48] sm:$0xff] }
 0x110   :  { %3465 = vmatpush1.bf16.msra.mxu0 %v4895_v10  ;;  %3506 = vmatpush1.bf16.msra.mxu1 %v5023_v11  ;;  %v465_v7 = vld [vmem:[#allocation5 + $0xb68] sm:$0xff]  ;;  %v4967_v10 = vcombine.low %v469_v62, %v473_v63  ;;  %v5095_v11 = vcombine.low %v597_v0, %v601_v1  ;;  %v158_v0 = vld [vmem:[#allocation5 + $0x1d0] sm:$0xff] }
 0x111   :  { %3466 = vmatprep.subr.bf16.mxu0 %v4888_v12  ;;  %3507 = vmatprep.subr.bf16.mxu1 %v5016_v13  ;;  %v589_v8 = vld [vmem:[#allocation5 + $0xf48] sm:$0xff]  ;;  %v4960_v12 = vcombine.high %v461_v6, %v465_v7  ;;  %v162_v1 = vld [vmem:[#allocation5 + $0x1f0] sm:$0xff] }
 0x112   :  { %v593_v9 = vld [vmem:[#allocation5 + $0xf68] sm:$0xff] }
 0x113   :  { %v5088_v13 = vcombine.high %v589_v8, %v593_v9  ;;  %v453_v14 = vld [vmem:[#allocation5 + $0xb08] sm:$0xff] }
 0x114   :  { %3467 = vmatpush1.bf16.msra.mxu0 %v4887_v19  ;;  %3508 = vmatpush1.bf16.msra.mxu1 %v5015_v21  ;;  %v457_v15 = vld [vmem:[#allocation5 + $0xb28] sm:$0xff]  ;;  %v4959_v19 = vcombine.low %v461_v6, %v465_v7  ;;  %v5087_v21 = vcombine.low %v589_v8, %v593_v9  ;;  %v5558_v7 = vld [vmem:[#allocation7] sm:$0xff]  ;;  %v4658_v8 = vcombine.high %v158_v0, %v162_v1 }
 0x115   :  { %3468 = vmatprep.subr.bf16.mxu0 %v4880_v22  ;;  %3509 = vmatprep.subr.bf16.mxu1 %v5008_v23  ;;  %v581_v17 = vld [vmem:[#allocation5 + $0xf08] sm:$0xff]  ;;  %v4952_v22 = vcombine.high %v453_v14, %v457_v15 }
 0x116   :  { %v585_v18 = vld [vmem:[#allocation5 + $0xf28] sm:$0xff] }
 0x117   :  { %v5080_v23 = vcombine.high %v581_v17, %v585_v18  ;;  %v445_v24 = vld [vmem:[#allocation5 + $0xac8] sm:$0xff] }
 0x118   :  { %3469 = vmatpush1.bf16.msra.mxu0 %v4879_v29  ;;  %3510 = vmatpush1.bf16.msra.mxu1 %v5007_v30  ;;  %v449_v25 = vld [vmem:[#allocation5 + $0xae8] sm:$0xff]  ;;  %v4951_v29 = vcombine.low %v453_v14, %v457_v15  ;;  %v5079_v30 = vcombine.low %v581_v17, %v585_v18  ;;  %v282_v14 = vld [vmem:[#allocation5 + $0x5b0] sm:$0xff]  ;;  %v4657_v17 = vcombine.low %v158_v0, %v162_v1 }
 0x119   :  { %3470 = vmatprep.subr.bf16.mxu0 %v4872_v32  ;;  %3511 = vmatprep.subr.bf16.mxu1 %v5000_v33  ;;  %v573_v26 = vld [vmem:[#allocation5 + $0xec8] sm:$0xff]  ;;  %v4944_v32 = vcombine.high %v445_v24, %v449_v25 }
 0x11a   :  { %v577_v27 = vld [vmem:[#allocation5 + $0xee8] sm:$0xff] }
 0x11b   :  { %v5072_v33 = vcombine.high %v573_v26, %v577_v27  ;;  %v437_v34 = vld [vmem:[#allocation5 + $0xa88] sm:$0xff] }
 0x11c   :  { %3471 = vmatpush1.bf16.msra.mxu0 %v4871_v40  ;;  %3512 = vmatpush1.bf16.msra.mxu1 %v4999_v41  ;;  %v441_v35 = vld [vmem:[#allocation5 + $0xaa8] sm:$0xff]  ;;  %v4943_v40 = vcombine.low %v445_v24, %v449_v25  ;;  %v5071_v41 = vcombine.low %v573_v26, %v577_v27  ;;  %v146_v24 = vld [vmem:[#allocation5 + $0x170] sm:$0xff] }
 0x11d   :  { %3472 = vmatprep.subr.bf16.mxu0 %v4864_v42  ;;  %3513 = vmatprep.subr.bf16.mxu1 %v4992_v43  ;;  %v565_v36 = vld [vmem:[#allocation5 + $0xe88] sm:$0xff]  ;;  %v4936_v42 = vcombine.high %v437_v34, %v441_v35  ;;  %v270_v26 = vld [vmem:[#allocation5 + $0x550] sm:$0xff] }
 0x11e   :  { %v569_v37 = vld [vmem:[#allocation5 + $0xea8] sm:$0xff]  ;;  %v274_v27 = vld [vmem:[#allocation5 + $0x570] sm:$0xff] }
 0x11f   :  { %v5064_v43 = vcombine.high %v565_v36, %v569_v37  ;;  %v429_v44 = vld [vmem:[#allocation5 + $0xa48] sm:$0xff] }
 0x120   :  { %3473 = vmatpush1.bf16.msra.mxu0 %v4863_v48  ;;  %3514 = vmatpush1.bf16.msra.mxu1 %v4991_v49  ;;  %v433_v45 = vld [vmem:[#allocation5 + $0xa68] sm:$0xff]  ;;  %v4935_v48 = vcombine.low %v437_v34, %v441_v35  ;;  %v614_v49 = vlaneseq }
 0x121   :  { %3474 = vmatprep.subr.bf16.mxu0 %v4856_v50  ;;  %3515 = vmatprep.subr.bf16.mxu1 %v4984_v51  ;;  %v557_v46 = vld [vmem:[#allocation5 + $0xe48] sm:$0xff]  ;;  %v5063_v50 = vcombine.low %v565_v36, %v569_v37  ;;  %v4928_v51 = vcombine.high %v429_v44, %v433_v45 }
 0x122   :  { %v561_v47 = vld [vmem:[#allocation5 + $0xe68] sm:$0xff] }
 0x123   :  { %v5056_v52 = vcombine.high %v557_v46, %v561_v47  ;;  %v421_v53 = vld [vmem:[#allocation5 + $0xa08] sm:$0xff] }
 0x124   :  { %3475 = vmatpush1.bf16.msra.mxu0 %v4855_v56  ;;  %3516 = vmatpush1.bf16.msra.mxu1 %v4983_v57  ;;  %v425_v54 = vld [vmem:[#allocation5 + $0xa28] sm:$0xff]  ;;  %v4927_v57 = vcombine.low %v429_v44, %v433_v45  ;;  %v262_v45 = vld [vmem:[#allocation5 + $0x510] sm:$0xff] }
 0x125   :  { %3476 = vmatprep.subr.bf16.mxu0 %v4976_v60  ;;  %3517 = vmatprep.subr.bf16.mxu1 %v5104_v61  ;;  %v549_v55 = vld [vmem:[#allocation5 + $0xe08] sm:$0xff]  ;;  %v5555_v60 = vshrl.u32 %v614_v49, 7  ;;  %v5055_v61 = vcombine.low %v557_v46, %v561_v47  ;;  %v4920_v62 = vcombine.high %v421_v53, %v425_v54  ;;  %v266_v46 = vld [vmem:[#allocation5 + $0x530] sm:$0xff] }
 0x126   :  { %v553_v56 = vld [vmem:[#allocation5 + $0xe28] sm:$0xff]  ;;  %v4761_v0 = vcombine.low %v262_v45, %v266_v46 }
 0x127   :  { %v5048_v63 = vcombine.high %v549_v55, %v553_v56  ;;  %v5047_v6 = vcombine.low %v549_v55, %v553_v56  ;;  %v4762_v55 = vcombine.high %v262_v45, %v266_v46  ;;  %v126_v56 = vld [vmem:[#allocation5 + $0xd0] sm:$0xff] }
 0x128   :  { %3477 = vmatpush2.bf16.msra.mxu0 %v4975_v2  ;;  %3518 = vmatpush2.bf16.msra.mxu1 %v5103_v3  ;;  %v286_v2 = vld [vmem:[#allocation5 + $0x5d0] sm:$0xff] }
 0x129   :  { %3478 = vmatprep.subr.bf16.mxu0 %v4968_v4  ;;  %3519 = vmatprep.subr.bf16.mxu1 %v5096_v5  ;;  %v290_v3 = vld [vmem:[#allocation5 + $0x5f0] sm:$0xff]  ;;  %v4919_v4 = vcombine.low %v421_v53, %v425_v54  ;;  %v616_v5 = vsub.s32 0, %v5555_v60 }
 0x12a   :  { %v4786_v9 = vcombine.high %v286_v2, %v290_v3  ;;  %v4785_v18 = vcombine.low %v286_v2, %v290_v3  ;;  %v118_v3 = vld [vmem:[#allocation5 + $0x90] sm:$0xff] }
 0x12b   :  { %v617_v15 = vrot.slane %v5558_v7, %v616_v5  ;;  %v246_v5 = vld [vmem:[#allocation5 + $0x490] sm:$0xff] }
 0x12c   :  { %3479 = vmatpush2.bf16.msra.mxu0 %v4967_v10  ;;  %3520 = vmatpush2.bf16.msra.mxu1 %v5095_v11  ;;  %v620_v10 = vsub.s32 1, %v5555_v60  ;;  %v150_v11 = vld [vmem:[#allocation5 + $0x190] sm:$0xff] }
 0x12d   :  { %3480 = vmatprep.subr.bf16.mxu0 %v4960_v12  ;;  %3521 = vmatprep.subr.bf16.mxu1 %v5088_v13  ;;  %v154_v12 = vld [vmem:[#allocation5 + $0x1b0] sm:$0xff] }
 0x12e   :  { %v278_v13 = vld [vmem:[#allocation5 + $0x590] sm:$0xff] }
 0x12f   :  { %v4777_v34 = vcombine.low %v278_v13, %v282_v14  ;;  %v342_v45 = vld [vmem:[#allocation5 + $0x790] sm:$0xff] }
 0x130   :  { %3481 = vmatpush2.bf16.msra.mxu0 %v4959_v19  ;;  %3522 = vmatpush2.bf16.msra.mxu1 %v5087_v21  ;;  %v4650_v19 = vcombine.high %v150_v11, %v154_v12  ;;  %v621_v21 = vrot.slane %v5558_v7, %v620_v10  ;;  %v346_v46 = vld [vmem:[#allocation5 + $0x7b0] sm:$0xff] }
 0x131   :  { %3482 = vmatprep.subr.bf16.mxu0 %v4952_v22  ;;  %3523 = vmatprep.subr.bf16.mxu1 %v5080_v23  ;;  %v4778_v22 = vcombine.high %v278_v13, %v282_v14  ;;  %v142_v23 = vld [vmem:[#allocation5 + $0x150] sm:$0xff] }
 0x132   :  { %v4642_v35 = vcombine.high %v142_v23, %v146_v24  ;;  %v114_v13 = vld [vmem:[#allocation5 + $0x70] sm:$0xff] }
 0x133   :  { %v238_v14 = vld [vmem:[#allocation5 + $0x450] sm:$0xff] }
 0x134   :  { %3483 = vmatpush2.bf16.msra.mxu0 %v4951_v29  ;;  %3524 = vmatpush2.bf16.msra.mxu1 %v5079_v30 }
 0x135   :  { %3484 = vmatprep.subr.bf16.mxu0 %v4944_v32  ;;  %3525 = vmatprep.subr.bf16.mxu1 %v5072_v33  ;;  %v4649_v32 = vcombine.low %v150_v11, %v154_v12  ;;  %v110_v12 = vld [vmem:[#allocation5 + $0x50] sm:$0xff] }
 0x138   :  { %3485 = vmatpush2.bf16.msra.mxu0 %v4943_v40  ;;  %3526 = vmatpush2.bf16.msra.mxu1 %v5071_v41  ;;  %v4770_v41 = vcombine.high %v270_v26, %v274_v27 }
 0x139   :  { %3486 = vmatprep.subr.bf16.mxu0 %v4936_v42  ;;  %3527 = vmatprep.subr.bf16.mxu1 %v5064_v43  ;;  %v134_v42 = vld [vmem:[#allocation5 + $0x110] sm:$0xff] }
 0x13a   :  { %v138_v43 = vld [vmem:[#allocation5 + $0x130] sm:$0xff] }
 0x13b   :  { %v4634_v53 = vcombine.high %v134_v42, %v138_v43 }
 0x13c   :  { %3487 = vmatpush2.bf16.msra.mxu0 %v4935_v48  ;;  %3528 = vmatpush2.bf16.msra.mxu1 %v5063_v50  ;;  %v4641_v50 = vcombine.low %v142_v23, %v146_v24  ;;  %v106_v23 = vld [vmem:[#allocation5 + $0x30] sm:$0xff] }
 0x13d   :  { %3488 = vmatprep.subr.bf16.mxu0 %v4928_v51  ;;  %3529 = vmatprep.subr.bf16.mxu1 %v5056_v52  ;;  %v4769_v52 = vcombine.low %v270_v26, %v274_v27  ;;  %v230_v24 = vld [vmem:[#allocation5 + $0x410] sm:$0xff]  ;;  %v4609_v26 = vcombine.low %v110_v12, %v114_v13 }
 0x140   :  { %3489 = vmatpush2.bf16.msra.mxu0 %v4927_v57  ;;  %3530 = vmatpush2.bf16.msra.mxu1 %v5055_v61  ;;  %v130_v57 = vld [vmem:[#allocation5 + $0xf0] sm:$0xff] }
 0x141   :  { %3490 = vmatprep.subr.bf16.mxu0 %v4920_v62  ;;  %3531 = vmatprep.subr.bf16.mxu1 %v5048_v63  ;;  %v254_v61 = vld [vmem:[#allocation5 + $0x4d0] sm:$0xff]  ;;  %v4633_v63 = vcombine.low %v134_v42, %v138_v43  ;;  %v4626_v1 = vcombine.high %v126_v56, %v130_v57 }
 0x142   :  { %v258_v62 = vld [vmem:[#allocation5 + $0x4f0] sm:$0xff] }
 0x143   :  { %v4754_v2 = vcombine.high %v254_v61, %v258_v62  ;;  %v214_v43 = vld [vmem:[#allocation5 + $0x390] sm:$0xff] }
 0x144   :  { %3491 = vmatpush2.bf16.msra.mxu0 %v4919_v4  ;;  %3532 = vmatpush2.bf16.msra.mxu1 %v5047_v6  ;;  %v122_v4 = vld [vmem:[#allocation5 + $0xb0] sm:$0xff] }
 0x145   :  { %3542 = vmatprep.subr.bf16.mxu0 %v4658_v8  ;;  %3583 = vmatprep.subr.bf16.mxu1 %v4786_v9  ;;  %v250_v6 = vld [vmem:[#allocation5 + $0x4b0] sm:$0xff]  ;;  %v4625_v8 = vcombine.low %v126_v56, %v130_v57  ;;  %v4753_v9 = vcombine.low %v254_v61, %v258_v62  ;;  %v4618_v10 = vcombine.high %v118_v3, %v122_v4 }
 0x146   :  { %v3289_v30 = vpop.f32.mrf.mxu1  ;;  %v4746_v11 = vcombine.high %v246_v5, %v250_v6  ;;  %v338_v56 = vld [vmem:[#allocation5 + $0x770] sm:$0xff]  ;;  %v4841_v61 = vcombine.low %v342_v45, %v346_v46 }
 0x147   :  { %v3248_v25 = vpop.f32.mrf.mxu0  ;;  %3493 = vmatmul.mubr.bf16.vlgmr.msra.gmra.mxu0 %v5542_v38  ;;  %3534 = vmatmul.mubr.bf16.vlgmr.msra.gmra.mxu1 %v5544_v39 }
 0x148   :  { %v3249_v29 = vadd.f32 %v3248_v25, %v617_v15  ;;  %3543 = vmatpush1.bf16.msra.mxu0 %v4657_v17  ;;  %3584 = vmatpush1.bf16.msra.mxu1 %v4785_v18  ;;  %v3291_v40 = vpop.f32.mrf.mxu1  ;;  %v242_v15 = vld [vmem:[#allocation5 + $0x470] sm:$0xff]  ;;  %v4617_v17 = vcombine.low %v118_v3, %v122_v4  ;;  %v4745_v18 = vcombine.low %v246_v5, %v250_v6 }
 0x149   :  { %v3250_v33 = vpop.f32.mrf.mxu0  ;;  %3544 = vmatprep.subr.bf16.mxu0 %v4650_v19  ;;  %3585 = vmatprep.subr.bf16.mxu1 %v4778_v22  ;;  %v4610_v19 = vcombine.high %v110_v12, %v114_v13  ;;  %v102_v22 = vld [vmem:[#allocation5 + $0x10] sm:$0xff]  ;;  %v4737_v27 = vcombine.low %v238_v14, %v242_v15 }
 0x14a   :  { %v5565_v36 = vadd.f32 %v3289_v30, %v3249_v29  ;;  %v3251_v37 = vadd.f32 %v3250_v33, %v621_v21  ;;  %3574 = vmatprep.mubr.bf16.mxu0 %v5524_v58  ;;  %3615 = vmatprep.mubr.bf16.mxu1 %v5526_v59  ;;  %v3293_v48 = vpop.f32.mrf.mxu1  ;;  %v4738_v21 = vcombine.high %v238_v14, %v242_v15  ;;  %v234_v25 = vld [vmem:[#allocation5 + $0x430] sm:$0xff] }
 0x14b   :  { %v3252_v44 = vpop.f32.mrf.mxu0  ;;  %v4602_v29 = vcombine.high %v102_v22, %v106_v23  ;;  %v4730_v30 = vcombine.high %v230_v24, %v234_v25  ;;  %v226_v33 = vld [vmem:[#allocation5 + $0x3f0] sm:$0xff] }
 0x14c   :  { %v5569_v47 = vadd.f32 %v3291_v40, %v3251_v37  ;;  %3545 = vmatpush1.bf16.msra.mxu0 %v4649_v32  ;;  %3586 = vmatpush1.bf16.msra.mxu1 %v4777_v34  ;;  %v3294_v54 = vpop.f32.mrf.mxu1  ;;  %v222_v32 = vld [vmem:[#allocation5 + $0x3d0] sm:$0xff]  ;;  %v4601_v37 = vcombine.low %v102_v22, %v106_v23  ;;  %v4729_v40 = vcombine.low %v230_v24, %v234_v25 }
 0x14d   :  { %v3253_v51 = vpop.f32.mrf.mxu0  ;;  %3546 = vmatprep.subr.bf16.mxu0 %v4642_v35  ;;  %3587 = vmatprep.subr.bf16.mxu1 %v4770_v41  ;;  %v350_v34 = vld [vmem:[#allocation5 + $0x7d0] sm:$0xff]  ;;  %v4722_v41 = vcombine.high %v222_v32, %v226_v33  ;;  %v4721_v48 = vcombine.low %v222_v32, %v226_v33 }
 0x14e   :  { %v354_v35 = vld [vmem:[#allocation5 + $0x7f0] sm:$0xff] }
 0x14f   :  { %v4850_v42 = vcombine.high %v350_v34, %v354_v35  ;;  %v218_v44 = vld [vmem:[#allocation5 + $0x3b0] sm:$0xff] }
 0x150   :  { %3547 = vmatpush1.bf16.msra.mxu0 %v4641_v50  ;;  %3588 = vmatpush1.bf16.msra.mxu1 %v4769_v52  ;;  %v4849_v50 = vcombine.low %v350_v34, %v354_v35  ;;  %v4714_v51 = vcombine.high %v214_v43, %v218_v44  ;;  %v4842_v52 = vcombine.high %v342_v45, %v346_v46  ;;  %v210_v54 = vld [vmem:[#allocation5 + $0x370] sm:$0xff] }
 0x151   :  { %3548 = vmatprep.subr.bf16.mxu0 %v4634_v53  ;;  %3589 = vmatprep.subr.bf16.mxu1 %v4762_v55  ;;  %v206_v53 = vld [vmem:[#allocation5 + $0x350] sm:$0xff]  ;;  %v4713_v57 = vcombine.low %v214_v43, %v218_v44 }
 0x152   :  { %v334_v55 = vld [vmem:[#allocation5 + $0x750] sm:$0xff]  ;;  %v4706_v62 = vcombine.high %v206_v53, %v210_v54  ;;  %v4705_v4 = vcombine.low %v206_v53, %v210_v54 }
 0x153   :  { %v330_v3 = vld [vmem:[#allocation5 + $0x730] sm:$0xff]  ;;  %v4833_v5 = vcombine.low %v334_v55, %v338_v56 }
 0x154   :  { %3549 = vmatpush1.bf16.msra.mxu0 %v4633_v63  ;;  %3590 = vmatpush1.bf16.msra.mxu1 %v4761_v0  ;;  %v4834_v63 = vcombine.high %v334_v55, %v338_v56  ;;  %v198_v0 = vld [vmem:[#allocation5 + $0x310] sm:$0xff] }
 0x155   :  { %3550 = vmatprep.subr.bf16.mxu0 %v4626_v1  ;;  %3591 = vmatprep.subr.bf16.mxu1 %v4754_v2  ;;  %v202_v1 = vld [vmem:[#allocation5 + $0x330] sm:$0xff] }
 0x156   :  { %v326_v2 = vld [vmem:[#allocation5 + $0x710] sm:$0xff]  ;;  %v4698_v6 = vcombine.high %v198_v0, %v202_v1  ;;  %v4697_v13 = vcombine.low %v198_v0, %v202_v1 }
 0x157   :  { %v322_v12 = vld [vmem:[#allocation5 + $0x6f0] sm:$0xff]  ;;  %v4825_v14 = vcombine.low %v326_v2, %v330_v3 }
 0x158   :  { %3551 = vmatpush1.bf16.msra.mxu0 %v4625_v8  ;;  %3592 = vmatpush1.bf16.msra.mxu1 %v4753_v9  ;;  %v4826_v8 = vcombine.high %v326_v2, %v330_v3  ;;  %v190_v9 = vld [vmem:[#allocation5 + $0x2d0] sm:$0xff] }
 0x159   :  { %3552 = vmatprep.subr.bf16.mxu0 %v4618_v10  ;;  %3593 = vmatprep.subr.bf16.mxu1 %v4746_v11  ;;  %v194_v10 = vld [vmem:[#allocation5 + $0x2f0] sm:$0xff] }
 0x15a   :  { %v318_v11 = vld [vmem:[#allocation5 + $0x6d0] sm:$0xff]  ;;  %v4690_v15 = vcombine.high %v190_v9, %v194_v10  ;;  %v4689_v23 = vcombine.low %v190_v9, %v194_v10 }
 0x15b   :  { %v314_v22 = vld [vmem:[#allocation5 + $0x6b0] sm:$0xff]  ;;  %v4817_v24 = vcombine.low %v318_v11, %v322_v12 }
 0x15c   :  { %3553 = vmatpush1.bf16.msra.mxu0 %v4617_v17  ;;  %3594 = vmatpush1.bf16.msra.mxu1 %v4745_v18  ;;  %v4818_v17 = vcombine.high %v318_v11, %v322_v12  ;;  %v182_v18 = vld [vmem:[#allocation5 + $0x290] sm:$0xff] }
 0x15d   :  { %3554 = vmatprep.subr.bf16.mxu0 %v4610_v19  ;;  %3595 = vmatprep.subr.bf16.mxu1 %v4738_v21  ;;  %v186_v19 = vld [vmem:[#allocation5 + $0x2b0] sm:$0xff] }
 0x15e   :  { %v310_v21 = vld [vmem:[#allocation5 + $0x690] sm:$0xff]  ;;  %v4682_v25 = vcombine.high %v182_v18, %v186_v19  ;;  %v4681_v33 = vcombine.low %v182_v18, %v186_v19 }
 0x15f   :  { %v306_v32 = vld [vmem:[#allocation5 + $0x670] sm:$0xff]  ;;  %v4809_v34 = vcombine.low %v310_v21, %v314_v22 }
 0x160   :  { %3555 = vmatpush1.bf16.msra.mxu0 %v4609_v26  ;;  %3596 = vmatpush1.bf16.msra.mxu1 %v4737_v27  ;;  %v4810_v26 = vcombine.high %v310_v21, %v314_v22  ;;  %v174_v27 = vld [vmem:[#allocation5 + $0x250] sm:$0xff] }
 0x161   :  { %3556 = vmatprep.subr.bf16.mxu0 %v4602_v29  ;;  %3597 = vmatprep.subr.bf16.mxu1 %v4730_v30  ;;  %v178_v29 = vld [vmem:[#allocation5 + $0x270] sm:$0xff] }
 0x162   :  { %v302_v30 = vld [vmem:[#allocation5 + $0x650] sm:$0xff]  ;;  %v4674_v35 = vcombine.high %v174_v27, %v178_v29  ;;  %v4673_v44 = vcombine.low %v174_v27, %v178_v29 }
 0x163   :  { %v298_v43 = vld [vmem:[#allocation5 + $0x630] sm:$0xff]  ;;  %v4801_v45 = vcombine.low %v302_v30, %v306_v32 }
 0x164   :  { %3557 = vmatpush1.bf16.msra.mxu0 %v4601_v37  ;;  %3598 = vmatpush1.bf16.msra.mxu1 %v4729_v40  ;;  %v4802_v37 = vcombine.high %v302_v30, %v306_v32  ;;  %v166_v40 = vld [vmem:[#allocation5 + $0x210] sm:$0xff] }
 0x165   :  { %3558 = vmatprep.subr.bf16.mxu0 %v4722_v41  ;;  %3599 = vmatprep.subr.bf16.mxu1 %v4850_v42  ;;  %v170_v41 = vld [vmem:[#allocation5 + $0x230] sm:$0xff] }
 0x166   :  { %v294_v42 = vld [vmem:[#allocation5 + $0x610] sm:$0xff]  ;;  %v4666_v46 = vcombine.high %v166_v40, %v170_v41  ;;  %v4665_v54 = vcombine.low %v166_v40, %v170_v41 }
 0x167   :  { %v546_v53 = vld [vmem:[#allocation5 + $0xdf0] sm:$0xff]  ;;  %v4793_v55 = vcombine.low %v294_v42, %v298_v43 }
 0x168   :  { %3559 = vmatpush2.bf16.msra.mxu0 %v4721_v48  ;;  %3600 = vmatpush2.bf16.msra.mxu1 %v4849_v50  ;;  %v4794_v48 = vcombine.high %v294_v42, %v298_v43  ;;  %v414_v50 = vld [vmem:[#allocation5 + $0x9d0] sm:$0xff] }
 0x169   :  { %3560 = vmatprep.subr.bf16.mxu0 %v4714_v51  ;;  %3601 = vmatprep.subr.bf16.mxu1 %v4842_v52  ;;  %v418_v51 = vld [vmem:[#allocation5 + $0x9f0] sm:$0xff] }
 0x16a   :  { %v542_v52 = vld [vmem:[#allocation5 + $0xdd0] sm:$0xff]  ;;  %v4914_v56 = vcombine.high %v414_v50, %v418_v51  ;;  %v4913_v1 = vcombine.low %v414_v50, %v418_v51 }
 0x16b   :  { %v538_v0 = vld [vmem:[#allocation5 + $0xdb0] sm:$0xff]  ;;  %v5041_v2 = vcombine.low %v542_v52, %v546_v53 }
 0x16c   :  { %3561 = vmatpush2.bf16.msra.mxu0 %v4713_v57  ;;  %3602 = vmatpush2.bf16.msra.mxu1 %v4841_v61  ;;  %v5042_v57 = vcombine.high %v542_v52, %v546_v53  ;;  %v406_v61 = vld [vmem:[#allocation5 + $0x990] sm:$0xff] }
 0x16d   :  { %3562 = vmatprep.subr.bf16.mxu0 %v4706_v62  ;;  %3603 = vmatprep.subr.bf16.mxu1 %v4834_v63  ;;  %v410_v62 = vld [vmem:[#allocation5 + $0x9b0] sm:$0xff] }
 0x16e   :  { %v534_v63 = vld [vmem:[#allocation5 + $0xd90] sm:$0xff]  ;;  %v4906_v3 = vcombine.high %v406_v61, %v410_v62 }
 0x16f   :  { %v526_v9 = vld [vmem:[#allocation5 + $0xd50] sm:$0xff] }
 0x170   :  { %3563 = vmatpush2.bf16.msra.mxu0 %v4705_v4  ;;  %3604 = vmatpush2.bf16.msra.mxu1 %v4833_v5  ;;  %v5034_v4 = vcombine.high %v534_v63, %v538_v0  ;;  %v398_v5 = vld [vmem:[#allocation5 + $0x950] sm:$0xff] }
 0x171   :  { %3564 = vmatprep.subr.bf16.mxu0 %v4698_v6  ;;  %3605 = vmatprep.subr.bf16.mxu1 %v4826_v8  ;;  %v402_v6 = vld [vmem:[#allocation5 + $0x970] sm:$0xff] }
 0x172   :  { %v530_v10 = vld [vmem:[#allocation5 + $0xd70] sm:$0xff]  ;;  %v4897_v30 = vcombine.low %v398_v5, %v402_v6 }
 0x173   :  { %v5026_v22 = vcombine.high %v526_v9, %v530_v10  ;;  %v386_v40 = vld [vmem:[#allocation5 + $0x8f0] sm:$0xff] }
 0x174   :  { %3565 = vmatpush2.bf16.msra.mxu0 %v4697_v13  ;;  %3606 = vmatpush2.bf16.msra.mxu1 %v4825_v14  ;;  %v4905_v13 = vcombine.low %v406_v61, %v410_v62  ;;  %v510_v41 = vld [vmem:[#allocation5 + $0xcd0] sm:$0xff] }
 0x175   :  { %3566 = vmatprep.subr.bf16.mxu0 %v4690_v15  ;;  %3607 = vmatprep.subr.bf16.mxu1 %v4818_v17  ;;  %v5033_v15 = vcombine.low %v534_v63, %v538_v0  ;;  %v4898_v17 = vcombine.high %v398_v5, %v402_v6  ;;  %v514_v42 = vld [vmem:[#allocation5 + $0xcf0] sm:$0xff] }
 0x176   :  { %v378_v50 = vld [vmem:[#allocation5 + $0x8b0] sm:$0xff] }
 0x177   :  { %v502_v51 = vld [vmem:[#allocation5 + $0xc90] sm:$0xff] }
 0x178   :  { %3567 = vmatpush2.bf16.msra.mxu0 %v4689_v23  ;;  %3608 = vmatpush2.bf16.msra.mxu1 %v4817_v24  ;;  %v390_v23 = vld [vmem:[#allocation5 + $0x910] sm:$0xff] }
 0x179   :  { %3568 = vmatprep.subr.bf16.mxu0 %v4682_v25  ;;  %3609 = vmatprep.subr.bf16.mxu1 %v4810_v26  ;;  %v394_v24 = vld [vmem:[#allocation5 + $0x930] sm:$0xff] }
 0x17a   :  { %v518_v25 = vld [vmem:[#allocation5 + $0xd10] sm:$0xff]  ;;  %v4889_v43 = vcombine.low %v390_v23, %v394_v24 }
 0x17b   :  { %v522_v26 = vld [vmem:[#allocation5 + $0xd30] sm:$0xff] }
 0x17c   :  { %3569 = vmatpush2.bf16.msra.mxu0 %v4681_v33  ;;  %3610 = vmatpush2.bf16.msra.mxu1 %v4809_v34  ;;  %v4890_v33 = vcombine.high %v390_v23, %v394_v24  ;;  %v506_v52 = vld [vmem:[#allocation5 + $0xcb0] sm:$0xff] }
 0x17d   :  { %3570 = vmatprep.subr.bf16.mxu0 %v4674_v35  ;;  %3611 = vmatprep.subr.bf16.mxu1 %v4802_v37  ;;  %v5018_v35 = vcombine.high %v518_v25, %v522_v26  ;;  %v382_v37 = vld [vmem:[#allocation5 + $0x8d0] sm:$0xff] }
 0x17e   :  { %v4881_v53 = vcombine.low %v382_v37, %v386_v40  ;;  %v370_v61 = vld [vmem:[#allocation5 + $0x870] sm:$0xff] }
 0x17f   :  { %v494_v62 = vld [vmem:[#allocation5 + $0xc50] sm:$0xff] }
 0x180   :  { %3571 = vmatpush2.bf16.msra.mxu0 %v4673_v44  ;;  %3612 = vmatpush2.bf16.msra.mxu1 %v4801_v45  ;;  %v5017_v44 = vcombine.low %v518_v25, %v522_v26  ;;  %v4882_v45 = vcombine.high %v382_v37, %v386_v40  ;;  %v498_v63 = vld [vmem:[#allocation5 + $0xc70] sm:$0xff] }
 0x181   :  { %3572 = vmatprep.subr.bf16.mxu0 %v4666_v46  ;;  %3613 = vmatprep.subr.bf16.mxu1 %v4794_v48  ;;  %v5010_v46 = vcombine.high %v510_v41, %v514_v42  ;;  %v374_v48 = vld [vmem:[#allocation5 + $0x890] sm:$0xff] }
 0x182   :  { %v4873_v0 = vcombine.low %v374_v48, %v378_v50  ;;  %v362_v5 = vld [vmem:[#allocation5 + $0x830] sm:$0xff] }
 0x183   :  { %v486_v6 = vld [vmem:[#allocation5 + $0xc10] sm:$0xff] }
 0x184   :  { %3573 = vmatpush2.bf16.msra.mxu0 %v4665_v54  ;;  %3614 = vmatpush2.bf16.msra.mxu1 %v4793_v55  ;;  %v5009_v54 = vcombine.low %v510_v41, %v514_v42  ;;  %v4874_v55 = vcombine.high %v374_v48, %v378_v50  ;;  %v470_v24 = vld [vmem:[#allocation5 + $0xb90] sm:$0xff] }
 0x185   :  { %3624 = vmatprep.subr.bf16.mxu0 %v4914_v56  ;;  %3665 = vmatprep.subr.bf16.mxu1 %v5042_v57  ;;  %v5002_v56 = vcombine.high %v502_v51, %v506_v52  ;;  %v366_v57 = vld [vmem:[#allocation5 + $0x850] sm:$0xff] }
 0x186   :  { %v598_v25 = vld [vmem:[#allocation5 + $0xf90] sm:$0xff] }
 0x187   :  { %v3330_v8 = vpop.f32.mrf.mxu0  ;;  %3575 = vmatmul.mubr.bf16.vlgmr.msra.gmra.mxu0 %v5530_v16  ;;  %v3371_v12 = vpop.f32.mrf.mxu1  ;;  %3616 = vmatmul.mubr.bf16.vlgmr.msra.gmra.mxu1 %v5532_v20  ;;  %v602_v26 = vld [vmem:[#allocation5 + $0xfb0] sm:$0xff] }
 0x188   :  { %v3331_v11 = vadd.f32 %v3330_v8, %v5565_v36  ;;  %3625 = vmatpush1.bf16.msra.mxu0 %v4913_v1  ;;  %3666 = vmatpush1.bf16.msra.mxu1 %v5041_v2  ;;  %v5001_v1 = vcombine.low %v502_v51, %v506_v52  ;;  %v4866_v2 = vcombine.high %v366_v57, %v370_v61  ;;  %v490_v8 = vld [vmem:[#allocation5 + $0xc30] sm:$0xff] }
 0x189   :  { %v3332_v14 = vpop.f32.mrf.mxu0  ;;  %3626 = vmatprep.subr.bf16.mxu0 %v4906_v3  ;;  %v3373_v21 = vpop.f32.mrf.mxu1  ;;  %3667 = vmatprep.subr.bf16.mxu1 %v5034_v4  ;;  %v4994_v3 = vcombine.high %v494_v62, %v498_v63  ;;  %v358_v4 = vld [vmem:[#allocation5 + $0x810] sm:$0xff]  ;;  %v5097_v41 = vcombine.low %v598_v25, %v602_v26 }
 0x18a   :  { %v5574_v18 = vadd.f32 %v3371_v12, %v3331_v11  ;;  %v3333_v19 = vadd.f32 %v3332_v14, %v5569_v47  ;;  %3656 = vmatprep.mubr.bf16.mxu0 %v5534_v28  ;;  %3697 = vmatprep.mubr.bf16.mxu1 %v5537_v31  ;;  %v5025_v47 = vcombine.low %v526_v9, %v530_v10  ;;  %v482_v14 = vld [vmem:[#allocation5 + $0xbf0] sm:$0xff] }
 0x18b   :  { %v3334_v36 = vpop.f32.mrf.mxu0  ;;  %v3375_v29 = vpop.f32.mrf.mxu1  ;;  %v4865_v9 = vcombine.low %v366_v57, %v370_v61  ;;  %v4993_v10 = vcombine.low %v494_v62, %v498_v63  ;;  %v4858_v11 = vcombine.high %v358_v4, %v362_v5  ;;  %v4986_v12 = vcombine.high %v486_v6, %v490_v8  ;;  %v594_v37 = vld [vmem:[#allocation5 + $0xf70] sm:$0xff] }
 0x18c   :  { %v5579_v27 = vadd.f32 %v3373_v21, %v3333_v19  ;;  %3627 = vmatpush1.bf16.msra.mxu0 %v4905_v13  ;;  %3668 = vmatpush1.bf16.msra.mxu1 %v5033_v15  ;;  %v478_v13 = vld [vmem:[#allocation5 + $0xbd0] sm:$0xff]  ;;  %v4857_v19 = vcombine.low %v358_v4, %v362_v5  ;;  %v4985_v21 = vcombine.low %v486_v6, %v490_v8 }
 0x18d   :  { %v3335_v32 = vpop.f32.mrf.mxu0  ;;  %3628 = vmatprep.subr.bf16.mxu0 %v4898_v17  ;;  %v3376_v34 = vpop.f32.mrf.mxu1  ;;  %3669 = vmatprep.subr.bf16.mxu1 %v5026_v22  ;;  %v606_v15 = vld [vmem:[#allocation5 + $0xfd0] sm:$0xff]  ;;  %v4978_v22 = vcombine.high %v478_v13, %v482_v14  ;;  %v4977_v29 = vcombine.low %v478_v13, %v482_v14 }
 0x18e   :  { %v610_v17 = vld [vmem:[#allocation5 + $0xff0] sm:$0xff] }
 0x18f   :  { %v5106_v23 = vcombine.high %v606_v15, %v610_v17  ;;  %v474_v36 = vld [vmem:[#allocation5 + $0xbb0] sm:$0xff] }
 0x190   :  { %3629 = vmatpush1.bf16.msra.mxu0 %v4897_v30  ;;  %3670 = vmatpush1.bf16.msra.mxu1 %v5025_v47  ;;  %v5105_v30 = vcombine.low %v606_v15, %v610_v17  ;;  %v4970_v32 = vcombine.high %v470_v24, %v474_v36  ;;  %v5098_v47 = vcombine.high %v598_v25, %v602_v26  ;;  %v466_v34 = vld [vmem:[#allocation5 + $0xb70] sm:$0xff] }
 0x191   :  { %3630 = vmatprep.subr.bf16.mxu0 %v4890_v33  ;;  %3671 = vmatprep.subr.bf16.mxu1 %v5018_v35  ;;  %v462_v33 = vld [vmem:[#allocation5 + $0xb50] sm:$0xff]  ;;  %v4969_v40 = vcombine.low %v470_v24, %v474_v36 }
 0x192   :  { %v590_v35 = vld [vmem:[#allocation5 + $0xf50] sm:$0xff]  ;;  %v4962_v42 = vcombine.high %v462_v33, %v466_v34  ;;  %v4961_v50 = vcombine.low %v462_v33, %v466_v34  ;;  %v291_v33 = vld [vmem:[#allocation5 + $0x5f8] sm:$0xff] }
 0x193   :  { %v586_v48 = vld [vmem:[#allocation5 + $0xf30] sm:$0xff]  ;;  %v5089_v51 = vcombine.low %v590_v35, %v594_v37 }
 0x194   :  { %3631 = vmatpush1.bf16.msra.mxu0 %v4889_v43  ;;  %3672 = vmatpush1.bf16.msra.mxu1 %v5017_v44  ;;  %v5090_v43 = vcombine.high %v590_v35, %v594_v37  ;;  %v454_v44 = vld [vmem:[#allocation5 + $0xb10] sm:$0xff]  ;;  %v624_v35 = vsub.s32 2, %v5555_v60 }
 0x195   :  { %3632 = vmatprep.subr.bf16.mxu0 %v4882_v45  ;;  %3673 = vmatprep.subr.bf16.mxu1 %v5010_v46  ;;  %v458_v45 = vld [vmem:[#allocation5 + $0xb30] sm:$0xff] }
 0x196   :  { %v582_v46 = vld [vmem:[#allocation5 + $0xf10] sm:$0xff]  ;;  %v4954_v52 = vcombine.high %v454_v44, %v458_v45  ;;  %v4953_v61 = vcombine.low %v454_v44, %v458_v45  ;;  %v155_v44 = vld [vmem:[#allocation5 + $0x1b8] sm:$0xff] }
 0x197   :  { %v578_v57 = vld [vmem:[#allocation5 + $0xef0] sm:$0xff]  ;;  %v5081_v62 = vcombine.low %v582_v46, %v586_v48  ;;  %v279_v45 = vld [vmem:[#allocation5 + $0x598] sm:$0xff] }
 0x198   :  { %3633 = vmatpush1.bf16.msra.mxu0 %v4881_v53  ;;  %3674 = vmatpush1.bf16.msra.mxu1 %v5009_v54  ;;  %v5082_v53 = vcombine.high %v582_v46, %v586_v48  ;;  %v446_v54 = vld [vmem:[#allocation5 + $0xad0] sm:$0xff]  ;;  %v283_v46 = vld [vmem:[#allocation5 + $0x5b8] sm:$0xff]  ;;  %v625_v48 = vrot.slane %v5558_v7, %v624_v35 }
 0x199   :  { %3634 = vmatprep.subr.bf16.mxu0 %v4874_v55  ;;  %3675 = vmatprep.subr.bf16.mxu1 %v5002_v56  ;;  %v450_v55 = vld [vmem:[#allocation5 + $0xaf0] sm:$0xff]  ;;  %v251_v35 = vld [vmem:[#allocation5 + $0x4b8] sm:$0xff] }
 0x19a   :  { %v574_v56 = vld [vmem:[#allocation5 + $0xed0] sm:$0xff]  ;;  %v4946_v63 = vcombine.high %v446_v54, %v450_v55  ;;  %v4945_v5 = vcombine.low %v446_v54, %v450_v55  ;;  %v4780_v54 = vcombine.high %v279_v45, %v283_v46  ;;  %v143_v55 = vld [vmem:[#allocation5 + $0x158] sm:$0xff] }
 0x19b   :  { %v570_v4 = vld [vmem:[#allocation5 + $0xeb0] sm:$0xff]  ;;  %v5073_v6 = vcombine.low %v574_v56, %v578_v57 }
 0x19c   :  { %3635 = vmatpush1.bf16.msra.mxu0 %v4873_v0  ;;  %3676 = vmatpush1.bf16.msra.mxu1 %v5001_v1  ;;  %v5074_v0 = vcombine.high %v574_v56, %v578_v57  ;;  %v438_v1 = vld [vmem:[#allocation5 + $0xa90] sm:$0xff]  ;;  %v147_v56 = vld [vmem:[#allocation5 + $0x178] sm:$0xff] }
 0x19d   :  { %3636 = vmatprep.subr.bf16.mxu0 %v4866_v2  ;;  %3677 = vmatprep.subr.bf16.mxu1 %v4994_v3  ;;  %v442_v2 = vld [vmem:[#allocation5 + $0xab0] sm:$0xff] }
 0x19e   :  { %v566_v3 = vld [vmem:[#allocation5 + $0xe90] sm:$0xff]  ;;  %v4938_v8 = vcombine.high %v438_v1, %v442_v2  ;;  %v4937_v14 = vcombine.low %v438_v1, %v442_v2 }
 0x19f   :  { %v562_v13 = vld [vmem:[#allocation5 + $0xe70] sm:$0xff]  ;;  %v5065_v15 = vcombine.low %v566_v3, %v570_v4 }
 0x1a0   :  { %3637 = vmatpush1.bf16.msra.mxu0 %v4865_v9  ;;  %3678 = vmatpush1.bf16.msra.mxu1 %v4993_v10  ;;  %v5066_v9 = vcombine.high %v566_v3, %v570_v4  ;;  %v430_v10 = vld [vmem:[#allocation5 + $0xa50] sm:$0xff]  ;;  %v4779_v3 = vcombine.low %v279_v45, %v283_v46  ;;  %v4644_v4 = vcombine.high %v143_v55, %v147_v56  ;;  %v239_v45 = vld [vmem:[#allocation5 + $0x458] sm:$0xff] }
 0x1a1   :  { %3638 = vmatprep.subr.bf16.mxu0 %v4858_v11  ;;  %3679 = vmatprep.subr.bf16.mxu1 %v4986_v12  ;;  %v434_v11 = vld [vmem:[#allocation5 + $0xa70] sm:$0xff]  ;;  %v243_v46 = vld [vmem:[#allocation5 + $0x478] sm:$0xff] }
 0x1a2   :  { %v558_v12 = vld [vmem:[#allocation5 + $0xe50] sm:$0xff]  ;;  %v4930_v17 = vcombine.high %v430_v10, %v434_v11  ;;  %v4929_v36 = vcombine.low %v430_v10, %v434_v11  ;;  %v139_v10 = vld [vmem:[#allocation5 + $0x138] sm:$0xff] }
 0x1a3   :  { %v554_v24 = vld [vmem:[#allocation5 + $0xe30] sm:$0xff]  ;;  %v5057_v25 = vcombine.low %v558_v12, %v562_v13 }
 0x1a4   :  { %3639 = vmatpush1.bf16.msra.mxu0 %v4857_v19  ;;  %3680 = vmatpush1.bf16.msra.mxu1 %v4985_v21  ;;  %v5058_v19 = vcombine.high %v558_v12, %v562_v13  ;;  %v422_v21 = vld [vmem:[#allocation5 + $0xa10] sm:$0xff]  ;;  %v263_v12 = vld [vmem:[#allocation5 + $0x518] sm:$0xff] }
 0x1a5   :  { %3640 = vmatprep.subr.bf16.mxu0 %v4978_v22  ;;  %3681 = vmatprep.subr.bf16.mxu1 %v5106_v23  ;;  %v426_v22 = vld [vmem:[#allocation5 + $0xa30] sm:$0xff]  ;;  %v267_v13 = vld [vmem:[#allocation5 + $0x538] sm:$0xff] }
 0x1a6   :  { %v550_v23 = vld [vmem:[#allocation5 + $0xe10] sm:$0xff]  ;;  %v4922_v26 = vcombine.high %v422_v21, %v426_v22  ;;  %v4921_v34 = vcombine.low %v422_v21, %v426_v22 }
 0x1a7   :  { %v5049_v37 = vcombine.low %v550_v23, %v554_v24 }
 0x1a8   :  { %3641 = vmatpush2.bf16.msra.mxu0 %v4977_v29  ;;  %3682 = vmatpush2.bf16.msra.mxu1 %v5105_v30  ;;  %v5050_v29 = vcombine.high %v550_v23, %v554_v24  ;;  %v159_v30 = vld [vmem:[#allocation5 + $0x1d8] sm:$0xff]  ;;  %v4764_v24 = vcombine.high %v263_v12, %v267_v13 }
 0x1a9   :  { %3642 = vmatprep.subr.bf16.mxu0 %v4970_v32  ;;  %3683 = vmatprep.subr.bf16.mxu1 %v5098_v47  ;;  %v163_v32 = vld [vmem:[#allocation5 + $0x1f8] sm:$0xff] }
 0x1aa   :  { %v287_v47 = vld [vmem:[#allocation5 + $0x5d8] sm:$0xff] }
 0x1ac   :  { %3643 = vmatpush2.bf16.msra.mxu0 %v4969_v40  ;;  %3684 = vmatpush2.bf16.msra.mxu1 %v5097_v41  ;;  %v4660_v40 = vcombine.high %v159_v30, %v163_v32  ;;  %v4788_v41 = vcombine.high %v287_v47, %v291_v33 }
 0x1ad   :  { %3644 = vmatprep.subr.bf16.mxu0 %v4962_v42  ;;  %3685 = vmatprep.subr.bf16.mxu1 %v5090_v43  ;;  %v628_v42 = vsub.s32 3, %v5555_v60  ;;  %v151_v43 = vld [vmem:[#allocation5 + $0x198] sm:$0xff] }
 0x1ae   :  { %v4651_v1 = vcombine.low %v151_v43, %v155_v44 }
 0x1b0   :  { %3645 = vmatpush2.bf16.msra.mxu0 %v4961_v50  ;;  %3686 = vmatpush2.bf16.msra.mxu1 %v5089_v51  ;;  %v4659_v50 = vcombine.low %v159_v30, %v163_v32  ;;  %v4787_v51 = vcombine.low %v287_v47, %v291_v33  ;;  %v119_v47 = vld [vmem:[#allocation5 + $0x98] sm:$0xff] }
 0x1b1   :  { %3646 = vmatprep.subr.bf16.mxu0 %v4954_v52  ;;  %3687 = vmatprep.subr.bf16.mxu1 %v5082_v53  ;;  %v4652_v52 = vcombine.high %v151_v43, %v155_v44  ;;  %v629_v53 = vrot.slane %v5558_v7, %v628_v42  ;;  %v123_v33 = vld [vmem:[#allocation5 + $0xb8] sm:$0xff] }
 0x1b2   :  { %v111_v43 = vld [vmem:[#allocation5 + $0x58] sm:$0xff] }
 0x1b3   :  { %v115_v44 = vld [vmem:[#allocation5 + $0x78] sm:$0xff] }
 0x1b4   :  { %3647 = vmatpush2.bf16.msra.mxu0 %v4953_v61  ;;  %3688 = vmatpush2.bf16.msra.mxu1 %v5081_v62  ;;  %v271_v61 = vld [vmem:[#allocation5 + $0x558] sm:$0xff] }
 0x1b5   :  { %3648 = vmatprep.subr.bf16.mxu0 %v4946_v63  ;;  %3689 = vmatprep.subr.bf16.mxu1 %v5074_v0  ;;  %v275_v62 = vld [vmem:[#allocation5 + $0x578] sm:$0xff] }
 0x1b6   :  { %v4771_v21 = vcombine.low %v271_v61, %v275_v62 }
 0x1b8   :  { %3649 = vmatpush2.bf16.msra.mxu0 %v4945_v5  ;;  %3690 = vmatpush2.bf16.msra.mxu1 %v5073_v6 }
 0x1b9   :  { %3650 = vmatprep.subr.bf16.mxu0 %v4938_v8  ;;  %3691 = vmatprep.subr.bf16.mxu1 %v5066_v9  ;;  %v4772_v8 = vcombine.high %v271_v61, %v275_v62  ;;  %v135_v9 = vld [vmem:[#allocation5 + $0x118] sm:$0xff]  ;;  %v4739_v61 = vcombine.low %v239_v45, %v243_v46 }
 0x1ba   :  { %v4636_v22 = vcombine.high %v135_v9, %v139_v10 }
 0x1bc   :  { %3651 = vmatpush2.bf16.msra.mxu0 %v4937_v14  ;;  %3692 = vmatpush2.bf16.msra.mxu1 %v5065_v15 }
 0x1bd   :  { %3652 = vmatprep.subr.bf16.mxu0 %v4930_v17  ;;  %3693 = vmatprep.subr.bf16.mxu1 %v5058_v19  ;;  %v4643_v17 = vcombine.low %v143_v55, %v147_v56  ;;  %v231_v55 = vld [vmem:[#allocation5 + $0x418] sm:$0xff] }
 0x1be   :  { %v235_v56 = vld [vmem:[#allocation5 + $0x438] sm:$0xff] }
 0x1c0   :  { %3653 = vmatpush2.bf16.msra.mxu0 %v4929_v36  ;;  %3694 = vmatpush2.bf16.msra.mxu1 %v5057_v25  ;;  %v127_v36 = vld [vmem:[#allocation5 + $0xd8] sm:$0xff] }
 0x1c1   :  { %3654 = vmatprep.subr.bf16.mxu0 %v4922_v26  ;;  %3695 = vmatprep.subr.bf16.mxu1 %v5050_v29  ;;  %v255_v25 = vld [vmem:[#allocation5 + $0x4d8] sm:$0xff]  ;;  %v4635_v29 = vcombine.low %v135_v9, %v139_v10 }
 0x1c2   :  { %v259_v26 = vld [vmem:[#allocation5 + $0x4f8] sm:$0xff] }
 0x1c3   :  { %v4756_v32 = vcombine.high %v255_v25, %v259_v26  ;;  %v215_v9 = vld [vmem:[#allocation5 + $0x398] sm:$0xff] }
 0x1c4   :  { %3655 = vmatpush2.bf16.msra.mxu0 %v4921_v34  ;;  %3696 = vmatpush2.bf16.msra.mxu1 %v5049_v37  ;;  %v247_v34 = vld [vmem:[#allocation5 + $0x498] sm:$0xff] }
 0x1c5   :  { %3706 = vmatprep.subr.bf16.mxu0 %v4660_v40  ;;  %3747 = vmatprep.subr.bf16.mxu1 %v4788_v41  ;;  %v4755_v40 = vcombine.low %v255_v25, %v259_v26  ;;  %v4620_v41 = vcombine.high %v119_v47, %v123_v33  ;;  %v4748_v42 = vcombine.high %v247_v34, %v251_v35  ;;  %v219_v10 = vld [vmem:[#allocation5 + $0x3b8] sm:$0xff] }
 0x1c7   :  { %v3412_v57 = vpop.f32.mrf.mxu0  ;;  %3657 = vmatmul.mubr.bf16.vlgmr.msra.gmra.mxu0 %v5542_v38  ;;  %v3453_v0 = vpop.f32.mrf.mxu1  ;;  %3698 = vmatmul.mubr.bf16.vlgmr.msra.gmra.mxu1 %v5544_v39 }
 0x1c8   :  { %v3413_v63 = vadd.f32 %v3412_v57, %v625_v48  ;;  %3707 = vmatpush1.bf16.msra.mxu0 %v4659_v50  ;;  %3748 = vmatpush1.bf16.msra.mxu1 %v4787_v51  ;;  %v4619_v48 = vcombine.low %v119_v47, %v123_v33  ;;  %v4747_v50 = vcombine.low %v247_v34, %v251_v35 }
 0x1c9   :  { %v3414_v2 = vpop.f32.mrf.mxu0  ;;  %3708 = vmatprep.subr.bf16.mxu0 %v4652_v52  ;;  %v3455_v6 = vpop.f32.mrf.mxu1  ;;  %3749 = vmatprep.subr.bf16.mxu1 %v4780_v54  ;;  %v4612_v51 = vcombine.high %v111_v43, %v115_v44  ;;  %v4740_v52 = vcombine.high %v239_v45, %v243_v46  ;;  %v107_v54 = vld [vmem:[#allocation5 + $0x38] sm:$0xff]  ;;  %v4611_v57 = vcombine.low %v111_v43, %v115_v44 }
 0x1ca   :  { %v5587_v7 = vadd.f32 %v3453_v0, %v3413_v63  ;;  %v3415_v5 = vadd.f32 %v3414_v2, %v629_v53  ;;  %3738 = vmatprep.mubr.bf16.mxu0 %v5524_v58  ;;  %3779 = vmatprep.mubr.bf16.mxu1 %v5526_v59  ;;  %v131_v58 = vld [vmem:[#allocation5 + $0xf8] sm:$0xff]  ;;  %v4763_v59 = vcombine.low %v263_v12, %v267_v13 }
 0x1cb   :  { %v3416_v11 = vpop.f32.mrf.mxu0  ;;  %v3457_v15 = vpop.f32.mrf.mxu1  ;;  %v4628_v30 = vcombine.high %v127_v36, %v131_v58  ;;  %v4627_v37 = vcombine.low %v127_v36, %v131_v58  ;;  %v103_v53 = vld [vmem:[#allocation5 + $0x18] sm:$0xff]  ;;  %v4732_v63 = vcombine.high %v231_v55, %v235_v56  ;;  %v4715_v36 = vcombine.low %v215_v9, %v219_v10 }
 0x1cc   :  { %v5591_v14 = vadd.f32 %v3455_v6, %v3415_v5  ;;  %3709 = vmatpush1.bf16.msra.mxu0 %v4651_v1  ;;  %3750 = vmatpush1.bf16.msra.mxu1 %v4779_v3  ;;  %v4604_v62 = vcombine.high %v103_v53, %v107_v54  ;;  %v223_v0 = vld [vmem:[#allocation5 + $0x3d8] sm:$0xff]  ;;  %v4731_v5 = vcombine.low %v231_v55, %v235_v56 }
 0x1cd   :  { %v3417_v19 = vpop.f32.mrf.mxu0  ;;  %3710 = vmatprep.subr.bf16.mxu0 %v4644_v4  ;;  %v3458_v23 = vpop.f32.mrf.mxu1  ;;  %3751 = vmatprep.subr.bf16.mxu1 %v4772_v8  ;;  %v227_v1 = vld [vmem:[#allocation5 + $0x3f8] sm:$0xff]  ;;  %v4603_v4 = vcombine.low %v103_v53, %v107_v54 }
 0x1ce   :  { %v351_v2 = vld [vmem:[#allocation5 + $0x7d8] sm:$0xff]  ;;  %v4724_v6 = vcombine.high %v223_v0, %v227_v1  ;;  %v4723_v13 = vcombine.low %v223_v0, %v227_v1 }
 0x1cf   :  { %v355_v3 = vld [vmem:[#allocation5 + $0x7f8] sm:$0xff] }
 0x1d0   :  { %3711 = vmatpush1.bf16.msra.mxu0 %v4643_v17  ;;  %3752 = vmatpush1.bf16.msra.mxu1 %v4771_v21  ;;  %v4852_v8 = vcombine.high %v351_v2, %v355_v3  ;;  %v343_v11 = vld [vmem:[#allocation5 + $0x798] sm:$0xff]  ;;  %v4851_v15 = vcombine.low %v351_v2, %v355_v3  ;;  %v4716_v17 = vcombine.high %v215_v9, %v219_v10 }
 0x1d1   :  { %3712 = vmatprep.subr.bf16.mxu0 %v4636_v22  ;;  %3753 = vmatprep.subr.bf16.mxu1 %v4764_v24  ;;  %v347_v12 = vld [vmem:[#allocation5 + $0x7b8] sm:$0xff] }
 0x1d2   :  { %v4844_v19 = vcombine.high %v343_v11, %v347_v12  ;;  %v207_v21 = vld [vmem:[#allocation5 + $0x358] sm:$0xff]  ;;  %v4843_v58 = vcombine.low %v343_v11, %v347_v12 }
 0x1d3   :  { %v211_v22 = vld [vmem:[#allocation5 + $0x378] sm:$0xff] }
 0x1d4   :  { %3713 = vmatpush1.bf16.msra.mxu0 %v4635_v29  ;;  %3754 = vmatpush1.bf16.msra.mxu1 %v4763_v59  ;;  %v335_v23 = vld [vmem:[#allocation5 + $0x758] sm:$0xff]  ;;  %v4708_v25 = vcombine.high %v207_v21, %v211_v22  ;;  %v4707_v47 = vcombine.low %v207_v21, %v211_v22 }
 0x1d5   :  { %3714 = vmatprep.subr.bf16.mxu0 %v4628_v30  ;;  %3755 = vmatprep.subr.bf16.mxu1 %v4756_v32  ;;  %v339_v24 = vld [vmem:[#allocation5 + $0x778] sm:$0xff] }
 0x1d6   :  { %v4836_v26 = vcombine.high %v335_v23, %v339_v24  ;;  %v199_v29 = vld [vmem:[#allocation5 + $0x318] sm:$0xff]  ;;  %v4835_v33 = vcombine.low %v335_v23, %v339_v24 }
 0x1d7   :  { %v203_v59 = vld [vmem:[#allocation5 + $0x338] sm:$0xff] }
 0x1d8   :  { %3715 = vmatpush1.bf16.msra.mxu0 %v4627_v37  ;;  %3756 = vmatpush1.bf16.msra.mxu1 %v4755_v40  ;;  %v327_v30 = vld [vmem:[#allocation5 + $0x718] sm:$0xff]  ;;  %v4700_v34 = vcombine.high %v199_v29, %v203_v59  ;;  %v4699_v43 = vcombine.low %v199_v29, %v203_v59 }
 0x1d9   :  { %3716 = vmatprep.subr.bf16.mxu0 %v4620_v41  ;;  %3757 = vmatprep.subr.bf16.mxu1 %v4748_v42  ;;  %v331_v32 = vld [vmem:[#allocation5 + $0x738] sm:$0xff] }
 0x1da   :  { %v4828_v35 = vcombine.high %v327_v30, %v331_v32  ;;  %v191_v37 = vld [vmem:[#allocation5 + $0x2d8] sm:$0xff]  ;;  %v4827_v44 = vcombine.low %v327_v30, %v331_v32 }
 0x1db   :  { %v195_v40 = vld [vmem:[#allocation5 + $0x2f8] sm:$0xff] }
 0x1dc   :  { %3717 = vmatpush1.bf16.msra.mxu0 %v4619_v48  ;;  %3758 = vmatpush1.bf16.msra.mxu1 %v4747_v50  ;;  %v319_v41 = vld [vmem:[#allocation5 + $0x6d8] sm:$0xff]  ;;  %v4692_v45 = vcombine.high %v191_v37, %v195_v40  ;;  %v4691_v53 = vcombine.low %v191_v37, %v195_v40 }
 0x1dd   :  { %3718 = vmatprep.subr.bf16.mxu0 %v4612_v51  ;;  %3759 = vmatprep.subr.bf16.mxu1 %v4740_v52  ;;  %v323_v42 = vld [vmem:[#allocation5 + $0x6f8] sm:$0xff] }
 0x1de   :  { %v4820_v46 = vcombine.high %v319_v41, %v323_v42  ;;  %v183_v48 = vld [vmem:[#allocation5 + $0x298] sm:$0xff]  ;;  %v4819_v54 = vcombine.low %v319_v41, %v323_v42 }
 0x1df   :  { %v187_v50 = vld [vmem:[#allocation5 + $0x2b8] sm:$0xff] }
 0x1e0   :  { %3719 = vmatpush1.bf16.msra.mxu0 %v4611_v57  ;;  %3760 = vmatpush1.bf16.msra.mxu1 %v4739_v61  ;;  %v311_v51 = vld [vmem:[#allocation5 + $0x698] sm:$0xff]  ;;  %v4684_v55 = vcombine.high %v183_v48, %v187_v50  ;;  %v4683_v0 = vcombine.low %v183_v48, %v187_v50 }
 0x1e1   :  { %3720 = vmatprep.subr.bf16.mxu0 %v4604_v62  ;;  %3761 = vmatprep.subr.bf16.mxu1 %v4732_v63  ;;  %v315_v52 = vld [vmem:[#allocation5 + $0x6b8] sm:$0xff] }
 0x1e2   :  { %v4812_v56 = vcombine.high %v311_v51, %v315_v52  ;;  %v175_v57 = vld [vmem:[#allocation5 + $0x258] sm:$0xff]  ;;  %v4811_v1 = vcombine.low %v311_v51, %v315_v52 }
 0x1e3   :  { %v179_v61 = vld [vmem:[#allocation5 + $0x278] sm:$0xff] }
 0x1e4   :  { %3721 = vmatpush1.bf16.msra.mxu0 %v4603_v4  ;;  %3762 = vmatpush1.bf16.msra.mxu1 %v4731_v5  ;;  %v303_v62 = vld [vmem:[#allocation5 + $0x658] sm:$0xff]  ;;  %v4676_v2 = vcombine.high %v175_v57, %v179_v61  ;;  %v4675_v9 = vcombine.low %v175_v57, %v179_v61 }
 0x1e5   :  { %3722 = vmatprep.subr.bf16.mxu0 %v4724_v6  ;;  %3763 = vmatprep.subr.bf16.mxu1 %v4852_v8  ;;  %v307_v63 = vld [vmem:[#allocation5 + $0x678] sm:$0xff] }
 0x1e6   :  { %v4804_v3 = vcombine.high %v303_v62, %v307_v63  ;;  %v167_v4 = vld [vmem:[#allocation5 + $0x218] sm:$0xff]  ;;  %v4803_v10 = vcombine.low %v303_v62, %v307_v63 }
 0x1e7   :  { %v171_v5 = vld [vmem:[#allocation5 + $0x238] sm:$0xff] }
 0x1e8   :  { %3723 = vmatpush2.bf16.msra.mxu0 %v4723_v13  ;;  %3764 = vmatpush2.bf16.msra.mxu1 %v4851_v15  ;;  %v295_v6 = vld [vmem:[#allocation5 + $0x618] sm:$0xff]  ;;  %v4668_v11 = vcombine.high %v167_v4, %v171_v5  ;;  %v4667_v21 = vcombine.low %v167_v4, %v171_v5 }
 0x1e9   :  { %3724 = vmatprep.subr.bf16.mxu0 %v4716_v17  ;;  %3765 = vmatprep.subr.bf16.mxu1 %v4844_v19  ;;  %v299_v8 = vld [vmem:[#allocation5 + $0x638] sm:$0xff] }
 0x1ea   :  { %v4796_v12 = vcombine.high %v295_v6, %v299_v8  ;;  %v415_v13 = vld [vmem:[#allocation5 + $0x9d8] sm:$0xff]  ;;  %v4795_v22 = vcombine.low %v295_v6, %v299_v8 }
 0x1eb   :  { %v419_v15 = vld [vmem:[#allocation5 + $0x9f8] sm:$0xff] }
 0x1ec   :  { %3725 = vmatpush2.bf16.msra.mxu0 %v4715_v36  ;;  %3766 = vmatpush2.bf16.msra.mxu1 %v4843_v58  ;;  %v543_v17 = vld [vmem:[#allocation5 + $0xdd8] sm:$0xff]  ;;  %v4916_v23 = vcombine.high %v415_v13, %v419_v15  ;;  %v4915_v29 = vcombine.low %v415_v13, %v419_v15 }
 0x1ed   :  { %3726 = vmatprep.subr.bf16.mxu0 %v4708_v25  ;;  %3767 = vmatprep.subr.bf16.mxu1 %v4836_v26  ;;  %v547_v19 = vld [vmem:[#allocation5 + $0xdf8] sm:$0xff] }
 0x1ee   :  { %v5044_v24 = vcombine.high %v543_v17, %v547_v19  ;;  %v407_v36 = vld [vmem:[#allocation5 + $0x998] sm:$0xff]  ;;  %v5043_v59 = vcombine.low %v543_v17, %v547_v19 }
 0x1ef   :  { %v411_v58 = vld [vmem:[#allocation5 + $0x9b8] sm:$0xff] }
 0x1f0   :  { %3727 = vmatpush2.bf16.msra.mxu0 %v4707_v47  ;;  %3768 = vmatpush2.bf16.msra.mxu1 %v4835_v33  ;;  %v535_v25 = vld [vmem:[#allocation5 + $0xd98] sm:$0xff]  ;;  %v4908_v30 = vcombine.high %v407_v36, %v411_v58  ;;  %v4907_v42 = vcombine.low %v407_v36, %v411_v58 }
 0x1f1   :  { %3728 = vmatprep.subr.bf16.mxu0 %v4700_v34  ;;  %3769 = vmatprep.subr.bf16.mxu1 %v4828_v35  ;;  %v539_v26 = vld [vmem:[#allocation5 + $0xdb8] sm:$0xff] }
 0x1f2   :  { %v5036_v32 = vcombine.high %v535_v25, %v539_v26  ;;  %v399_v47 = vld [vmem:[#allocation5 + $0x958] sm:$0xff] }
 0x1f3   :  { %v403_v33 = vld [vmem:[#allocation5 + $0x978] sm:$0xff] }
 0x1f4   :  { %3729 = vmatpush2.bf16.msra.mxu0 %v4699_v43  ;;  %3770 = vmatpush2.bf16.msra.mxu1 %v4827_v44  ;;  %v527_v35 = vld [vmem:[#allocation5 + $0xd58] sm:$0xff]  ;;  %v5035_v44 = vcombine.low %v535_v25, %v539_v26 }
 0x1f5   :  { %3730 = vmatprep.subr.bf16.mxu0 %v4692_v45  ;;  %3771 = vmatprep.subr.bf16.mxu1 %v4820_v46  ;;  %v531_v37 = vld [vmem:[#allocation5 + $0xd78] sm:$0xff]  ;;  %v4900_v45 = vcombine.high %v399_v47, %v403_v33 }
 0x1f6   :  { %v391_v50 = vld [vmem:[#allocation5 + $0x918] sm:$0xff] }
 0x1f7   :  { %v395_v51 = vld [vmem:[#allocation5 + $0x938] sm:$0xff] }
 0x1f8   :  { %3731 = vmatpush2.bf16.msra.mxu0 %v4691_v53  ;;  %3772 = vmatpush2.bf16.msra.mxu1 %v4819_v54  ;;  %v523_v52 = vld [vmem:[#allocation5 + $0xd38] sm:$0xff]  ;;  %v4899_v54 = vcombine.low %v399_v47, %v403_v33  ;;  %v4892_v57 = vcombine.high %v391_v50, %v395_v51 }
 0x1f9   :  { %3732 = vmatprep.subr.bf16.mxu0 %v4684_v55  ;;  %3773 = vmatprep.subr.bf16.mxu1 %v4812_v56  ;;  %v5027_v56 = vcombine.low %v527_v35, %v531_v37  ;;  %v383_v63 = vld [vmem:[#allocation5 + $0x8d8] sm:$0xff] }
 0x1fa   :  { %v375_v5 = vld [vmem:[#allocation5 + $0x898] sm:$0xff] }
 0x1fb   :  { %v379_v6 = vld [vmem:[#allocation5 + $0x8b8] sm:$0xff] }
 0x1fc   :  { %3733 = vmatpush2.bf16.msra.mxu0 %v4683_v0  ;;  %3774 = vmatpush2.bf16.msra.mxu1 %v4811_v1  ;;  %v387_v0 = vld [vmem:[#allocation5 + $0x8f8] sm:$0xff] }
 0x1fd   :  { %3734 = vmatprep.subr.bf16.mxu0 %v4676_v2  ;;  %3775 = vmatprep.subr.bf16.mxu1 %v4804_v3  ;;  %v511_v1 = vld [vmem:[#allocation5 + $0xcd8] sm:$0xff]  ;;  %v4891_v2 = vcombine.low %v391_v50, %v395_v51  ;;  %v4884_v3 = vcombine.high %v383_v63, %v387_v0 }
 0x1fe   :  { %v503_v8 = vld [vmem:[#allocation5 + $0xc98] sm:$0xff] }
 0x1ff   :  { %v367_v15 = vld [vmem:[#allocation5 + $0x858] sm:$0xff] }
 0x200   :  { %3735 = vmatpush2.bf16.msra.mxu0 %v4675_v9  ;;  %3776 = vmatpush2.bf16.msra.mxu1 %v4803_v10  ;;  %v507_v9 = vld [vmem:[#allocation5 + $0xcb8] sm:$0xff]  ;;  %v4883_v10 = vcombine.low %v383_v63, %v387_v0 }
 0x201   :  { %3736 = vmatprep.subr.bf16.mxu0 %v4668_v11  ;;  %3777 = vmatprep.subr.bf16.mxu1 %v4796_v12  ;;  %v4876_v12 = vcombine.high %v375_v5, %v379_v6  ;;  %v5004_v13 = vcombine.high %v503_v8, %v507_v9  ;;  %v371_v17 = vld [vmem:[#allocation5 + $0x878] sm:$0xff] }
 0x202   :  { %v495_v19 = vld [vmem:[#allocation5 + $0xc58] sm:$0xff] }
 0x203   :  { %v359_v58 = vld [vmem:[#allocation5 + $0x818] sm:$0xff] }
 0x204   :  { %3737 = vmatpush2.bf16.msra.mxu0 %v4667_v21  ;;  %3778 = vmatpush2.bf16.msra.mxu1 %v4795_v22  ;;  %v499_v21 = vld [vmem:[#allocation5 + $0xc78] sm:$0xff]  ;;  %v4875_v22 = vcombine.low %v375_v5, %v379_v6 }
 0x205   :  { %3788 = vmatprep.subr.bf16.mxu0 %v4916_v23  ;;  %3829 = vmatprep.subr.bf16.mxu1 %v5044_v24  ;;  %v5003_v23 = vcombine.low %v503_v8, %v507_v9  ;;  %v4868_v24 = vcombine.high %v367_v15, %v371_v17  ;;  %v4996_v36 = vcombine.high %v495_v19, %v499_v21  ;;  %v363_v25 = vld [vmem:[#allocation5 + $0x838] sm:$0xff] }
 0x206   :  { %v487_v26 = vld [vmem:[#allocation5 + $0xc18] sm:$0xff] }
 0x207   :  { %v3494_v34 = vpop.f32.mrf.mxu0  ;;  %3739 = vmatmul.mubr.bf16.vlgmr.msra.gmra.mxu0 %v5530_v16  ;;  %v3535_v41 = vpop.f32.mrf.mxu1  ;;  %3780 = vmatmul.mubr.bf16.vlgmr.msra.gmra.mxu1 %v5532_v20  ;;  %v5028_v16 = vcombine.high %v527_v35, %v531_v37  ;;  %v519_v20 = vld [vmem:[#allocation5 + $0xd18] sm:$0xff] }
 0x208   :  { %v3495_v40 = vadd.f32 %v3494_v34, %v5587_v7  ;;  %3789 = vmatpush1.bf16.msra.mxu0 %v4915_v29  ;;  %3830 = vmatpush1.bf16.msra.mxu1 %v5043_v59  ;;  %v5020_v62 = vcombine.high %v519_v20, %v523_v52  ;;  %v491_v29 = vld [vmem:[#allocation5 + $0xc38] sm:$0xff]  ;;  %v4867_v59 = vcombine.low %v367_v15, %v371_v17 }
 0x209   :  { %v5596_v43 = vpop.f32.mrf.mxu0  ;;  %3790 = vmatprep.subr.bf16.mxu0 %v4908_v30  ;;  %v5600_v48 = vpop.f32.mrf.mxu1  ;;  %3831 = vmatprep.subr.bf16.mxu1 %v5036_v32  ;;  %v4995_v30 = vcombine.low %v495_v19, %v499_v21  ;;  %v4860_v32 = vcombine.high %v359_v58, %v363_v25  ;;  %v4988_v47 = vcombine.high %v487_v26, %v491_v29  ;;  %v479_v33 = vld [vmem:[#allocation5 + $0xbd8] sm:$0xff] }
 0x20a   :  { %v5598_v46 = vadd.f32 %v3535_v41, %v3495_v40  ;;  %3820 = vmatprep.mubr.bf16.mxu0 %v5534_v28  ;;  %3861 = vmatprep.mubr.bf16.mxu1 %v5537_v31  ;;  %v515_v28 = vld [vmem:[#allocation5 + $0xcf8] sm:$0xff]  ;;  %v5019_v31 = vcombine.low %v519_v20, %v523_v52  ;;  %v4859_v40 = vcombine.low %v359_v58, %v363_v25 }
 0x20b   :  { %v3498_v7 = vpop.f32.mrf.mxu0  ;;  %v3539_v53 = vpop.f32.mrf.mxu1  ;;  %v5012_v4 = vcombine.high %v511_v1, %v515_v28  ;;  %v5011_v11 = vcombine.low %v511_v1, %v515_v28  ;;  %v483_v34 = vld [vmem:[#allocation5 + $0xbf8] sm:$0xff]  ;;  %v4987_v41 = vcombine.low %v487_v26, %v491_v29 }
 0x20c   :  { %3791 = vmatpush1.bf16.msra.mxu0 %v4907_v42  ;;  %3832 = vmatpush1.bf16.msra.mxu1 %v5035_v44  ;;  %v607_v35 = vld [vmem:[#allocation5 + $0xfd8] sm:$0xff]  ;;  %v4980_v42 = vcombine.high %v479_v33, %v483_v34  ;;  %v4979_v7 = vcombine.low %v479_v33, %v483_v34 }
 0x20d   :  { %v3499_v55 = vpop.f32.mrf.mxu0  ;;  %3792 = vmatprep.subr.bf16.mxu0 %v4900_v45  ;;  %v3540_v61 = vpop.f32.mrf.mxu1  ;;  %3833 = vmatprep.subr.bf16.mxu1 %v5028_v16  ;;  %v611_v37 = vld [vmem:[#allocation5 + $0xff8] sm:$0xff] }
 0x20e   :  { %v5108_v44 = vcombine.high %v607_v35, %v611_v37  ;;  %v471_v45 = vld [vmem:[#allocation5 + $0xb98] sm:$0xff]  ;;  %v5107_v20 = vcombine.low %v607_v35, %v611_v37 }
 0x20f   :  { %v475_v16 = vld [vmem:[#allocation5 + $0xbb8] sm:$0xff] }
 0x210   :  { %3793 = vmatpush1.bf16.msra.mxu0 %v4899_v54  ;;  %3834 = vmatpush1.bf16.msra.mxu1 %v5027_v56  ;;  %v599_v50 = vld [vmem:[#allocation5 + $0xf98] sm:$0xff]  ;;  %v4972_v52 = vcombine.high %v471_v45, %v475_v16  ;;  %v4971_v61 = vcombine.low %v471_v45, %v475_v16 }
 0x211   :  { %3794 = vmatprep.subr.bf16.mxu0 %v4892_v57  ;;  %3835 = vmatprep.subr.bf16.mxu1 %v5020_v62  ;;  %v603_v51 = vld [vmem:[#allocation5 + $0xfb8] sm:$0xff] }
 0x212   :  { %v5100_v53 = vcombine.high %v599_v50, %v603_v51  ;;  %v463_v54 = vld [vmem:[#allocation5 + $0xb58] sm:$0xff]  ;;  %v5099_v62 = vcombine.low %v599_v50, %v603_v51 }
 0x213   :  { %v467_v55 = vld [vmem:[#allocation5 + $0xb78] sm:$0xff] }
 0x214   :  { %3795 = vmatpush1.bf16.msra.mxu0 %v4891_v2  ;;  %3836 = vmatpush1.bf16.msra.mxu1 %v5019_v31  ;;  %v591_v56 = vld [vmem:[#allocation5 + $0xf58] sm:$0xff]  ;;  %v4964_v63 = vcombine.high %v463_v54, %v467_v55 }
 0x215   :  { %3796 = vmatprep.subr.bf16.mxu0 %v4884_v3  ;;  %3837 = vmatprep.subr.bf16.mxu1 %v5012_v4  ;;  %v595_v57 = vld [vmem:[#allocation5 + $0xf78] sm:$0xff]  ;;  %v4963_v3 = vcombine.low %v463_v54, %v467_v55  ;;  %v5274_v54 = vld [vmem:[#allocation8 + $0x38] sm:$0xff]  }
 0x216   :  { %v5092_v0 = vcombine.high %v591_v56, %v595_v57  ;;  %v455_v1 = vld [vmem:[#allocation5 + $0xb18] sm:$0xff]  ;;  %v5091_v4 = vcombine.low %v591_v56, %v595_v57  ;;  %v5275_v55 = vld [vmem:[#allocation8 + $0xb8] sm:$0xff]  }
 0x217   :  { %v459_v28 = vld [vmem:[#allocation5 + $0xb38] sm:$0xff] }
 0x218   :  { %3797 = vmatpush1.bf16.msra.mxu0 %v4883_v10  ;;  %3838 = vmatpush1.bf16.msra.mxu1 %v5011_v11  ;;  %v583_v2 = vld [vmem:[#allocation5 + $0xf18] sm:$0xff]  ;;  %v4956_v5 = vcombine.high %v455_v1, %v459_v28 }
 0x219   :  { %3798 = vmatprep.subr.bf16.mxu0 %v4876_v12  ;;  %3839 = vmatprep.subr.bf16.mxu1 %v5004_v13  ;;  %v587_v31 = vld [vmem:[#allocation5 + $0xf38] sm:$0xff]  ;;  %v4955_v12 = vcombine.low %v455_v1, %v459_v28  ;;  %v5280_v28 = vld [vmem:[#allocation8 + $0x68] sm:$0xff]  }
 0x21a   :  { %v5084_v6 = vcombine.high %v583_v2, %v587_v31  ;;  %v447_v8 = vld [vmem:[#allocation5 + $0xad8] sm:$0xff]  ;;  %v5083_v13 = vcombine.low %v583_v2, %v587_v31  ;;  %v5281_v31 = vld [vmem:[#allocation8 + $0xe8] sm:$0xff]  }
 0x21b   :  { %v451_v9 = vld [vmem:[#allocation5 + $0xaf8] sm:$0xff] }
 0x21c   :  { %3799 = vmatpush1.bf16.msra.mxu0 %v4875_v22  ;;  %3840 = vmatpush1.bf16.msra.mxu1 %v5003_v23  ;;  %v575_v10 = vld [vmem:[#allocation5 + $0xed8] sm:$0xff]  ;;  %v4948_v15 = vcombine.high %v447_v8, %v451_v9 }
 0x21d   :  { %3800 = vmatprep.subr.bf16.mxu0 %v4868_v24  ;;  %3841 = vmatprep.subr.bf16.mxu1 %v4996_v36  ;;  %v579_v11 = vld [vmem:[#allocation5 + $0xef8] sm:$0xff]  ;;  %v4947_v24 = vcombine.low %v447_v8, %v451_v9  ;;  %v5285_v9 = vld [vmem:[#allocation8 + $0xe0] sm:$0xff]  }
 0x21e   :  { %v5076_v17 = vcombine.high %v575_v10, %v579_v11  ;;  %v439_v19 = vld [vmem:[#allocation5 + $0xa98] sm:$0xff]  ;;  %v5075_v36 = vcombine.low %v575_v10, %v579_v11  ;;  %v5286_v10 = vld [vmem:[#allocation8 + $0x20] sm:$0xff]  }
 0x21f   :  { %v443_v21 = vld [vmem:[#allocation5 + $0xab8] sm:$0xff]  ;;  %v5287_v11 = vld [vmem:[#allocation8 + $0xa0] sm:$0xff]  }
 0x220   :  { %3801 = vmatpush1.bf16.msra.mxu0 %v4867_v59  ;;  %3842 = vmatpush1.bf16.msra.mxu1 %v4995_v30  ;;  %v567_v22 = vld [vmem:[#allocation5 + $0xe98] sm:$0xff]  ;;  %v4940_v58 = vcombine.high %v439_v19, %v443_v21 }
 0x221   :  { %3802 = vmatprep.subr.bf16.mxu0 %v4860_v32  ;;  %3843 = vmatprep.subr.bf16.mxu1 %v4988_v47  ;;  %v571_v23 = vld [vmem:[#allocation5 + $0xeb8] sm:$0xff]  ;;  %v4939_v32 = vcombine.low %v439_v19, %v443_v21 }
 0x222   :  { %v5068_v25 = vcombine.high %v567_v22, %v571_v23  ;;  %v431_v26 = vld [vmem:[#allocation5 + $0xa58] sm:$0xff]  ;;  %v5067_v47 = vcombine.low %v567_v22, %v571_v23 }
 0x223   :  { %v435_v29 = vld [vmem:[#allocation5 + $0xa78] sm:$0xff] }
 0x224   :  { %3803 = vmatpush1.bf16.msra.mxu0 %v4859_v40  ;;  %3844 = vmatpush1.bf16.msra.mxu1 %v4987_v41  ;;  %v559_v59 = vld [vmem:[#allocation5 + $0xe58] sm:$0xff]  ;;  %v4932_v33 = vcombine.high %v431_v26, %v435_v29 }
 0x225   :  { %3804 = vmatprep.subr.bf16.mxu0 %v4980_v42  ;;  %3845 = vmatprep.subr.bf16.mxu1 %v5108_v44  ;;  %v563_v30 = vld [vmem:[#allocation5 + $0xe78] sm:$0xff]  ;;  %v3497_v42 = vadd.f32 %v5596_v43, %v5591_v14  ;;  %v4931_v44 = vcombine.low %v431_v26, %v435_v29  ;;  %v3871_v14 = vmax.f32 %v5579_v27, 0.0  ;;  %v5300_v26 = vld [vmem:[#allocation8 + $0x40] sm:$0xff]  }
 0x226   :  { %v5060_v34 = vcombine.high %v559_v59, %v563_v30  ;;  %v423_v35 = vld [vmem:[#allocation5 + $0xa18] sm:$0xff]  ;;  %v5059_v45 = vcombine.low %v559_v59, %v563_v30  ;;  %v5301_v29 = vld [vmem:[#allocation8 + $0xc0] sm:$0xff]   ;;  %v3870_v30 = vmax.f32 %v5574_v18, 0.0 }
 0x227   :  { %v427_v37 = vld [vmem:[#allocation5 + $0xa38] sm:$0xff]  ;;  %v3538_v51 = vadd.f32 %v5600_v48, %v3497_v42  ;;  %v3879_v57 = vpack.c.bf16 %v3871_v14, %v3871_v14  ;;  %v5302_v59 = vld [vmem:[#allocation8] sm:$0xff]  }
 0x228   :  { %3805 = vmatpush2.bf16.msra.mxu0 %v4979_v7  ;;  %3846 = vmatpush2.bf16.msra.mxu1 %v5107_v20  ;;  %v551_v40 = vld [vmem:[#allocation5 + $0xe18] sm:$0xff]  ;;  %v4924_v16 = vcombine.high %v423_v35, %v427_v37  ;;  %v4923_v7 = vcombine.low %v423_v35, %v427_v37  ;;  %v5305_v35 = vld [vmem:[#allocation8 + $0x138] sm:$0xff]   ;;  %v3878_v37 = vpack.c.bf16 %v3870_v30, %v3870_v30  ;;  %v5327_v14 = vld [vmem:[#allocation8 + $0x1a0] sm:$0xff]  }
 0x229   :  { %3806 = vmatprep.subr.bf16.mxu0 %v4972_v52  ;;  %3847 = vmatprep.subr.bf16.mxu1 %v5100_v53  ;;  %v555_v41 = vld [vmem:[#allocation5 + $0xe38] sm:$0xff]  ;;  %v5272_v52 = vld [vmem:[#allocation8 + $0x78] sm:$0xff]   ;;  %v3873_v43 = vmax.f32 %v3538_v51, 0.0  ;;  %v5310_v51 = vld [vmem:[#allocation8 + $0x160] sm:$0xff]  }
 0x22a   :  { %v5052_v50 = vcombine.high %v551_v40, %v555_v41  ;;  %v5051_v20 = vcombine.low %v551_v40, %v555_v41  ;;  %v5273_v53 = vld [vmem:[#allocation8 + $0xf8] sm:$0xff]   ;;  %v5276_v56 = vld [vmem:[#allocation8 + $0x70] sm:$0xff]  }
 0x22b   :  { %v5278_v27 = vld [vmem:[#allocation8 + $0x30] sm:$0xff]   ;;  %v5321_v41 = vld [vmem:[#allocation8 + $0x1b8] sm:$0xff]  }
 0x22c   :  { %3807 = vmatpush2.bf16.msra.mxu0 %v4971_v61  ;;  %3848 = vmatpush2.bf16.msra.mxu1 %v5099_v62  ;;  %v5277_v61 = vld [vmem:[#allocation8 + $0xf0] sm:$0xff]   ;;  %v3881_v62 = vpack.c.bf16 %v3873_v43, %v3873_v43  ;;  %v5328_v43 = vld [vmem:[#allocation8 + $0x1d8] sm:$0xff]  }
 0x22d   :  { %3808 = vmatprep.subr.bf16.mxu0 %v4964_v63  ;;  %3849 = vmatprep.subr.bf16.mxu1 %v5092_v0  ;;  %v5279_v1 = vld [vmem:[#allocation8 + $0xb0] sm:$0xff]  }
 0x22e   :  { %v5292_v19 = vld [vmem:[#allocation8 + $0x50] sm:$0xff]  }
 0x22f   :  { %v5293_v21 = vld [vmem:[#allocation8 + $0xd0] sm:$0xff]  }
 0x230   :  { %3809 = vmatpush2.bf16.msra.mxu0 %v4963_v3  ;;  %3850 = vmatpush2.bf16.msra.mxu1 %v5091_v4  ;;  %v5282_v4 = vld [vmem:[#allocation8 + $0x28] sm:$0xff]   ;;  %v5294_v22 = vld [vmem:[#allocation8 + $0x10] sm:$0xff]  }
 0x231   :  { %3810 = vmatprep.subr.bf16.mxu0 %v4956_v5  ;;  %3851 = vmatprep.subr.bf16.mxu1 %v5084_v6  ;;  %v5283_v5 = vld [vmem:[#allocation8 + $0xa8] sm:$0xff]   ;;  %v5284_v6 = vld [vmem:[#allocation8 + $0x60] sm:$0xff]   ;;  %v5295_v23 = vld [vmem:[#allocation8 + $0x90] sm:$0xff]  }
 0x232   :  { %v5306_v40 = vld [vmem:[#allocation8 + $0x170] sm:$0xff]  }
 0x233   :  { %v5307_v18 = vld [vmem:[#allocation8 + $0x130] sm:$0xff]  }
 0x234   :  { %3811 = vmatpush2.bf16.msra.mxu0 %v4955_v12  ;;  %3852 = vmatpush2.bf16.msra.mxu1 %v5083_v13  ;;  %v5288_v12 = vld [vmem:[#allocation8 + $0x58] sm:$0xff]  }
 0x235   :  { %3812 = vmatprep.subr.bf16.mxu0 %v4948_v15  ;;  %3853 = vmatprep.subr.bf16.mxu1 %v5076_v17  ;;  %v5289_v13 = vld [vmem:[#allocation8 + $0xd8] sm:$0xff]  }
 0x236   :  { %v5290_v15 = vld [vmem:[#allocation8 + $0x18] sm:$0xff]  }
 0x237   :  { %v5291_v17 = vld [vmem:[#allocation8 + $0x98] sm:$0xff]  }
 0x238   :  { %3813 = vmatpush2.bf16.msra.mxu0 %v4947_v24  ;;  %3854 = vmatpush2.bf16.msra.mxu1 %v5075_v36  ;;  %v5296_v24 = vld [vmem:[#allocation8 + $0x48] sm:$0xff]  }
 0x239   :  { %3814 = vmatprep.subr.bf16.mxu0 %v4940_v58  ;;  %3855 = vmatprep.subr.bf16.mxu1 %v5068_v25  ;;  %v5297_v36 = vld [vmem:[#allocation8 + $0xc8] sm:$0xff]  }
 0x23a   :  { %v5298_v58 = vld [vmem:[#allocation8 + $0x8] sm:$0xff]  }
 0x23b   :  { %v5299_v25 = vld [vmem:[#allocation8 + $0x88] sm:$0xff]  }
 0x23c   :  { %3815 = vmatpush2.bf16.msra.mxu0 %v4939_v32  ;;  %3856 = vmatpush2.bf16.msra.mxu1 %v5067_v47  ;;  %v5303_v32 = vld [vmem:[#allocation8 + $0x80] sm:$0xff]   ;;  %v5304_v47 = vld [vmem:[#allocation8 + $0x178] sm:$0xff]  }
 0x23d   :  { %3816 = vmatprep.subr.bf16.mxu0 %v4932_v33  ;;  %3857 = vmatprep.subr.bf16.mxu1 %v5060_v34  ;;  %v3872_v33 = vmax.f32 %v5598_v46, 0.0  ;;  %v5320_v34 = vld [vmem:[#allocation8 + $0x1f8] sm:$0xff]   ;;  %v5323_v46 = vld [vmem:[#allocation8 + $0x1b0] sm:$0xff]  }
 0x23f   :  { %v3880_v42 = vpack.c.bf16 %v3872_v33, %v3872_v33 }
 0x240   :  { %3817 = vmatpush2.bf16.msra.mxu0 %v4931_v44  ;;  %3858 = vmatpush2.bf16.msra.mxu1 %v5059_v45  ;;  %v5322_v44 = vld [vmem:[#allocation8 + $0x1f0] sm:$0xff]   ;;  %v5308_v45 = vld [vmem:[#allocation8 + $0x168] sm:$0xff]  }
 0x241   :  { %3818 = vmatprep.subr.bf16.mxu0 %v4924_v16  ;;  %3859 = vmatprep.subr.bf16.mxu1 %v5052_v50  ;;  %v5324_v16 = vld [vmem:[#allocation8 + $0x1e8] sm:$0xff]  }
 0x242   :  { %v5309_v50 = vld [vmem:[#allocation8 + $0x128] sm:$0xff]  }
 0x244   :  { %3819 = vmatpush2.bf16.msra.mxu0 %v4923_v7  ;;  %3860 = vmatpush2.bf16.msra.mxu1 %v5051_v20  ;;  %v5325_v7 = vld [vmem:[#allocation8 + $0x1a8] sm:$0xff]   ;;  %v5326_v20 = vld [vmem:[#allocation8 + $0x1e0] sm:$0xff]  }
 0x245   :  { %5174 = vmatprep.subr.bf16.mxu0 %v5272_v52  ;;  %5196 = vmatprep.subr.bf16.mxu1 %v5273_v53  ;;  %v5311_v52 = vld [vmem:[#allocation8 + $0x120] sm:$0xff]   ;;  %v5312_v53 = vld [vmem:[#allocation8 + $0x158] sm:$0xff]  }
 0x247   :  { %v5608_v48 = vpop.f32.mrf.mxu0  ;;  %3821 = vmatmul.mubr.bf16.vlgmr.msra.gmra.mxu0 %v5542_v38  ;;  %v5611_v63 = vpop.f32.mrf.mxu1  ;;  %3862 = vmatmul.mubr.bf16.vlgmr.msra.gmra.mxu1 %v5544_v39 }
 0x248   :  { %5175 = vmatpush3.bf16.msra.mxu0 %v5274_v54  ;;  %4437 = vmatprep.mubr.bf16.mxu0 %v3879_v57  ;;  %v5313_v54 = vld [vmem:[#allocation8 + $0x118] sm:$0xff]   ;;  %v5315_v57 = vld [vmem:[#allocation8 + $0x110] sm:$0xff]  }
 0x249   :  { %5197 = vmatpush3.bf16.msra.mxu1 %v5275_v55  ;;  %v5614_v0 = vpop.f32.mrf.mxu0  ;;  %4477 = vmatprep.mubr.bf16.mxu1 %v3881_v62  ;;  %v5616_v2 = vpop.f32.mrf.mxu1  ;;  %v5314_v55 = vld [vmem:[#allocation8 + $0x150] sm:$0xff]   ;;  %v632_v62 = vsub.s32 4, %v5555_v60 }
 0x24a   :  { %5176 = vmatprep.subr.bf16.mxu0 %v5276_v56  ;;  %5198 = vmatprep.subr.bf16.mxu1 %v5277_v61  ;;  %v5329_v56 = vld [vmem:[#allocation8 + $0x198] sm:$0xff]   ;;  %v5316_v61 = vld [vmem:[#allocation8 + $0x148] sm:$0xff]  }
 0x24b   :  { %v3580_v38 = vpop.f32.mrf.mxu0  ;;  %v3621_v3 = vpop.f32.mrf.mxu1 }
 0x24c   :  { %5177 = vmatpush3.bf16.msra.mxu0 %v5278_v27  ;;  %v636_v27 = vsub.s32 5, %v5555_v60 }
 0x24d   :  { %5199 = vmatpush3.bf16.msra.mxu1 %v5279_v1  ;;  %v3581_v39 = vpop.f32.mrf.mxu0  ;;  %5178 = vmatprep.subr.bf16.mxu0 %v5280_v28  ;;  %v3622_v8 = vpop.f32.mrf.mxu1  ;;  %v5317_v1 = vld [vmem:[#allocation8 + $0x108] sm:$0xff]   ;;  %v5318_v28 = vld [vmem:[#allocation8 + $0x140] sm:$0xff]  }
 0x24e   :  { %5200 = vmatprep.subr.bf16.mxu1 %v5281_v31  ;;  %v5340_v31 = vld [vmem:[#allocation7] sm:$0xff] }
 0x24f   :  { %v633_v38 = vrot.slane %v5340_v31, %v632_v62  ;;  %v637_v3 = vrot.slane %v5340_v31, %v636_v27 }
 0x250   :  { %5179 = vmatpush3.bf16.msra.mxu0 %v5282_v4  ;;  %v5319_v4 = vld [vmem:[#allocation8 + $0x100] sm:$0xff]  }
 0x251   :  { %5201 = vmatpush3.bf16.msra.mxu1 %v5283_v5  ;;  %5180 = vmatprep.subr.bf16.mxu0 %v5284_v6  ;;  %v3577_v39 = vadd.f32 %v5608_v48, %v633_v38  ;;  %v3579_v5 = vadd.f32 %v5614_v0, %v637_v3  ;;  %v5332_v48 = vld [vmem:[#allocation8 + $0x1c8] sm:$0xff]   ;;  %v5109_v38 = vld [vmem:[#allocation10] ss:$0 sm:$0xff] }
 0x252   :  { %5202 = vmatprep.subr.bf16.mxu1 %v5285_v9  ;;  %v5330_v9 = vld [vmem:[#allocation8 + $0x1d0] sm:$0xff]  }
 0x253   :  { %v3618_v6 = vadd.f32 %v5611_v63, %v3577_v39 }
 0x254   :  { %5181 = vmatpush3.bf16.msra.mxu0 %v5286_v10  ;;  %v3620_v10 = vadd.f32 %v5616_v2, %v3579_v5  ;;  %v5334_v2 = vld [vmem:[#allocation8 + $0x1c0] sm:$0xff]  }
 0x255   :  { %5203 = vmatpush3.bf16.msra.mxu1 %v5287_v11  ;;  %5182 = vmatprep.subr.bf16.mxu0 %v5288_v12 }
 0x256   :  { %5204 = vmatprep.subr.bf16.mxu1 %v5289_v13  ;;  %v5331_v13 = vld [vmem:[#allocation8 + $0x190] sm:$0xff]  }
 0x258   :  { %5183 = vmatpush3.bf16.msra.mxu0 %v5290_v15 }
 0x259   :  { %5205 = vmatpush3.bf16.msra.mxu1 %v5291_v17  ;;  %5184 = vmatprep.subr.bf16.mxu0 %v5292_v19 }
 0x25a   :  { %5206 = vmatprep.subr.bf16.mxu1 %v5293_v21 }
 0x25c   :  { %5185 = vmatpush3.bf16.msra.mxu0 %v5294_v22 }
 0x25d   :  { %5207 = vmatpush3.bf16.msra.mxu1 %v5295_v23  ;;  %5186 = vmatprep.subr.bf16.mxu0 %v5296_v24  ;;  %v5333_v24 = vld [vmem:[#allocation8 + $0x188] sm:$0xff]  }
 0x25e   :  { %5208 = vmatprep.subr.bf16.mxu1 %v5297_v36 }
 0x260   :  { %5187 = vmatpush3.bf16.msra.mxu0 %v5298_v58 }
 0x261   :  { %5209 = vmatpush3.bf16.msra.mxu1 %v5299_v25  ;;  %5188 = vmatprep.subr.bf16.mxu0 %v5300_v26 }
 0x262   :  { %5210 = vmatprep.subr.bf16.mxu1 %v5301_v29  ;;  %v5335_v29 = vld [vmem:[#allocation8 + $0x180] sm:$0xff]  }
 0x264   :  { %5189 = vmatpush3.bf16.msra.mxu0 %v5302_v59 }
 0x265   :  { %5211 = vmatpush3.bf16.msra.mxu1 %v5303_v32  ;;  %5218 = vmatprep.subr.bf16.mxu0 %v5304_v47 }
 0x266   :  { %5240 = vmatprep.subr.bf16.mxu1 %v5320_v34 }
 0x267   :  { %4438 = vmatmul.mubr.bf16.vlgmr.msra.gmra.mxu0 %v3878_v37 }
 0x268   :  { %4478 = vmatmul.mubr.bf16.vlgmr.msra.gmra.mxu1 %v3880_v42  ;;  %5219 = vmatpush3.bf16.msra.mxu0 %v5305_v35  ;;  %v644_v42 = vsub.s32 7, %v5555_v60 }
 0x269   :  { %5220 = vmatprep.subr.bf16.mxu0 %v5306_v40  ;;  %5241 = vmatpush3.bf16.msra.mxu1 %v5321_v41  ;;  %v640_v41 = vsub.s32 6, %v5555_v60 }
 0x26a   :  { %5242 = vmatprep.subr.bf16.mxu1 %v5322_v44 }
 0x26b   :  { %v641_v44 = vrot.slane %v5340_v31, %v640_v41 }
 0x26c   :  { %5221 = vmatpush3.bf16.msra.mxu0 %v5307_v18  ;;  %v645_v18 = vrot.slane %v5340_v31, %v644_v42 }
 0x26d   :  { %5222 = vmatprep.subr.bf16.mxu0 %v5308_v45  ;;  %5243 = vmatpush3.bf16.msra.mxu1 %v5323_v46 }
 0x26e   :  { %5244 = vmatprep.subr.bf16.mxu1 %v5324_v16 }
 0x270   :  { %5223 = vmatpush3.bf16.msra.mxu0 %v5309_v50 }
 0x271   :  { %5224 = vmatprep.subr.bf16.mxu0 %v5310_v51  ;;  %5245 = vmatpush3.bf16.msra.mxu1 %v5325_v7 }
 0x272   :  { %5246 = vmatprep.subr.bf16.mxu1 %v5326_v20 }
 0x274   :  { %5225 = vmatpush3.bf16.msra.mxu0 %v5311_v52 }
 0x275   :  { %5226 = vmatprep.subr.bf16.mxu0 %v5312_v53  ;;  %5247 = vmatpush3.bf16.msra.mxu1 %v5327_v14 }
 0x276   :  { %5248 = vmatprep.subr.bf16.mxu1 %v5328_v43 }
 0x278   :  { %5227 = vmatpush3.bf16.msra.mxu0 %v5313_v54 }
 0x279   :  { %5228 = vmatprep.subr.bf16.mxu0 %v5314_v55  ;;  %5249 = vmatpush3.bf16.msra.mxu1 %v5329_v56 }
 0x27a   :  { %5250 = vmatprep.subr.bf16.mxu1 %v5330_v9 }
 0x27c   :  { %5229 = vmatpush3.bf16.msra.mxu0 %v5315_v57 }
 0x27d   :  { %5230 = vmatprep.subr.bf16.mxu0 %v5316_v61  ;;  %5251 = vmatpush3.bf16.msra.mxu1 %v5331_v13 }
 0x27e   :  { %5252 = vmatprep.subr.bf16.mxu1 %v5332_v48 }
 0x280   :  { %5231 = vmatpush3.bf16.msra.mxu0 %v5317_v1 }
 0x281   :  { %5232 = vmatprep.subr.bf16.mxu0 %v5318_v28  ;;  %5253 = vmatpush3.bf16.msra.mxu1 %v5333_v24 }
 0x282   :  { %5254 = vmatprep.subr.bf16.mxu1 %v5334_v2 }
 0x284   :  { %5233 = vmatpush3.bf16.msra.mxu0 %v5319_v4 }
 0x285   :  { %5255 = vmatpush3.bf16.msra.mxu1 %v5335_v29 }
 0x287   :  { %v3658_v8 = vpop.f32.mrf.mxu0  ;;  %v3699_v12 = vpop.f32.mrf.mxu1 }
 0x288   :  { %v3659_v11 = vadd.f32 %v3658_v8, %v3618_v6 }
 0x289   :  { %v3660_v15 = vpop.f32.mrf.mxu0  ;;  %v3701_v21 = vpop.f32.mrf.mxu1 }
 0x28a   :  { %v3700_v17 = vadd.f32 %v3699_v12, %v3659_v11  ;;  %v3661_v19 = vadd.f32 %v3660_v15, %v3620_v10 }
 0x28b   :  { %v3662_v22 = vpop.f32.mrf.mxu0  ;;  %v3703_v0 = vpop.f32.mrf.mxu1 }
 0x28c   :  { %v3702_v23 = vadd.f32 %v3701_v21, %v3661_v19  ;;  %v3874_v36 = vmax.f32 %v3700_v17, 0.0  ;;  %v4567_v0 = vand.u32 127, %v614_v49 }
 0x28d   :  { %v3663_v63 = vpop.f32.mrf.mxu0  ;;  %v3704_v25 = vpop.f32.mrf.mxu1 }
 0x28e   :  { %v3875_v58 = vmax.f32 %v3702_v23, 0.0  ;;  %v3882_v59 = vpack.c.bf16 %v3874_v36, %v3874_v36  ;;  %vm4568_vm0 = vcmp.lt.s32.totalorder %v4567_v0, 10 }
 0x290   :  { %v3883_v26 = vpack.c.bf16 %v3875_v58, %v3875_v58 }
 0x292   :  { %4517 = vmatprep.mubr.bf16.mxu0 %v3883_v26 }
 0x293   :  { %4518 = vmatmul.mubr.bf16.vlgmr.msra.gmra.mxu0 %v3882_v59 }
 0x2c7   :  { %v3740_v30 = vpop.f32.mrf.mxu0  ;;  %v3781_v32 = vpop.f32.mrf.mxu1 }
 0x2c8   :  { %v3741_v45 = vadd.f32 %v3740_v30, %v641_v44 }
 0x2c9   :  { %v3742_v47 = vpop.f32.mrf.mxu0  ;;  %v3783_v33 = vpop.f32.mrf.mxu1 }
 0x2ca   :  { %v3743_v46 = vadd.f32 %v3742_v47, %v645_v18  ;;  %v3782_v16 = vadd.f32 %v3781_v32, %v3741_v45 }
 0x2cb   :  { %v3744_v34 = vpop.f32.mrf.mxu0  ;;  %v3785_v35 = vpop.f32.mrf.mxu1 }
 0x2cc   :  { %v3784_v51 = vadd.f32 %v3783_v33, %v3743_v46 }
 0x2cd   :  { %v3745_v37 = vpop.f32.mrf.mxu0  ;;  %v3786_v40 = vpop.f32.mrf.mxu1 }
 0x307   :  { %v3822_v50 = vpop.f32.mrf.mxu0  ;;  %v3863_v20 = vpop.f32.mrf.mxu1 }
 0x308   :  { %v3823_v7 = vadd.f32 %v3822_v50, %v3782_v16 }
 0x309   :  { %v3824_v52 = vpop.f32.mrf.mxu0  ;;  %v3865_v43 = vpop.f32.mrf.mxu1 }
 0x30a   :  { %v3864_v53 = vadd.f32 %v3863_v20, %v3823_v7  ;;  %v3825_v14 = vadd.f32 %v3824_v52, %v3784_v51 }
 0x30b   :  { %v3826_v54 = vpop.f32.mrf.mxu0  ;;  %v3867_v56 = vpop.f32.mrf.mxu1 }
 0x30c   :  { %v3866_v55 = vadd.f32 %v3865_v43, %v3825_v14  ;;  %v3876_v57 = vmax.f32 %v3864_v53, 0.0 }
 0x30d   :  { %v3827_v61 = vpop.f32.mrf.mxu0  ;;  %v3868_v60 = vpop.f32.mrf.mxu1 }
 0x30e   :  { %v3877_v62 = vmax.f32 %v3866_v55, 0.0  ;;  %v3884_v1 = vpack.c.bf16 %v3876_v57, %v3876_v57 }
 0x310   :  { %v3885_v27 = vpack.c.bf16 %v3877_v62, %v3877_v62 }
 0x312   :  { %4557 = vmatprep.mubr.bf16.mxu1 %v3885_v27 }
 0x313   :  { %4558 = vmatmul.mubr.bf16.vlgmr.msra.gmra.mxu1 %v3884_v1 }
 0x327   :  { %v5190_v28 = vpop.f32.mrf.mxu0 }
 0x328   :  { %v5212_v31 = vpop.f32.mrf.mxu1 }
 0x329   :  { %v5191_v3 = vpop.f32.mrf.mxu0 }
 0x32a   :  { %v5192_v4 = vadd.f32 %v5191_v3, %v5190_v28  ;;  %v5213_v39 = vpop.f32.mrf.mxu1 }
 0x32b   :  { %v5214_v5 = vadd.f32 %v5213_v39, %v5212_v31  ;;  %v5193_v6 = vpop.f32.mrf.mxu0 }
 0x32c   :  { %v4440_v8 = vadd.f32 %v5192_v4, %v5109_v38  ;;  %v5215_v9 = vpop.f32.mrf.mxu1 }
 0x32d   :  { %v5194_v10 = vpop.f32.mrf.mxu0 }
 0x32e   :  { %v4480_v11 = vadd.f32 %v5214_v5, %v4440_v8  ;;  %v5216_v12 = vpop.f32.mrf.mxu1 }
 0x353   :  { %v5234_v13 = vpop.f32.mrf.mxu0 }
 0x355   :  { %v5235_v15 = vpop.f32.mrf.mxu0 }
 0x356   :  { %v5236_v17 = vadd.f32 %v5235_v15, %v5234_v13 }
 0x357   :  { %v5237_v19 = vpop.f32.mrf.mxu0 }
 0x358   :  { %v4520_v21 = vadd.f32 %v5236_v17, %v4480_v11 }
 0x359   :  { %v5238_v22 = vpop.f32.mrf.mxu0 }
 0x3d3   :  { %v5256_v48 = vpop.f32.mrf.mxu1 }
 0x3d5   :  { %v5257_v23 = vpop.f32.mrf.mxu1 }
 0x3d6   :  { %v5258_v24 = vadd.f32 %v5257_v23, %v5256_v48 }
 0x3d7   :  { %v5259_v36 = vpop.f32.mrf.mxu1 }
 0x3d8   :  { %v4560_v63 = vadd.f32 %v5258_v24, %v4520_v21 }
 0x3d9   :  { %v5260_v58 = vpop.f32.mrf.mxu1 }
 0x3da   :  { %v4565_v25 = vmax.f32 %v4560_v63, 0.0 }
 0x3dc   :  { %v4569_v2 = vsel %vm4568_vm0, %v4565_v25, -inf }
 0x3dd   :  { %4570 = vmax.xlane.f32.xlu0 %v4569_v2 }
 0x466   :  { %v4571_v26 = vpop.xlane.xlu0 %4570 }
 0x467   :  { %v4572_v29 = vsub.f32 %v4569_v2, %v4571_v26 }
 0x469   :  { %v4573_v59 = vmul.f32 1.442695, %v4572_v29 }
 0x46b   :  { %5336 = vpow2.f32 %v4573_v59 }
 0x478   :  { %v5337_v30 = vpop.eup %5336 }
 0x479   :  { %4575 = vadd.xlane.f32.xlu0 %v5337_v30 }
 0x502   :  { %v4576_v32 = vpop.xlane.xlu0 %4575 }
 0x503   :  { %5338 = vrcp.f32 %v4576_v32 }
 0x510   :  { %v5339_v47 = vpop.eup %5338 }
 0x511   :  { %v4578_v49 = vmul.f32 %v5339_v47, %v5337_v30 }
 0x513   :  { %4579 = vst [vmem:[#allocation11] sm:$0xff] %v4578_v49 }
 0x514   :  { %5452 = shalt.err (!%p5449_p1)
}
 0x515   :  { %4589 = dma.vmem_to_hbm [thread:$0]  %s4587_s4, 128, %s5637_s5, [#allocation4]  }
 0x516   :  { %5467 = dma.done.wait [#allocation4], 128  }
 0x517   :  { %5468 = vsyncadd [#allocation4], 4294967168 }
 0x518   :  { %4593 = vsyncpa [#allocation3], 1 }
 0x519   :  { %4594 = vsyncpa [#allocation6], 1 }
 0x51a   :  { %4595 = vsyncpa [#allocation9], 1 }
 0x51b   :  { %4596 = vsyncpa [#allocation4], 1 }

// kernel: tpu_custom_call.1
= control target key start
LH: loop header
LB: loop body
LE: loop exit
PB: predicated region body
PF: predicated region fallthrough
CT: control target
= control target key end

     0   :  { %10 = vsyncpa [#allocation3], 0  ;;  %s5632_s0 = inlined_call_operand.hbm [shape: f32[8,1024], index: 0, kind: input, shape index: {}]   ;;  %s5633_s1 = inlined_call_operand.hbm [shape: bf16[1024,1024], index: 1, kind: input, shape index: {}]   ;;  %s5634_s2 = inlined_call_operand.hbm [shape: f32[1,1024], index: 2, kind: input, shape index: {}]   ;;  %s5635_s3 = inlined_call_operand.hbm [shape: bf16[1024,128], index: 3, kind: input, shape index: {}]   ;;  %s5636_s4 = inlined_call_operand.hbm [shape: f32[1,128], index: 4, kind: input, shape index: {}]   ;;  %s5637_s5 = inlined_call_operand.hbm [shape: f32[8,128], index: 5, kind: output, shape index: {}]  }
   0x1   :  { %11 = vsyncpa [#allocation6], 0 }
   0x2   :  { %12 = vsyncpa [#allocation9], 0 }
   0x3   :  { %13 = vsyncpa [#allocation4], 0  ;;  %s5469_s18 = smov [#allocation5]  }
   0x4   :  { %s29_s19 = sshll.u32 %s5469_s18, 4  ;;  %s30_s19 = int_to_ptr.vmem [resolvable:$true] %s29_s19 }
   0x5   :  { %s5349_s20 = scalar_lea.vmem %s30_s19, 65536  ;;  %p5354_p1 = scmp.lt.s32.totalorder %s30_s19, %s30_s19 }
   0x6   :  { %p5350_p0 = scmp.ne.s32.totalorder %s30_s19, %s5349_s20  ;;  %p5355_p2 = scmp.lt.s32.totalorder %s5349_s20, %s5349_s20 }
   0x8   :  { %p5356_p3 = por %p5355_p2, %p5354_p1 }
   0xa   :  { %p5357_p4 = pnand %p5356_p3, %p5350_p0 }
   0xc   :  { %5360 = shalt.err (!%p5357_p4)
}
   0xd   :  { %s5470_s21 = smov 512   ;;  %s5471_s22 = smov 32  }
   0xe   :  { %35 = dma.hbm_to_vmem [thread:$0]  %s5633_s1, 65536, %s30_s19, [#allocation6], %s5470_s21, %s5470_s21, %s5471_s22  }
   0xf   :  { %s5472_s25 = smov [#allocation8]  }
  0x10   :  { %s51_s26 = sshll.u32 %s5472_s25, 4  ;;  %s52_s26 = int_to_ptr.vmem [resolvable:$true] %s51_s26 }
  0x11   :  { %s5369_s27 = scalar_lea.vmem %s52_s26, 8192  ;;  %p5374_p6 = scmp.lt.s32.totalorder %s52_s26, %s52_s26 }
  0x12   :  { %p5370_p5 = scmp.ne.s32.totalorder %s52_s26, %s5369_s27  ;;  %p5375_p7 = scmp.lt.s32.totalorder %s5369_s27, %s5369_s27 }
  0x14   :  { %p5376_p8 = por %p5375_p7, %p5374_p6 }
  0x16   :  { %p5377_p9 = pnand %p5376_p8, %p5370_p5 }
  0x18   :  { %5380 = shalt.err (!%p5377_p9)
}
  0x19   :  { %s5473_s28 = smov 64   ;;  %s5474_s29 = smov 4  }
  0x1a   :  { %57 = dma.hbm_to_vmem [thread:$0]  %s5635_s3, 8192, %s52_s26, [#allocation9], %s5473_s28, %s5473_s28, %s5474_s29  }
  0x1b   :  { %s5475_s7 = smov [#allocation2]   ;;  %s5476_s9 = smov [#allocation7]  }
  0x1c   :  { %s20_s8 = sshll.u32 %s5475_s7, 4  ;;  %s42_s1 = sshll.u32 %s5476_s9, 4  ;;  %s21_s8 = int_to_ptr.vmem [resolvable:$true] %s20_s8  ;;  %s43_s1 = int_to_ptr.vmem [resolvable:$true] %s42_s1 }
  0x1d   :  { %s5389_s10 = scalar_lea.vmem %s21_s8, 1024  ;;  %p5394_p11 = scmp.lt.s32.totalorder %s21_s8, %s21_s8 }
  0x1e   :  { %p5390_p10 = scmp.ne.s32.totalorder %s21_s8, %s5389_s10  ;;  %p5395_p12 = scmp.lt.s32.totalorder %s5389_s10, %s5389_s10 }
  0x20   :  { %p5396_p13 = por %p5395_p12, %p5394_p11 }
  0x22   :  { %p5397_p0 = pnand %p5396_p13, %p5390_p10 }
  0x24   :  { %5400 = shalt.err (!%p5397_p0)
}
  0x25   :  { %23 = dma.hbm_to_vmem [thread:$0]  %s5632_s0, 1024, %s21_s8, [#allocation3]  }
  0x26   :  { %s5409_s13 = scalar_lea.vmem %s43_s1, 128  ;;  %p5414_p2 = scmp.lt.s32.totalorder %s43_s1, %s43_s1 }
  0x27   :  { %p5410_p1 = scmp.ne.s32.totalorder %s43_s1, %s5409_s13  ;;  %p5415_p3 = scmp.lt.s32.totalorder %s5409_s13, %s5409_s13 }
  0x29   :  { %p5416_p4 = por %p5415_p3, %p5414_p2 }
  0x2b   :  { %p5417_p5 = pnand %p5416_p4, %p5410_p1 }
  0x2d   :  { %5420 = shalt.err (!%p5417_p5)
}
  0x2e   :  { %45 = dma.hbm_to_vmem [thread:$0]  %s5634_s2, 128, %s43_s1, [#allocation6]  }
  0x2f   :  { %s5477_s15 = smov [#allocation10]  }
  0x30   :  { %s64_s16 = sshll.u32 %s5477_s15, 4  ;;  %s65_s16 = int_to_ptr.vmem [resolvable:$true] %s64_s16 }
  0x31   :  { %s5429_s17 = scalar_lea.vmem %s65_s16, 16  ;;  %s5433_s18 = scalar_lea.vmem %s65_s16, 32 }
  0x32   :  { %p5430_p6 = scmp.ne.s32.totalorder %s65_s16, %s5429_s17  ;;  %p5434_p7 = scmp.lt.s32.totalorder %s65_s16, %s65_s16 }
  0x33   :  { %p5435_p8 = scmp.lt.s32.totalorder %s5433_s18, %s5429_s17 }
  0x35   :  { %p5436_p9 = por %p5435_p8, %p5434_p7 }
  0x37   :  { %p5437_p10 = pnand %p5436_p9, %p5430_p6 }
  0x39   :  { %5440 = shalt.err (!%p5437_p10)
}
  0x3a   :  { %67 = dma.hbm_to_vmem [thread:$0]  %s5636_s4, 16, %s65_s16, [#allocation9]  }
  0x3b   :  { %5461 = dma.done.wait [#allocation3], 1024  }
  0x3c   :  { %5462 = vsyncadd [#allocation3], 4294966272 }
  0x3d   :  { %5463 = dma.done.wait [#allocation6], 65664  }
  0x3e   :  { %5464 = vsyncadd [#allocation6], 4294901632 }
  0x3f   :  { %5465 = dma.done.wait [#allocation9], 8208  }
  0x40   :  { %5466 = vsyncadd [#allocation9], 4294959088  ;;  %v156_v0 = vld [vmem:[#allocation5 + $0x1c0] sm:$0xff]  ;;  %v85_v53 = vld [vmem:[#allocation2 + $0x8] sm:$0xff]  ;;  %s5478_s2 = smov [#allocation11]  }
  0x41   :  { %v160_v1 = vld [vmem:[#allocation5 + $0x1e0] sm:$0xff]  ;;  %v87_v54 = vld [vmem:[#allocation2 + $0x18] sm:$0xff]  ;;  %v5524_v58 = vpack.c.bf16 %v85_v53, %v85_v53  ;;  %s4586_s4 = sshll.u32 %s5478_s2, 4  ;;  %s4587_s4 = int_to_ptr.vmem [resolvable:$true] %s4586_s4 }
  0x42   :  { %v284_v2 = vld [vmem:[#allocation5 + $0x5c0] sm:$0xff]  ;;  %v4654_v3 = vcombine.high %v156_v0, %v160_v1  ;;  %v4653_v5 = vcombine.low %v156_v0, %v160_v1  ;;  %v5526_v59 = vpack.c.bf16 %v87_v54, %v87_v54  ;;  %s5441_s20 = scalar_lea.vmem %s4587_s4, 128  ;;  %p5446_p12 = scmp.lt.s32.totalorder %s4587_s4, %s4587_s4 }
  0x43   :  { %v288_v4 = vld [vmem:[#allocation5 + $0x5e0] sm:$0xff]  ;;  %3246 = vmatprep.mubr.bf16.mxu0 %v5524_v58  ;;  %p5442_p11 = scmp.ne.s32.totalorder %s4587_s4, %s5441_s20  ;;  %p5447_p13 = scmp.lt.s32.totalorder %s5441_s20, %s5441_s20 }
  0x44   :  { %v148_v6 = vld [vmem:[#allocation5 + $0x180] sm:$0xff]  ;;  %v4782_v8 = vcombine.high %v284_v2, %v288_v4  ;;  %v4781_v9 = vcombine.low %v284_v2, %v288_v4  ;;  %3214 = vmatprep.subr.bf16.mxu0 %v4654_v3  ;;  %3287 = vmatprep.mubr.bf16.mxu1 %v5526_v59 }
  0x45   :  { %v152_v7 = vld [vmem:[#allocation5 + $0x1a0] sm:$0xff]  ;;  %3215 = vmatpush1.bf16.msra.mxu0 %v4653_v5  ;;  %p5448_p0 = por %p5447_p13, %p5446_p12 }
  0x46   :  { %v4646_v10 = vcombine.high %v148_v6, %v152_v7  ;;  %v276_v11 = vld [vmem:[#allocation5 + $0x580] sm:$0xff]  ;;  %3255 = vmatprep.subr.bf16.mxu1 %v4782_v8  ;;  %v4645_v18 = vcombine.low %v148_v6, %v152_v7 }
  0x47   :  { %v280_v12 = vld [vmem:[#allocation5 + $0x5a0] sm:$0xff]  ;;  %3256 = vmatpush1.bf16.msra.mxu1 %v4781_v9  ;;  %p5449_p1 = pnand %p5448_p0, %p5442_p11 }
  0x48   :  { %v140_v13 = vld [vmem:[#allocation5 + $0x140] sm:$0xff]  ;;  %v4774_v14 = vcombine.high %v276_v11, %v280_v12  ;;  %3216 = vmatprep.subr.bf16.mxu0 %v4646_v10  ;;  %v4773_v19 = vcombine.low %v276_v11, %v280_v12 }
  0x49   :  { %v144_v15 = vld [vmem:[#allocation5 + $0x160] sm:$0xff]  ;;  %3217 = vmatpush1.bf16.msra.mxu0 %v4645_v18 }
  0x4a   :  { %v268_v16 = vld [vmem:[#allocation5 + $0x540] sm:$0xff]  ;;  %v4638_v20 = vcombine.high %v140_v13, %v144_v15  ;;  %3257 = vmatprep.subr.bf16.mxu1 %v4774_v14  ;;  %v4637_v26 = vcombine.low %v140_v13, %v144_v15 }
  0x4b   :  { %v272_v17 = vld [vmem:[#allocation5 + $0x560] sm:$0xff]  ;;  %3258 = vmatpush1.bf16.msra.mxu1 %v4773_v19 }
  0x4c   :  { %v4766_v21 = vcombine.high %v268_v16, %v272_v17  ;;  %v132_v22 = vld [vmem:[#allocation5 + $0x100] sm:$0xff]  ;;  %3218 = vmatprep.subr.bf16.mxu0 %v4638_v20  ;;  %v4765_v27 = vcombine.low %v268_v16, %v272_v17 }
  0x4d   :  { %v136_v23 = vld [vmem:[#allocation5 + $0x120] sm:$0xff]  ;;  %3219 = vmatpush1.bf16.msra.mxu0 %v4637_v26 }
  0x4e   :  { %v260_v24 = vld [vmem:[#allocation5 + $0x500] sm:$0xff]  ;;  %v4630_v28 = vcombine.high %v132_v22, %v136_v23  ;;  %3259 = vmatprep.subr.bf16.mxu1 %v4766_v21  ;;  %v4629_v34 = vcombine.low %v132_v22, %v136_v23 }
  0x4f   :  { %v264_v25 = vld [vmem:[#allocation5 + $0x520] sm:$0xff]  ;;  %3260 = vmatpush1.bf16.msra.mxu1 %v4765_v27 }
  0x50   :  { %v4758_v29 = vcombine.high %v260_v24, %v264_v25  ;;  %v124_v30 = vld [vmem:[#allocation5 + $0xc0] sm:$0xff]  ;;  %3220 = vmatprep.subr.bf16.mxu0 %v4630_v28  ;;  %v4757_v35 = vcombine.low %v260_v24, %v264_v25 }
  0x51   :  { %v128_v31 = vld [vmem:[#allocation5 + $0xe0] sm:$0xff]  ;;  %3221 = vmatpush1.bf16.msra.mxu0 %v4629_v34 }
  0x52   :  { %v252_v32 = vld [vmem:[#allocation5 + $0x4c0] sm:$0xff]  ;;  %v4622_v36 = vcombine.high %v124_v30, %v128_v31  ;;  %3261 = vmatprep.subr.bf16.mxu1 %v4758_v29  ;;  %v4621_v42 = vcombine.low %v124_v30, %v128_v31 }
  0x53   :  { %v256_v33 = vld [vmem:[#allocation5 + $0x4e0] sm:$0xff]  ;;  %3262 = vmatpush1.bf16.msra.mxu1 %v4757_v35 }
  0x54   :  { %v4750_v37 = vcombine.high %v252_v32, %v256_v33  ;;  %v116_v38 = vld [vmem:[#allocation5 + $0x80] sm:$0xff]  ;;  %3222 = vmatprep.subr.bf16.mxu0 %v4622_v36  ;;  %v4749_v43 = vcombine.low %v252_v32, %v256_v33 }
  0x55   :  { %v120_v39 = vld [vmem:[#allocation5 + $0xa0] sm:$0xff]  ;;  %3223 = vmatpush1.bf16.msra.mxu0 %v4621_v42 }
  0x56   :  { %v244_v40 = vld [vmem:[#allocation5 + $0x480] sm:$0xff]  ;;  %v4614_v44 = vcombine.high %v116_v38, %v120_v39  ;;  %3263 = vmatprep.subr.bf16.mxu1 %v4750_v37  ;;  %v4613_v50 = vcombine.low %v116_v38, %v120_v39 }
  0x57   :  { %v248_v41 = vld [vmem:[#allocation5 + $0x4a0] sm:$0xff]  ;;  %3264 = vmatpush1.bf16.msra.mxu1 %v4749_v43 }
  0x58   :  { %v4742_v45 = vcombine.high %v244_v40, %v248_v41  ;;  %v108_v46 = vld [vmem:[#allocation5 + $0x40] sm:$0xff]  ;;  %3224 = vmatprep.subr.bf16.mxu0 %v4614_v44  ;;  %v4741_v51 = vcombine.low %v244_v40, %v248_v41 }
  0x59   :  { %v112_v47 = vld [vmem:[#allocation5 + $0x60] sm:$0xff]  ;;  %3225 = vmatpush1.bf16.msra.mxu0 %v4613_v50 }
  0x5a   :  { %v236_v48 = vld [vmem:[#allocation5 + $0x440] sm:$0xff]  ;;  %v4606_v52 = vcombine.high %v108_v46, %v112_v47  ;;  %3265 = vmatprep.subr.bf16.mxu1 %v4742_v45  ;;  %v4605_v62 = vcombine.low %v108_v46, %v112_v47 }
  0x5b   :  { %v240_v49 = vld [vmem:[#allocation5 + $0x460] sm:$0xff]  ;;  %3266 = vmatpush1.bf16.msra.mxu1 %v4741_v51 }
  0x5c   :  { %v4734_v55 = vcombine.high %v236_v48, %v240_v49  ;;  %v100_v56 = vld [vmem:[#allocation5] sm:$0xff]  ;;  %3226 = vmatprep.subr.bf16.mxu0 %v4606_v52  ;;  %v4733_v63 = vcombine.low %v236_v48, %v240_v49 }
  0x5d   :  { %v104_v57 = vld [vmem:[#allocation5 + $0x20] sm:$0xff]  ;;  %3227 = vmatpush1.bf16.msra.mxu0 %v4605_v62 }
  0x5e   :  { %v228_v60 = vld [vmem:[#allocation5 + $0x400] sm:$0xff]  ;;  %v4598_v0 = vcombine.high %v100_v56, %v104_v57  ;;  %3267 = vmatprep.subr.bf16.mxu1 %v4734_v55  ;;  %v4597_v6 = vcombine.low %v100_v56, %v104_v57 }
  0x5f   :  { %v232_v61 = vld [vmem:[#allocation5 + $0x420] sm:$0xff]  ;;  %3268 = vmatpush1.bf16.msra.mxu1 %v4733_v63 }
  0x60   :  { %v4726_v1 = vcombine.high %v228_v60, %v232_v61  ;;  %v220_v2 = vld [vmem:[#allocation5 + $0x3c0] sm:$0xff]  ;;  %3228 = vmatprep.subr.bf16.mxu0 %v4598_v0  ;;  %v4725_v7 = vcombine.low %v228_v60, %v232_v61 }
  0x61   :  { %v224_v3 = vld [vmem:[#allocation5 + $0x3e0] sm:$0xff]  ;;  %3229 = vmatpush1.bf16.msra.mxu0 %v4597_v6 }
  0x62   :  { %v348_v4 = vld [vmem:[#allocation5 + $0x7c0] sm:$0xff]  ;;  %v4718_v8 = vcombine.high %v220_v2, %v224_v3  ;;  %3269 = vmatprep.subr.bf16.mxu1 %v4726_v1  ;;  %v4717_v14 = vcombine.low %v220_v2, %v224_v3 }
  0x63   :  { %v352_v5 = vld [vmem:[#allocation5 + $0x7e0] sm:$0xff]  ;;  %3270 = vmatpush1.bf16.msra.mxu1 %v4725_v7 }
  0x64   :  { %v4846_v9 = vcombine.high %v348_v4, %v352_v5  ;;  %v212_v10 = vld [vmem:[#allocation5 + $0x380] sm:$0xff]  ;;  %3230 = vmatprep.subr.bf16.mxu0 %v4718_v8  ;;  %v4845_v15 = vcombine.low %v348_v4, %v352_v5 }
  0x65   :  { %v216_v11 = vld [vmem:[#allocation5 + $0x3a0] sm:$0xff]  ;;  %3231 = vmatpush2.bf16.msra.mxu0 %v4717_v14 }
  0x66   :  { %v340_v12 = vld [vmem:[#allocation5 + $0x780] sm:$0xff]  ;;  %v4710_v16 = vcombine.high %v212_v10, %v216_v11  ;;  %3271 = vmatprep.subr.bf16.mxu1 %v4846_v9  ;;  %v4709_v22 = vcombine.low %v212_v10, %v216_v11  ;;  %v86_v11 = vld [vmem:[#allocation2 + $0x10] sm:$0xff] }
  0x67   :  { %v344_v13 = vld [vmem:[#allocation5 + $0x7a0] sm:$0xff]  ;;  %3272 = vmatpush2.bf16.msra.mxu1 %v4845_v15 }
  0x68   :  { %v4838_v17 = vcombine.high %v340_v12, %v344_v13  ;;  %v204_v18 = vld [vmem:[#allocation5 + $0x340] sm:$0xff]  ;;  %3232 = vmatprep.subr.bf16.mxu0 %v4710_v16  ;;  %v4837_v23 = vcombine.low %v340_v12, %v344_v13 }
  0x69   :  { %v208_v19 = vld [vmem:[#allocation5 + $0x360] sm:$0xff]  ;;  %3233 = vmatpush2.bf16.msra.mxu0 %v4709_v22  ;;  %v91_v22 = vld [vmem:[#allocation2 + $0x38] sm:$0xff] }
  0x6a   :  { %v332_v20 = vld [vmem:[#allocation5 + $0x740] sm:$0xff]  ;;  %v4702_v24 = vcombine.high %v204_v18, %v208_v19  ;;  %3273 = vmatprep.subr.bf16.mxu1 %v4838_v17  ;;  %v4701_v30 = vcombine.low %v204_v18, %v208_v19  ;;  %v89_v19 = vld [vmem:[#allocation2 + $0x28] sm:$0xff] }
  0x6b   :  { %v336_v21 = vld [vmem:[#allocation5 + $0x760] sm:$0xff]  ;;  %3274 = vmatpush2.bf16.msra.mxu1 %v4837_v23 }
  0x6c   :  { %v4830_v25 = vcombine.high %v332_v20, %v336_v21  ;;  %v196_v26 = vld [vmem:[#allocation5 + $0x300] sm:$0xff]  ;;  %3234 = vmatprep.subr.bf16.mxu0 %v4702_v24  ;;  %v4829_v31 = vcombine.low %v332_v20, %v336_v21  ;;  %v5532_v20 = vpack.c.bf16 %v86_v11, %v86_v11 }
  0x6d   :  { %v200_v27 = vld [vmem:[#allocation5 + $0x320] sm:$0xff]  ;;  %3235 = vmatpush2.bf16.msra.mxu0 %v4701_v30 }
  0x6e   :  { %v324_v28 = vld [vmem:[#allocation5 + $0x700] sm:$0xff]  ;;  %v4694_v32 = vcombine.high %v196_v26, %v200_v27  ;;  %3275 = vmatprep.subr.bf16.mxu1 %v4830_v25  ;;  %v4693_v38 = vcombine.low %v196_v26, %v200_v27 }
  0x6f   :  { %v328_v29 = vld [vmem:[#allocation5 + $0x720] sm:$0xff]  ;;  %3276 = vmatpush2.bf16.msra.mxu1 %v4829_v31  ;;  %v5537_v31 = vpack.c.bf16 %v91_v22, %v91_v22 }
  0x70   :  { %v4822_v33 = vcombine.high %v324_v28, %v328_v29  ;;  %v188_v34 = vld [vmem:[#allocation5 + $0x2c0] sm:$0xff]  ;;  %3236 = vmatprep.subr.bf16.mxu0 %v4694_v32  ;;  %v4821_v39 = vcombine.low %v324_v28, %v328_v29  ;;  %v5534_v28 = vpack.c.bf16 %v89_v19, %v89_v19 }
  0x71   :  { %v192_v35 = vld [vmem:[#allocation5 + $0x2e0] sm:$0xff]  ;;  %3237 = vmatpush2.bf16.msra.mxu0 %v4693_v38 }
  0x72   :  { %v316_v36 = vld [vmem:[#allocation5 + $0x6c0] sm:$0xff]  ;;  %v4686_v40 = vcombine.high %v188_v34, %v192_v35  ;;  %3277 = vmatprep.subr.bf16.mxu1 %v4822_v33  ;;  %v4685_v46 = vcombine.low %v188_v34, %v192_v35 }
  0x73   :  { %v320_v37 = vld [vmem:[#allocation5 + $0x6e0] sm:$0xff]  ;;  %3278 = vmatpush2.bf16.msra.mxu1 %v4821_v39 }
  0x74   :  { %v4814_v41 = vcombine.high %v316_v36, %v320_v37  ;;  %v180_v42 = vld [vmem:[#allocation5 + $0x280] sm:$0xff]  ;;  %3238 = vmatprep.subr.bf16.mxu0 %v4686_v40  ;;  %v4813_v47 = vcombine.low %v316_v36, %v320_v37 }
  0x75   :  { %v184_v43 = vld [vmem:[#allocation5 + $0x2a0] sm:$0xff]  ;;  %3239 = vmatpush2.bf16.msra.mxu0 %v4685_v46 }
  0x76   :  { %v308_v44 = vld [vmem:[#allocation5 + $0x680] sm:$0xff]  ;;  %v4678_v48 = vcombine.high %v180_v42, %v184_v43  ;;  %3279 = vmatprep.subr.bf16.mxu1 %v4814_v41  ;;  %v4677_v54 = vcombine.low %v180_v42, %v184_v43 }
  0x77   :  { %v312_v45 = vld [vmem:[#allocation5 + $0x6a0] sm:$0xff]  ;;  %3280 = vmatpush2.bf16.msra.mxu1 %v4813_v47 }
  0x78   :  { %v4806_v49 = vcombine.high %v308_v44, %v312_v45  ;;  %v172_v50 = vld [vmem:[#allocation5 + $0x240] sm:$0xff]  ;;  %3240 = vmatprep.subr.bf16.mxu0 %v4678_v48  ;;  %v4805_v55 = vcombine.low %v308_v44, %v312_v45 }
  0x79   :  { %v176_v51 = vld [vmem:[#allocation5 + $0x260] sm:$0xff]  ;;  %3241 = vmatpush2.bf16.msra.mxu0 %v4677_v54 }
  0x7a   :  { %v300_v52 = vld [vmem:[#allocation5 + $0x640] sm:$0xff]  ;;  %v4670_v56 = vcombine.high %v172_v50, %v176_v51  ;;  %3281 = vmatprep.subr.bf16.mxu1 %v4806_v49  ;;  %v4669_v0 = vcombine.low %v172_v50, %v176_v51 }
  0x7b   :  { %v304_v53 = vld [vmem:[#allocation5 + $0x660] sm:$0xff]  ;;  %3282 = vmatpush2.bf16.msra.mxu1 %v4805_v55 }
  0x7c   :  { %v4798_v57 = vcombine.high %v300_v52, %v304_v53  ;;  %v164_v60 = vld [vmem:[#allocation5 + $0x200] sm:$0xff]  ;;  %3242 = vmatprep.subr.bf16.mxu0 %v4670_v56  ;;  %v4797_v1 = vcombine.low %v300_v52, %v304_v53 }
  0x7d   :  { %v168_v61 = vld [vmem:[#allocation5 + $0x220] sm:$0xff]  ;;  %3243 = vmatpush2.bf16.msra.mxu0 %v4669_v0 }
  0x7e   :  { %v292_v62 = vld [vmem:[#allocation5 + $0x600] sm:$0xff]  ;;  %v4662_v2 = vcombine.high %v164_v60, %v168_v61  ;;  %3283 = vmatprep.subr.bf16.mxu1 %v4798_v57  ;;  %v4661_v8 = vcombine.low %v164_v60, %v168_v61 }
  0x7f   :  { %v296_v63 = vld [vmem:[#allocation5 + $0x620] sm:$0xff]  ;;  %3284 = vmatpush2.bf16.msra.mxu1 %v4797_v1 }
  0x80   :  { %v4790_v3 = vcombine.high %v292_v62, %v296_v63  ;;  %v412_v4 = vld [vmem:[#allocation5 + $0x9c0] sm:$0xff]  ;;  %3244 = vmatprep.subr.bf16.mxu0 %v4662_v2  ;;  %v4789_v10 = vcombine.low %v292_v62, %v296_v63 }
  0x81   :  { %v416_v5 = vld [vmem:[#allocation5 + $0x9e0] sm:$0xff]  ;;  %3245 = vmatpush2.bf16.msra.mxu0 %v4661_v8 }
  0x82   :  { %v540_v6 = vld [vmem:[#allocation5 + $0xdc0] sm:$0xff]  ;;  %v4910_v12 = vcombine.high %v412_v4, %v416_v5  ;;  %3285 = vmatprep.subr.bf16.mxu1 %v4790_v3  ;;  %v4909_v21 = vcombine.low %v412_v4, %v416_v5 }
  0x83   :  { %v544_v7 = vld [vmem:[#allocation5 + $0xde0] sm:$0xff]  ;;  %3286 = vmatpush2.bf16.msra.mxu1 %v4789_v10 }
  0x84   :  { %v84_v9 = vld [vmem:[#allocation2] sm:$0xff]  ;;  %v5038_v13 = vcombine.high %v540_v6, %v544_v7  ;;  %3296 = vmatprep.subr.bf16.mxu0 %v4910_v12  ;;  %v5037_v23 = vcombine.low %v540_v6, %v544_v7 }
  0x85   :  { %v404_v14 = vld [vmem:[#allocation5 + $0x980] sm:$0xff]  ;;  %v5530_v16 = vpack.c.bf16 %v84_v9, %v84_v9 }
  0x86   :  { %v408_v15 = vld [vmem:[#allocation5 + $0x9a0] sm:$0xff]  ;;  %3337 = vmatprep.subr.bf16.mxu1 %v5038_v13  ;;  %3288 = vmatmul.mubr.bf16.vlgmr.msra.gmra.mxu1 %v5532_v20 }
  0x87   :  { %v532_v17 = vld [vmem:[#allocation5 + $0xd80] sm:$0xff]  ;;  %v4902_v24 = vcombine.high %v404_v14, %v408_v15  ;;  %3247 = vmatmul.mubr.bf16.vlgmr.msra.gmra.mxu0 %v5530_v16  ;;  %v4901_v32 = vcombine.low %v404_v14, %v408_v15  ;;  %3338 = vmatpush1.bf16.msra.mxu1 %v5037_v23 }
  0x88   :  { %v536_v18 = vld [vmem:[#allocation5 + $0xda0] sm:$0xff]  ;;  %3297 = vmatpush1.bf16.msra.mxu0 %v4909_v21  ;;  %3328 = vmatprep.mubr.bf16.mxu0 %v5534_v28 }
  0x89   :  { %v5030_v25 = vcombine.high %v532_v17, %v536_v18  ;;  %v396_v26 = vld [vmem:[#allocation5 + $0x940] sm:$0xff]  ;;  %3298 = vmatprep.subr.bf16.mxu0 %v4902_v24  ;;  %v5029_v33 = vcombine.low %v532_v17, %v536_v18  ;;  %3369 = vmatprep.mubr.bf16.mxu1 %v5537_v31 }
  0x8a   :  { %v400_v27 = vld [vmem:[#allocation5 + $0x960] sm:$0xff] }
  0x8b   :  { %v524_v29 = vld [vmem:[#allocation5 + $0xd40] sm:$0xff]  ;;  %v4894_v34 = vcombine.high %v396_v26, %v400_v27  ;;  %3339 = vmatprep.subr.bf16.mxu1 %v5030_v25  ;;  %v4893_v40 = vcombine.low %v396_v26, %v400_v27 }
  0x8c   :  { %v528_v30 = vld [vmem:[#allocation5 + $0xd60] sm:$0xff]  ;;  %3299 = vmatpush1.bf16.msra.mxu0 %v4901_v32  ;;  %3340 = vmatpush1.bf16.msra.mxu1 %v5029_v33 }
  0x8d   :  { %v388_v35 = vld [vmem:[#allocation5 + $0x900] sm:$0xff]  ;;  %v5022_v38 = vcombine.high %v524_v29, %v528_v30  ;;  %3300 = vmatprep.subr.bf16.mxu0 %v4894_v34  ;;  %v5021_v41 = vcombine.low %v524_v29, %v528_v30 }
  0x8e   :  { %v392_v36 = vld [vmem:[#allocation5 + $0x920] sm:$0xff] }
  0x8f   :  { %v516_v37 = vld [vmem:[#allocation5 + $0xd00] sm:$0xff]  ;;  %v4886_v42 = vcombine.high %v388_v35, %v392_v36  ;;  %3341 = vmatprep.subr.bf16.mxu1 %v5022_v38  ;;  %v4885_v48 = vcombine.low %v388_v35, %v392_v36 }
  0x90   :  { %v520_v39 = vld [vmem:[#allocation5 + $0xd20] sm:$0xff]  ;;  %3301 = vmatpush1.bf16.msra.mxu0 %v4893_v40  ;;  %3342 = vmatpush1.bf16.msra.mxu1 %v5021_v41 }
  0x91   :  { %v380_v43 = vld [vmem:[#allocation5 + $0x8c0] sm:$0xff]  ;;  %v5014_v46 = vcombine.high %v516_v37, %v520_v39  ;;  %3302 = vmatprep.subr.bf16.mxu0 %v4886_v42  ;;  %v5013_v49 = vcombine.low %v516_v37, %v520_v39 }
  0x92   :  { %v384_v44 = vld [vmem:[#allocation5 + $0x8e0] sm:$0xff] }
  0x93   :  { %v508_v45 = vld [vmem:[#allocation5 + $0xcc0] sm:$0xff]  ;;  %v4878_v50 = vcombine.high %v380_v43, %v384_v44  ;;  %3343 = vmatprep.subr.bf16.mxu1 %v5014_v46  ;;  %v4877_v56 = vcombine.low %v380_v43, %v384_v44 }
  0x94   :  { %v512_v47 = vld [vmem:[#allocation5 + $0xce0] sm:$0xff]  ;;  %3303 = vmatpush1.bf16.msra.mxu0 %v4885_v48  ;;  %3344 = vmatpush1.bf16.msra.mxu1 %v5013_v49 }
  0x95   :  { %v372_v51 = vld [vmem:[#allocation5 + $0x880] sm:$0xff]  ;;  %v5006_v54 = vcombine.high %v508_v45, %v512_v47  ;;  %3304 = vmatprep.subr.bf16.mxu0 %v4878_v50  ;;  %v5005_v57 = vcombine.low %v508_v45, %v512_v47 }
  0x96   :  { %v376_v52 = vld [vmem:[#allocation5 + $0x8a0] sm:$0xff] }
  0x97   :  { %v500_v53 = vld [vmem:[#allocation5 + $0xc80] sm:$0xff]  ;;  %v4870_v60 = vcombine.high %v372_v51, %v376_v52  ;;  %3345 = vmatprep.subr.bf16.mxu1 %v5006_v54  ;;  %v4869_v2 = vcombine.low %v372_v51, %v376_v52 }
  0x98   :  { %v504_v55 = vld [vmem:[#allocation5 + $0xca0] sm:$0xff]  ;;  %3305 = vmatpush1.bf16.msra.mxu0 %v4877_v56  ;;  %3346 = vmatpush1.bf16.msra.mxu1 %v5005_v57 }
  0x99   :  { %v364_v61 = vld [vmem:[#allocation5 + $0x840] sm:$0xff]  ;;  %v4998_v0 = vcombine.high %v500_v53, %v504_v55  ;;  %3306 = vmatprep.subr.bf16.mxu0 %v4870_v60  ;;  %v4997_v3 = vcombine.low %v500_v53, %v504_v55 }
  0x9a   :  { %v368_v62 = vld [vmem:[#allocation5 + $0x860] sm:$0xff] }
  0x9b   :  { %v492_v63 = vld [vmem:[#allocation5 + $0xc40] sm:$0xff]  ;;  %v4862_v4 = vcombine.high %v364_v61, %v368_v62  ;;  %3347 = vmatprep.subr.bf16.mxu1 %v4998_v0  ;;  %v4861_v10 = vcombine.low %v364_v61, %v368_v62 }
  0x9c   :  { %v496_v1 = vld [vmem:[#allocation5 + $0xc60] sm:$0xff]  ;;  %3307 = vmatpush1.bf16.msra.mxu0 %v4869_v2  ;;  %3348 = vmatpush1.bf16.msra.mxu1 %v4997_v3 }
  0x9d   :  { %v356_v5 = vld [vmem:[#allocation5 + $0x800] sm:$0xff]  ;;  %v4990_v8 = vcombine.high %v492_v63, %v496_v1  ;;  %3308 = vmatprep.subr.bf16.mxu0 %v4862_v4  ;;  %v4989_v11 = vcombine.low %v492_v63, %v496_v1 }
  0x9e   :  { %v360_v6 = vld [vmem:[#allocation5 + $0x820] sm:$0xff] }
  0x9f   :  { %v484_v7 = vld [vmem:[#allocation5 + $0xc00] sm:$0xff]  ;;  %v4854_v12 = vcombine.high %v356_v5, %v360_v6  ;;  %3349 = vmatprep.subr.bf16.mxu1 %v4990_v8  ;;  %v4853_v19 = vcombine.low %v356_v5, %v360_v6 }
  0xa0   :  { %v488_v9 = vld [vmem:[#allocation5 + $0xc20] sm:$0xff]  ;;  %3309 = vmatpush1.bf16.msra.mxu0 %v4861_v10  ;;  %3350 = vmatpush1.bf16.msra.mxu1 %v4989_v11 }
  0xa1   :  { %v476_v13 = vld [vmem:[#allocation5 + $0xbc0] sm:$0xff]  ;;  %v4982_v17 = vcombine.high %v484_v7, %v488_v9  ;;  %3310 = vmatprep.subr.bf16.mxu0 %v4854_v12  ;;  %v4981_v21 = vcombine.low %v484_v7, %v488_v9 }
  0xa2   :  { %v480_v14 = vld [vmem:[#allocation5 + $0xbe0] sm:$0xff] }
  0xa3   :  { %v604_v15 = vld [vmem:[#allocation5 + $0xfc0] sm:$0xff]  ;;  %v4974_v22 = vcombine.high %v476_v13, %v480_v14  ;;  %3351 = vmatprep.subr.bf16.mxu1 %v4982_v17  ;;  %v4973_v29 = vcombine.low %v476_v13, %v480_v14 }
  0xa4   :  { %v608_v18 = vld [vmem:[#allocation5 + $0xfe0] sm:$0xff]  ;;  %3311 = vmatpush1.bf16.msra.mxu0 %v4853_v19  ;;  %3352 = vmatpush1.bf16.msra.mxu1 %v4981_v21  ;;  %v157_v21 = vld [vmem:[#allocation5 + $0x1c8] sm:$0xff] }
  0xa5   :  { %v468_v23 = vld [vmem:[#allocation5 + $0xb80] sm:$0xff]  ;;  %v5102_v26 = vcombine.high %v604_v15, %v608_v18  ;;  %3312 = vmatprep.subr.bf16.mxu0 %v4974_v22  ;;  %v5101_v30 = vcombine.low %v604_v15, %v608_v18  ;;  %v161_v22 = vld [vmem:[#allocation5 + $0x1e8] sm:$0xff] }
  0xa6   :  { %v472_v24 = vld [vmem:[#allocation5 + $0xba0] sm:$0xff] }
  0xa7   :  { %v596_v25 = vld [vmem:[#allocation5 + $0xf80] sm:$0xff]  ;;  %v4966_v32 = vcombine.high %v468_v23, %v472_v24  ;;  %3353 = vmatprep.subr.bf16.mxu1 %v5102_v26  ;;  %v4965_v38 = vcombine.low %v468_v23, %v472_v24  ;;  %v285_v23 = vld [vmem:[#allocation5 + $0x5c8] sm:$0xff] }
  0xa8   :  { %v600_v27 = vld [vmem:[#allocation5 + $0xfa0] sm:$0xff]  ;;  %3313 = vmatpush2.bf16.msra.mxu0 %v4973_v29  ;;  %3354 = vmatpush2.bf16.msra.mxu1 %v5101_v30  ;;  %v289_v26 = vld [vmem:[#allocation5 + $0x5e8] sm:$0xff] }
  0xa9   :  { %v460_v33 = vld [vmem:[#allocation5 + $0xb40] sm:$0xff]  ;;  %v5094_v36 = vcombine.high %v596_v25, %v600_v27  ;;  %3314 = vmatprep.subr.bf16.mxu0 %v4966_v32  ;;  %v5093_v39 = vcombine.low %v596_v25, %v600_v27  ;;  %v90_v27 = vld [vmem:[#allocation2 + $0x30] sm:$0xff]  ;;  %v4656_v32 = vcombine.high %v157_v21, %v161_v22 }
  0xaa   :  { %v464_v34 = vld [vmem:[#allocation5 + $0xb60] sm:$0xff] }
  0xab   :  { %v588_v35 = vld [vmem:[#allocation5 + $0xf40] sm:$0xff]  ;;  %v4958_v40 = vcombine.high %v460_v33, %v464_v34  ;;  %3355 = vmatprep.subr.bf16.mxu1 %v5094_v36  ;;  %v4957_v46 = vcombine.low %v460_v33, %v464_v34  ;;  %v149_v33 = vld [vmem:[#allocation5 + $0x188] sm:$0xff]  ;;  %v4784_v36 = vcombine.high %v285_v23, %v289_v26 }
  0xac   :  { %v592_v37 = vld [vmem:[#allocation5 + $0xf60] sm:$0xff]  ;;  %3315 = vmatpush2.bf16.msra.mxu0 %v4965_v38  ;;  %3356 = vmatpush2.bf16.msra.mxu1 %v5093_v39  ;;  %v153_v34 = vld [vmem:[#allocation5 + $0x1a8] sm:$0xff]  ;;  %v5544_v39 = vpack.c.bf16 %v90_v27, %v90_v27 }
  0xad   :  { %v452_v41 = vld [vmem:[#allocation5 + $0xb00] sm:$0xff]  ;;  %v5086_v44 = vcombine.high %v588_v35, %v592_v37  ;;  %3316 = vmatprep.subr.bf16.mxu0 %v4958_v40  ;;  %v5085_v47 = vcombine.low %v588_v35, %v592_v37  ;;  %v277_v35 = vld [vmem:[#allocation5 + $0x588] sm:$0xff]  ;;  %v4655_v40 = vcombine.low %v157_v21, %v161_v22 }
  0xae   :  { %v456_v42 = vld [vmem:[#allocation5 + $0xb20] sm:$0xff]  ;;  %v281_v37 = vld [vmem:[#allocation5 + $0x5a8] sm:$0xff] }
  0xaf   :  { %v580_v43 = vld [vmem:[#allocation5 + $0xf00] sm:$0xff]  ;;  %v4950_v48 = vcombine.high %v452_v41, %v456_v42  ;;  %3357 = vmatprep.subr.bf16.mxu1 %v5086_v44  ;;  %v4949_v54 = vcombine.low %v452_v41, %v456_v42  ;;  %v4783_v41 = vcombine.low %v285_v23, %v289_v26  ;;  %v4648_v42 = vcombine.high %v149_v33, %v153_v34  ;;  %v229_v26 = vld [vmem:[#allocation5 + $0x408] sm:$0xff] }
  0xb0   :  { %v584_v45 = vld [vmem:[#allocation5 + $0xf20] sm:$0xff]  ;;  %3317 = vmatpush2.bf16.msra.mxu0 %v4957_v46  ;;  %3358 = vmatpush2.bf16.msra.mxu1 %v5085_v47  ;;  %v4776_v44 = vcombine.high %v277_v35, %v281_v37  ;;  %v269_v46 = vld [vmem:[#allocation5 + $0x548] sm:$0xff] }
  0xb1   :  { %v444_v49 = vld [vmem:[#allocation5 + $0xac0] sm:$0xff]  ;;  %v5078_v52 = vcombine.high %v580_v43, %v584_v45  ;;  %3318 = vmatprep.subr.bf16.mxu0 %v4950_v48  ;;  %v5077_v55 = vcombine.low %v580_v43, %v584_v45  ;;  %v141_v43 = vld [vmem:[#allocation5 + $0x148] sm:$0xff]  ;;  %v4647_v48 = vcombine.low %v149_v33, %v153_v34 }
  0xb2   :  { %v448_v50 = vld [vmem:[#allocation5 + $0xae0] sm:$0xff]  ;;  %v145_v45 = vld [vmem:[#allocation5 + $0x168] sm:$0xff] }
  0xb3   :  { %v572_v51 = vld [vmem:[#allocation5 + $0xec0] sm:$0xff]  ;;  %v4942_v56 = vcombine.high %v444_v49, %v448_v50  ;;  %3359 = vmatprep.subr.bf16.mxu1 %v5078_v52  ;;  %v4941_v0 = vcombine.low %v444_v49, %v448_v50  ;;  %v273_v47 = vld [vmem:[#allocation5 + $0x568] sm:$0xff]  ;;  %v4775_v49 = vcombine.low %v277_v35, %v281_v37  ;;  %v4640_v50 = vcombine.high %v141_v43, %v145_v45 }
  0xb4   :  { %v576_v53 = vld [vmem:[#allocation5 + $0xee0] sm:$0xff]  ;;  %3319 = vmatpush2.bf16.msra.mxu0 %v4949_v54  ;;  %3360 = vmatpush2.bf16.msra.mxu1 %v5077_v55  ;;  %v133_v52 = vld [vmem:[#allocation5 + $0x108] sm:$0xff] }
  0xb5   :  { %v436_v57 = vld [vmem:[#allocation5 + $0xa80] sm:$0xff]  ;;  %v5070_v62 = vcombine.high %v572_v51, %v576_v53  ;;  %3320 = vmatprep.subr.bf16.mxu0 %v4942_v56  ;;  %v5069_v1 = vcombine.low %v572_v51, %v576_v53  ;;  %v4768_v51 = vcombine.high %v269_v46, %v273_v47  ;;  %v137_v53 = vld [vmem:[#allocation5 + $0x128] sm:$0xff]  ;;  %v4639_v56 = vcombine.low %v141_v43, %v145_v45 }
  0xb6   :  { %v440_v60 = vld [vmem:[#allocation5 + $0xaa0] sm:$0xff]  ;;  %v261_v54 = vld [vmem:[#allocation5 + $0x508] sm:$0xff] }
  0xb7   :  { %v564_v61 = vld [vmem:[#allocation5 + $0xe80] sm:$0xff]  ;;  %v4934_v2 = vcombine.high %v436_v57, %v440_v60  ;;  %3361 = vmatprep.subr.bf16.mxu1 %v5070_v62  ;;  %v4933_v8 = vcombine.low %v436_v57, %v440_v60  ;;  %v265_v55 = vld [vmem:[#allocation5 + $0x528] sm:$0xff]  ;;  %v4767_v57 = vcombine.low %v269_v46, %v273_v47  ;;  %v4632_v60 = vcombine.high %v133_v52, %v137_v53 }
  0xb8   :  { %v568_v63 = vld [vmem:[#allocation5 + $0xea0] sm:$0xff]  ;;  %3321 = vmatpush2.bf16.msra.mxu0 %v4941_v0  ;;  %3362 = vmatpush2.bf16.msra.mxu1 %v5069_v1  ;;  %v125_v62 = vld [vmem:[#allocation5 + $0xc8] sm:$0xff] }
  0xb9   :  { %v428_v3 = vld [vmem:[#allocation5 + $0xa40] sm:$0xff]  ;;  %v5062_v6 = vcombine.high %v564_v61, %v568_v63  ;;  %3322 = vmatprep.subr.bf16.mxu0 %v4934_v2  ;;  %v5061_v9 = vcombine.low %v564_v61, %v568_v63  ;;  %v4760_v61 = vcombine.high %v261_v54, %v265_v55  ;;  %v129_v63 = vld [vmem:[#allocation5 + $0xe8] sm:$0xff]  ;;  %v4631_v2 = vcombine.low %v133_v52, %v137_v53 }
  0xba   :  { %v432_v4 = vld [vmem:[#allocation5 + $0xa60] sm:$0xff]  ;;  %v253_v0 = vld [vmem:[#allocation5 + $0x4c8] sm:$0xff] }
  0xbb   :  { %v556_v5 = vld [vmem:[#allocation5 + $0xe40] sm:$0xff]  ;;  %v4926_v10 = vcombine.high %v428_v3, %v432_v4  ;;  %3363 = vmatprep.subr.bf16.mxu1 %v5062_v6  ;;  %v4925_v17 = vcombine.low %v428_v3, %v432_v4  ;;  %v257_v1 = vld [vmem:[#allocation5 + $0x4e8] sm:$0xff]  ;;  %v4759_v3 = vcombine.low %v261_v54, %v265_v55  ;;  %v4624_v4 = vcombine.high %v125_v62, %v129_v63 }
  0xbc   :  { %v560_v7 = vld [vmem:[#allocation5 + $0xe60] sm:$0xff]  ;;  %3323 = vmatpush2.bf16.msra.mxu0 %v4933_v8  ;;  %3364 = vmatpush2.bf16.msra.mxu1 %v5061_v9  ;;  %v117_v6 = vld [vmem:[#allocation5 + $0x88] sm:$0xff] }
  0xbd   :  { %v420_v11 = vld [vmem:[#allocation5 + $0xa00] sm:$0xff]  ;;  %v5054_v14 = vcombine.high %v556_v5, %v560_v7  ;;  %3324 = vmatprep.subr.bf16.mxu0 %v4926_v10  ;;  %v5053_v18 = vcombine.low %v556_v5, %v560_v7  ;;  %v4752_v5 = vcombine.high %v253_v0, %v257_v1  ;;  %v121_v7 = vld [vmem:[#allocation5 + $0xa8] sm:$0xff]  ;;  %v4623_v10 = vcombine.low %v125_v62, %v129_v63 }
  0xbe   :  { %v424_v12 = vld [vmem:[#allocation5 + $0xa20] sm:$0xff]  ;;  %v245_v8 = vld [vmem:[#allocation5 + $0x488] sm:$0xff] }
  0xbf   :  { %v548_v13 = vld [vmem:[#allocation5 + $0xe00] sm:$0xff]  ;;  %v4918_v19 = vcombine.high %v420_v11, %v424_v12  ;;  %3365 = vmatprep.subr.bf16.mxu1 %v5054_v14  ;;  %v4917_v29 = vcombine.low %v420_v11, %v424_v12  ;;  %v249_v9 = vld [vmem:[#allocation5 + $0x4a8] sm:$0xff]  ;;  %v4751_v11 = vcombine.low %v253_v0, %v257_v1  ;;  %v4616_v12 = vcombine.high %v117_v6, %v121_v7 }
  0xc0   :  { %v552_v15 = vld [vmem:[#allocation5 + $0xe20] sm:$0xff]  ;;  %3325 = vmatpush2.bf16.msra.mxu0 %v4925_v17  ;;  %3366 = vmatpush2.bf16.msra.mxu1 %v5053_v18  ;;  %v109_v14 = vld [vmem:[#allocation5 + $0x48] sm:$0xff]  ;;  %v4743_v21 = vcombine.low %v245_v8, %v249_v9 }
  0xc1   :  { %v5046_v24 = vcombine.high %v548_v13, %v552_v15  ;;  %v88_v25 = vld [vmem:[#allocation2 + $0x20] sm:$0xff]  ;;  %3326 = vmatprep.subr.bf16.mxu0 %v4918_v19  ;;  %v5045_v30 = vcombine.low %v548_v13, %v552_v15  ;;  %v4744_v13 = vcombine.high %v245_v8, %v249_v9  ;;  %v113_v15 = vld [vmem:[#allocation5 + $0x68] sm:$0xff]  ;;  %v4615_v19 = vcombine.low %v117_v6, %v121_v7 }
  0xc2   :  { %v5542_v38 = vpack.c.bf16 %v88_v25, %v88_v25  ;;  %v237_v17 = vld [vmem:[#allocation5 + $0x448] sm:$0xff]  ;;  %v4608_v22 = vcombine.high %v109_v14, %v113_v15 }
  0xc3   :  { %3367 = vmatprep.subr.bf16.mxu1 %v5046_v24  ;;  %v241_v18 = vld [vmem:[#allocation5 + $0x468] sm:$0xff] }
  0xc4   :  { %3327 = vmatpush2.bf16.msra.mxu0 %v4917_v29  ;;  %3368 = vmatpush2.bf16.msra.mxu1 %v5045_v30  ;;  %v4736_v23 = vcombine.high %v237_v17, %v241_v18  ;;  %v101_v24 = vld [vmem:[#allocation5 + $0x8] sm:$0xff]  ;;  %v4607_v29 = vcombine.low %v109_v14, %v113_v15  ;;  %v4735_v30 = vcombine.low %v237_v17, %v241_v18 }
  0xc5   :  { %3378 = vmatprep.subr.bf16.mxu0 %v4656_v32  ;;  %3419 = vmatprep.subr.bf16.mxu1 %v4784_v36  ;;  %v105_v25 = vld [vmem:[#allocation5 + $0x28] sm:$0xff] }
  0xc6   :  { %v233_v27 = vld [vmem:[#allocation5 + $0x428] sm:$0xff]  ;;  %v4600_v32 = vcombine.high %v101_v24, %v105_v25 }
  0xc7   :  { %3329 = vmatmul.mubr.bf16.vlgmr.msra.gmra.mxu0 %v5542_v38  ;;  %3370 = vmatmul.mubr.bf16.vlgmr.msra.gmra.mxu1 %v5544_v39  ;;  %v4728_v33 = vcombine.high %v229_v26, %v233_v27  ;;  %v221_v34 = vld [vmem:[#allocation5 + $0x3c8] sm:$0xff] }
  0xc8   :  { %3379 = vmatpush1.bf16.msra.mxu0 %v4655_v40  ;;  %3420 = vmatpush1.bf16.msra.mxu1 %v4783_v41  ;;  %v225_v35 = vld [vmem:[#allocation5 + $0x3e8] sm:$0xff]  ;;  %v4599_v40 = vcombine.low %v101_v24, %v105_v25  ;;  %v4727_v41 = vcombine.low %v229_v26, %v233_v27 }
  0xc9   :  { %3380 = vmatprep.subr.bf16.mxu0 %v4648_v42  ;;  %3421 = vmatprep.subr.bf16.mxu1 %v4776_v44  ;;  %v349_v36 = vld [vmem:[#allocation5 + $0x7c8] sm:$0xff]  ;;  %v4720_v42 = vcombine.high %v221_v34, %v225_v35 }
  0xca   :  { %3410 = vmatprep.mubr.bf16.mxu0 %v5524_v58  ;;  %3451 = vmatprep.mubr.bf16.mxu1 %v5526_v59  ;;  %v353_v37 = vld [vmem:[#allocation5 + $0x7e8] sm:$0xff] }
  0xcb   :  { %v4848_v43 = vcombine.high %v349_v36, %v353_v37  ;;  %v213_v44 = vld [vmem:[#allocation5 + $0x388] sm:$0xff] }
  0xcc   :  { %3381 = vmatpush1.bf16.msra.mxu0 %v4647_v48  ;;  %3422 = vmatpush1.bf16.msra.mxu1 %v4775_v49  ;;  %v217_v45 = vld [vmem:[#allocation5 + $0x3a8] sm:$0xff]  ;;  %v4719_v48 = vcombine.low %v221_v34, %v225_v35  ;;  %v4847_v49 = vcombine.low %v349_v36, %v353_v37 }
  0xcd   :  { %3382 = vmatprep.subr.bf16.mxu0 %v4640_v50  ;;  %3423 = vmatprep.subr.bf16.mxu1 %v4768_v51  ;;  %v341_v46 = vld [vmem:[#allocation5 + $0x788] sm:$0xff]  ;;  %v4712_v50 = vcombine.high %v213_v44, %v217_v45 }
  0xce   :  { %v345_v47 = vld [vmem:[#allocation5 + $0x7a8] sm:$0xff] }
  0xcf   :  { %v4840_v51 = vcombine.high %v341_v46, %v345_v47  ;;  %v205_v52 = vld [vmem:[#allocation5 + $0x348] sm:$0xff] }
  0xd0   :  { %3383 = vmatpush1.bf16.msra.mxu0 %v4639_v56  ;;  %3424 = vmatpush1.bf16.msra.mxu1 %v4767_v57  ;;  %v209_v53 = vld [vmem:[#allocation5 + $0x368] sm:$0xff]  ;;  %v4711_v56 = vcombine.low %v213_v44, %v217_v45  ;;  %v4839_v57 = vcombine.low %v341_v46, %v345_v47 }
  0xd1   :  { %3384 = vmatprep.subr.bf16.mxu0 %v4632_v60  ;;  %3425 = vmatprep.subr.bf16.mxu1 %v4760_v61  ;;  %v333_v54 = vld [vmem:[#allocation5 + $0x748] sm:$0xff]  ;;  %v4704_v60 = vcombine.high %v205_v52, %v209_v53 }
  0xd2   :  { %v337_v55 = vld [vmem:[#allocation5 + $0x768] sm:$0xff] }
  0xd3   :  { %v4832_v61 = vcombine.high %v333_v54, %v337_v55  ;;  %v197_v62 = vld [vmem:[#allocation5 + $0x308] sm:$0xff] }
  0xd4   :  { %3385 = vmatpush1.bf16.msra.mxu0 %v4631_v2  ;;  %3426 = vmatpush1.bf16.msra.mxu1 %v4759_v3  ;;  %v201_v63 = vld [vmem:[#allocation5 + $0x328] sm:$0xff]  ;;  %v4703_v2 = vcombine.low %v205_v52, %v209_v53  ;;  %v4831_v3 = vcombine.low %v333_v54, %v337_v55 }
  0xd5   :  { %3386 = vmatprep.subr.bf16.mxu0 %v4624_v4  ;;  %3427 = vmatprep.subr.bf16.mxu1 %v4752_v5  ;;  %v325_v0 = vld [vmem:[#allocation5 + $0x708] sm:$0xff]  ;;  %v4696_v4 = vcombine.high %v197_v62, %v201_v63 }
  0xd6   :  { %v329_v1 = vld [vmem:[#allocation5 + $0x728] sm:$0xff] }
  0xd7   :  { %v4824_v5 = vcombine.high %v325_v0, %v329_v1  ;;  %v189_v6 = vld [vmem:[#allocation5 + $0x2c8] sm:$0xff] }
  0xd8   :  { %3387 = vmatpush1.bf16.msra.mxu0 %v4623_v10  ;;  %3428 = vmatpush1.bf16.msra.mxu1 %v4751_v11  ;;  %v193_v7 = vld [vmem:[#allocation5 + $0x2e8] sm:$0xff]  ;;  %v4695_v10 = vcombine.low %v197_v62, %v201_v63  ;;  %v4823_v11 = vcombine.low %v325_v0, %v329_v1 }
  0xd9   :  { %3388 = vmatprep.subr.bf16.mxu0 %v4616_v12  ;;  %3429 = vmatprep.subr.bf16.mxu1 %v4744_v13  ;;  %v317_v8 = vld [vmem:[#allocation5 + $0x6c8] sm:$0xff]  ;;  %v4688_v12 = vcombine.high %v189_v6, %v193_v7 }
  0xda   :  { %v321_v9 = vld [vmem:[#allocation5 + $0x6e8] sm:$0xff] }
  0xdb   :  { %v4816_v13 = vcombine.high %v317_v8, %v321_v9  ;;  %v181_v14 = vld [vmem:[#allocation5 + $0x288] sm:$0xff] }
  0xdc   :  { %3389 = vmatpush1.bf16.msra.mxu0 %v4615_v19  ;;  %3430 = vmatpush1.bf16.msra.mxu1 %v4743_v21  ;;  %v185_v15 = vld [vmem:[#allocation5 + $0x2a8] sm:$0xff]  ;;  %v4687_v19 = vcombine.low %v189_v6, %v193_v7  ;;  %v4815_v21 = vcombine.low %v317_v8, %v321_v9 }
  0xdd   :  { %3390 = vmatprep.subr.bf16.mxu0 %v4608_v22  ;;  %3431 = vmatprep.subr.bf16.mxu1 %v4736_v23  ;;  %v309_v17 = vld [vmem:[#allocation5 + $0x688] sm:$0xff]  ;;  %v4680_v22 = vcombine.high %v181_v14, %v185_v15 }
  0xde   :  { %v313_v18 = vld [vmem:[#allocation5 + $0x6a8] sm:$0xff] }
  0xdf   :  { %v4808_v23 = vcombine.high %v309_v17, %v313_v18  ;;  %v173_v24 = vld [vmem:[#allocation5 + $0x248] sm:$0xff] }
  0xe0   :  { %3391 = vmatpush1.bf16.msra.mxu0 %v4607_v29  ;;  %3432 = vmatpush1.bf16.msra.mxu1 %v4735_v30  ;;  %v177_v25 = vld [vmem:[#allocation5 + $0x268] sm:$0xff]  ;;  %v4679_v29 = vcombine.low %v181_v14, %v185_v15  ;;  %v4807_v30 = vcombine.low %v309_v17, %v313_v18 }
  0xe1   :  { %3392 = vmatprep.subr.bf16.mxu0 %v4600_v32  ;;  %3433 = vmatprep.subr.bf16.mxu1 %v4728_v33  ;;  %v301_v26 = vld [vmem:[#allocation5 + $0x648] sm:$0xff]  ;;  %v4672_v32 = vcombine.high %v173_v24, %v177_v25 }
  0xe2   :  { %v305_v27 = vld [vmem:[#allocation5 + $0x668] sm:$0xff] }
  0xe3   :  { %v4800_v33 = vcombine.high %v301_v26, %v305_v27  ;;  %v165_v34 = vld [vmem:[#allocation5 + $0x208] sm:$0xff] }
  0xe4   :  { %3393 = vmatpush1.bf16.msra.mxu0 %v4599_v40  ;;  %3434 = vmatpush1.bf16.msra.mxu1 %v4727_v41  ;;  %v169_v35 = vld [vmem:[#allocation5 + $0x228] sm:$0xff]  ;;  %v4671_v40 = vcombine.low %v173_v24, %v177_v25  ;;  %v4799_v41 = vcombine.low %v301_v26, %v305_v27 }
  0xe5   :  { %3394 = vmatprep.subr.bf16.mxu0 %v4720_v42  ;;  %3435 = vmatprep.subr.bf16.mxu1 %v4848_v43  ;;  %v293_v36 = vld [vmem:[#allocation5 + $0x608] sm:$0xff]  ;;  %v4664_v42 = vcombine.high %v165_v34, %v169_v35 }
  0xe6   :  { %v297_v37 = vld [vmem:[#allocation5 + $0x628] sm:$0xff] }
  0xe7   :  { %v4792_v43 = vcombine.high %v293_v36, %v297_v37  ;;  %v413_v44 = vld [vmem:[#allocation5 + $0x9c8] sm:$0xff] }
  0xe8   :  { %3395 = vmatpush2.bf16.msra.mxu0 %v4719_v48  ;;  %3436 = vmatpush2.bf16.msra.mxu1 %v4847_v49  ;;  %v417_v45 = vld [vmem:[#allocation5 + $0x9e8] sm:$0xff]  ;;  %v4663_v48 = vcombine.low %v165_v34, %v169_v35  ;;  %v4791_v49 = vcombine.low %v293_v36, %v297_v37 }
  0xe9   :  { %3396 = vmatprep.subr.bf16.mxu0 %v4712_v50  ;;  %3437 = vmatprep.subr.bf16.mxu1 %v4840_v51  ;;  %v541_v46 = vld [vmem:[#allocation5 + $0xdc8] sm:$0xff]  ;;  %v4912_v50 = vcombine.high %v413_v44, %v417_v45 }
  0xea   :  { %v545_v47 = vld [vmem:[#allocation5 + $0xde8] sm:$0xff] }
  0xeb   :  { %v5040_v51 = vcombine.high %v541_v46, %v545_v47  ;;  %v405_v52 = vld [vmem:[#allocation5 + $0x988] sm:$0xff] }
  0xec   :  { %3397 = vmatpush2.bf16.msra.mxu0 %v4711_v56  ;;  %3438 = vmatpush2.bf16.msra.mxu1 %v4839_v57  ;;  %v409_v53 = vld [vmem:[#allocation5 + $0x9a8] sm:$0xff]  ;;  %v4911_v56 = vcombine.low %v413_v44, %v417_v45  ;;  %v5039_v57 = vcombine.low %v541_v46, %v545_v47 }
  0xed   :  { %3398 = vmatprep.subr.bf16.mxu0 %v4704_v60  ;;  %3439 = vmatprep.subr.bf16.mxu1 %v4832_v61  ;;  %v533_v54 = vld [vmem:[#allocation5 + $0xd88] sm:$0xff]  ;;  %v4904_v60 = vcombine.high %v405_v52, %v409_v53 }
  0xee   :  { %v537_v55 = vld [vmem:[#allocation5 + $0xda8] sm:$0xff] }
  0xef   :  { %v5032_v61 = vcombine.high %v533_v54, %v537_v55  ;;  %v397_v62 = vld [vmem:[#allocation5 + $0x948] sm:$0xff] }
  0xf0   :  { %3399 = vmatpush2.bf16.msra.mxu0 %v4703_v2  ;;  %3440 = vmatpush2.bf16.msra.mxu1 %v4831_v3  ;;  %v401_v63 = vld [vmem:[#allocation5 + $0x968] sm:$0xff]  ;;  %v4903_v2 = vcombine.low %v405_v52, %v409_v53  ;;  %v5031_v3 = vcombine.low %v533_v54, %v537_v55 }
  0xf1   :  { %3400 = vmatprep.subr.bf16.mxu0 %v4696_v4  ;;  %3441 = vmatprep.subr.bf16.mxu1 %v4824_v5  ;;  %v525_v0 = vld [vmem:[#allocation5 + $0xd48] sm:$0xff]  ;;  %v4896_v4 = vcombine.high %v397_v62, %v401_v63 }
  0xf2   :  { %v529_v1 = vld [vmem:[#allocation5 + $0xd68] sm:$0xff] }
  0xf3   :  { %v5024_v5 = vcombine.high %v525_v0, %v529_v1  ;;  %v389_v6 = vld [vmem:[#allocation5 + $0x908] sm:$0xff] }
  0xf4   :  { %3401 = vmatpush2.bf16.msra.mxu0 %v4695_v10  ;;  %3442 = vmatpush2.bf16.msra.mxu1 %v4823_v11  ;;  %v393_v7 = vld [vmem:[#allocation5 + $0x928] sm:$0xff]  ;;  %v4895_v10 = vcombine.low %v397_v62, %v401_v63  ;;  %v5023_v11 = vcombine.low %v525_v0, %v529_v1 }
  0xf5   :  { %3402 = vmatprep.subr.bf16.mxu0 %v4688_v12  ;;  %3443 = vmatprep.subr.bf16.mxu1 %v4816_v13  ;;  %v517_v8 = vld [vmem:[#allocation5 + $0xd08] sm:$0xff]  ;;  %v4888_v12 = vcombine.high %v389_v6, %v393_v7 }
  0xf6   :  { %v521_v9 = vld [vmem:[#allocation5 + $0xd28] sm:$0xff] }
  0xf7   :  { %v5016_v13 = vcombine.high %v517_v8, %v521_v9  ;;  %v381_v14 = vld [vmem:[#allocation5 + $0x8c8] sm:$0xff] }
  0xf8   :  { %3403 = vmatpush2.bf16.msra.mxu0 %v4687_v19  ;;  %3444 = vmatpush2.bf16.msra.mxu1 %v4815_v21  ;;  %v385_v15 = vld [vmem:[#allocation5 + $0x8e8] sm:$0xff]  ;;  %v4887_v19 = vcombine.low %v389_v6, %v393_v7  ;;  %v5015_v21 = vcombine.low %v517_v8, %v521_v9 }
  0xf9   :  { %3404 = vmatprep.subr.bf16.mxu0 %v4680_v22  ;;  %3445 = vmatprep.subr.bf16.mxu1 %v4808_v23  ;;  %v509_v17 = vld [vmem:[#allocation5 + $0xcc8] sm:$0xff]  ;;  %v4880_v22 = vcombine.high %v381_v14, %v385_v15 }
  0xfa   :  { %v513_v18 = vld [vmem:[#allocation5 + $0xce8] sm:$0xff] }
  0xfb   :  { %v5008_v23 = vcombine.high %v509_v17, %v513_v18  ;;  %v373_v24 = vld [vmem:[#allocation5 + $0x888] sm:$0xff] }
  0xfc   :  { %3405 = vmatpush2.bf16.msra.mxu0 %v4679_v29  ;;  %3446 = vmatpush2.bf16.msra.mxu1 %v4807_v30  ;;  %v377_v25 = vld [vmem:[#allocation5 + $0x8a8] sm:$0xff]  ;;  %v4879_v29 = vcombine.low %v381_v14, %v385_v15  ;;  %v5007_v30 = vcombine.low %v509_v17, %v513_v18 }
  0xfd   :  { %3406 = vmatprep.subr.bf16.mxu0 %v4672_v32  ;;  %3447 = vmatprep.subr.bf16.mxu1 %v4800_v33  ;;  %v501_v26 = vld [vmem:[#allocation5 + $0xc88] sm:$0xff]  ;;  %v4872_v32 = vcombine.high %v373_v24, %v377_v25 }
  0xfe   :  { %v505_v27 = vld [vmem:[#allocation5 + $0xca8] sm:$0xff] }
  0xff   :  { %v5000_v33 = vcombine.high %v501_v26, %v505_v27  ;;  %v365_v34 = vld [vmem:[#allocation5 + $0x848] sm:$0xff] }
 0x100   :  { %3407 = vmatpush2.bf16.msra.mxu0 %v4671_v40  ;;  %3448 = vmatpush2.bf16.msra.mxu1 %v4799_v41  ;;  %v369_v35 = vld [vmem:[#allocation5 + $0x868] sm:$0xff]  ;;  %v4871_v40 = vcombine.low %v373_v24, %v377_v25  ;;  %v4999_v41 = vcombine.low %v501_v26, %v505_v27 }
 0x101   :  { %3408 = vmatprep.subr.bf16.mxu0 %v4664_v42  ;;  %3449 = vmatprep.subr.bf16.mxu1 %v4792_v43  ;;  %v493_v36 = vld [vmem:[#allocation5 + $0xc48] sm:$0xff]  ;;  %v4864_v42 = vcombine.high %v365_v34, %v369_v35 }
 0x102   :  { %v497_v37 = vld [vmem:[#allocation5 + $0xc68] sm:$0xff] }
 0x103   :  { %v4992_v43 = vcombine.high %v493_v36, %v497_v37  ;;  %v357_v44 = vld [vmem:[#allocation5 + $0x808] sm:$0xff] }
 0x104   :  { %3409 = vmatpush2.bf16.msra.mxu0 %v4663_v48  ;;  %3450 = vmatpush2.bf16.msra.mxu1 %v4791_v49  ;;  %v361_v45 = vld [vmem:[#allocation5 + $0x828] sm:$0xff]  ;;  %v4863_v48 = vcombine.low %v365_v34, %v369_v35  ;;  %v4991_v49 = vcombine.low %v493_v36, %v497_v37 }
 0x105   :  { %3460 = vmatprep.subr.bf16.mxu0 %v4912_v50  ;;  %3501 = vmatprep.subr.bf16.mxu1 %v5040_v51  ;;  %v485_v46 = vld [vmem:[#allocation5 + $0xc08] sm:$0xff]  ;;  %v4856_v50 = vcombine.high %v357_v44, %v361_v45 }
 0x106   :  { %v489_v47 = vld [vmem:[#allocation5 + $0xc28] sm:$0xff] }
 0x107   :  { %3411 = vmatmul.mubr.bf16.vlgmr.msra.gmra.mxu0 %v5530_v16  ;;  %3452 = vmatmul.mubr.bf16.vlgmr.msra.gmra.mxu1 %v5532_v20  ;;  %v4984_v51 = vcombine.high %v485_v46, %v489_v47  ;;  %v477_v52 = vld [vmem:[#allocation5 + $0xbc8] sm:$0xff] }
 0x108   :  { %3461 = vmatpush1.bf16.msra.mxu0 %v4911_v56  ;;  %3502 = vmatpush1.bf16.msra.mxu1 %v5039_v57  ;;  %v481_v53 = vld [vmem:[#allocation5 + $0xbe8] sm:$0xff]  ;;  %v4855_v56 = vcombine.low %v357_v44, %v361_v45  ;;  %v4983_v57 = vcombine.low %v485_v46, %v489_v47 }
 0x109   :  { %3462 = vmatprep.subr.bf16.mxu0 %v4904_v60  ;;  %3503 = vmatprep.subr.bf16.mxu1 %v5032_v61  ;;  %v605_v54 = vld [vmem:[#allocation5 + $0xfc8] sm:$0xff]  ;;  %v4976_v60 = vcombine.high %v477_v52, %v481_v53 }
 0x10a   :  { %3492 = vmatprep.mubr.bf16.mxu0 %v5534_v28  ;;  %3533 = vmatprep.mubr.bf16.mxu1 %v5537_v31  ;;  %v609_v55 = vld [vmem:[#allocation5 + $0xfe8] sm:$0xff] }
 0x10b   :  { %v5104_v61 = vcombine.high %v605_v54, %v609_v55  ;;  %v469_v62 = vld [vmem:[#allocation5 + $0xb88] sm:$0xff] }
 0x10c   :  { %3463 = vmatpush1.bf16.msra.mxu0 %v4903_v2  ;;  %3504 = vmatpush1.bf16.msra.mxu1 %v5031_v3  ;;  %v473_v63 = vld [vmem:[#allocation5 + $0xba8] sm:$0xff]  ;;  %v4975_v2 = vcombine.low %v477_v52, %v481_v53  ;;  %v5103_v3 = vcombine.low %v605_v54, %v609_v55 }
 0x10d   :  { %3464 = vmatprep.subr.bf16.mxu0 %v4896_v4  ;;  %3505 = vmatprep.subr.bf16.mxu1 %v5024_v5  ;;  %v597_v0 = vld [vmem:[#allocation5 + $0xf88] sm:$0xff]  ;;  %v4968_v4 = vcombine.high %v469_v62, %v473_v63 }
 0x10e   :  { %v601_v1 = vld [vmem:[#allocation5 + $0xfa8] sm:$0xff] }
 0x10f   :  { %v5096_v5 = vcombine.high %v597_v0, %v601_v1  ;;  %v461_v6 = vld [vmem:[#allocation5 + $0xb48] sm:$0xff] }
 0x110   :  { %3465 = vmatpush1.bf16.msra.mxu0 %v4895_v10  ;;  %3506 = vmatpush1.bf16.msra.mxu1 %v5023_v11  ;;  %v465_v7 = vld [vmem:[#allocation5 + $0xb68] sm:$0xff]  ;;  %v4967_v10 = vcombine.low %v469_v62, %v473_v63  ;;  %v5095_v11 = vcombine.low %v597_v0, %v601_v1  ;;  %v158_v0 = vld [vmem:[#allocation5 + $0x1d0] sm:$0xff] }
 0x111   :  { %3466 = vmatprep.subr.bf16.mxu0 %v4888_v12  ;;  %3507 = vmatprep.subr.bf16.mxu1 %v5016_v13  ;;  %v589_v8 = vld [vmem:[#allocation5 + $0xf48] sm:$0xff]  ;;  %v4960_v12 = vcombine.high %v461_v6, %v465_v7  ;;  %v162_v1 = vld [vmem:[#allocation5 + $0x1f0] sm:$0xff] }
 0x112   :  { %v593_v9 = vld [vmem:[#allocation5 + $0xf68] sm:$0xff] }
 0x113   :  { %v5088_v13 = vcombine.high %v589_v8, %v593_v9  ;;  %v453_v14 = vld [vmem:[#allocation5 + $0xb08] sm:$0xff] }
 0x114   :  { %3467 = vmatpush1.bf16.msra.mxu0 %v4887_v19  ;;  %3508 = vmatpush1.bf16.msra.mxu1 %v5015_v21  ;;  %v457_v15 = vld [vmem:[#allocation5 + $0xb28] sm:$0xff]  ;;  %v4959_v19 = vcombine.low %v461_v6, %v465_v7  ;;  %v5087_v21 = vcombine.low %v589_v8, %v593_v9  ;;  %v5558_v7 = vld [vmem:[#allocation7] sm:$0xff]  ;;  %v4658_v8 = vcombine.high %v158_v0, %v162_v1 }
 0x115   :  { %3468 = vmatprep.subr.bf16.mxu0 %v4880_v22  ;;  %3509 = vmatprep.subr.bf16.mxu1 %v5008_v23  ;;  %v581_v17 = vld [vmem:[#allocation5 + $0xf08] sm:$0xff]  ;;  %v4952_v22 = vcombine.high %v453_v14, %v457_v15 }
 0x116   :  { %v585_v18 = vld [vmem:[#allocation5 + $0xf28] sm:$0xff] }
 0x117   :  { %v5080_v23 = vcombine.high %v581_v17, %v585_v18  ;;  %v445_v24 = vld [vmem:[#allocation5 + $0xac8] sm:$0xff] }
 0x118   :  { %3469 = vmatpush1.bf16.msra.mxu0 %v4879_v29  ;;  %3510 = vmatpush1.bf16.msra.mxu1 %v5007_v30  ;;  %v449_v25 = vld [vmem:[#allocation5 + $0xae8] sm:$0xff]  ;;  %v4951_v29 = vcombine.low %v453_v14, %v457_v15  ;;  %v5079_v30 = vcombine.low %v581_v17, %v585_v18  ;;  %v282_v14 = vld [vmem:[#allocation5 + $0x5b0] sm:$0xff]  ;;  %v4657_v17 = vcombine.low %v158_v0, %v162_v1 }
 0x119   :  { %3470 = vmatprep.subr.bf16.mxu0 %v4872_v32  ;;  %3511 = vmatprep.subr.bf16.mxu1 %v5000_v33  ;;  %v573_v26 = vld [vmem:[#allocation5 + $0xec8] sm:$0xff]  ;;  %v4944_v32 = vcombine.high %v445_v24, %v449_v25 }
 0x11a   :  { %v577_v27 = vld [vmem:[#allocation5 + $0xee8] sm:$0xff] }
 0x11b   :  { %v5072_v33 = vcombine.high %v573_v26, %v577_v27  ;;  %v437_v34 = vld [vmem:[#allocation5 + $0xa88] sm:$0xff] }
 0x11c   :  { %3471 = vmatpush1.bf16.msra.mxu0 %v4871_v40  ;;  %3512 = vmatpush1.bf16.msra.mxu1 %v4999_v41  ;;  %v441_v35 = vld [vmem:[#allocation5 + $0xaa8] sm:$0xff]  ;;  %v4943_v40 = vcombine.low %v445_v24, %v449_v25  ;;  %v5071_v41 = vcombine.low %v573_v26, %v577_v27  ;;  %v146_v24 = vld [vmem:[#allocation5 + $0x170] sm:$0xff] }
 0x11d   :  { %3472 = vmatprep.subr.bf16.mxu0 %v4864_v42  ;;  %3513 = vmatprep.subr.bf16.mxu1 %v4992_v43  ;;  %v565_v36 = vld [vmem:[#allocation5 + $0xe88] sm:$0xff]  ;;  %v4936_v42 = vcombine.high %v437_v34, %v441_v35  ;;  %v270_v26 = vld [vmem:[#allocation5 + $0x550] sm:$0xff] }
 0x11e   :  { %v569_v37 = vld [vmem:[#allocation5 + $0xea8] sm:$0xff]  ;;  %v274_v27 = vld [vmem:[#allocation5 + $0x570] sm:$0xff] }
 0x11f   :  { %v5064_v43 = vcombine.high %v565_v36, %v569_v37  ;;  %v429_v44 = vld [vmem:[#allocation5 + $0xa48] sm:$0xff] }
 0x120   :  { %3473 = vmatpush1.bf16.msra.mxu0 %v4863_v48  ;;  %3514 = vmatpush1.bf16.msra.mxu1 %v4991_v49  ;;  %v433_v45 = vld [vmem:[#allocation5 + $0xa68] sm:$0xff]  ;;  %v4935_v48 = vcombine.low %v437_v34, %v441_v35  ;;  %v614_v49 = vlaneseq }
 0x121   :  { %3474 = vmatprep.subr.bf16.mxu0 %v4856_v50  ;;  %3515 = vmatprep.subr.bf16.mxu1 %v4984_v51  ;;  %v557_v46 = vld [vmem:[#allocation5 + $0xe48] sm:$0xff]  ;;  %v5063_v50 = vcombine.low %v565_v36, %v569_v37  ;;  %v4928_v51 = vcombine.high %v429_v44, %v433_v45 }
 0x122   :  { %v561_v47 = vld [vmem:[#allocation5 + $0xe68] sm:$0xff] }
 0x123   :  { %v5056_v52 = vcombine.high %v557_v46, %v561_v47  ;;  %v421_v53 = vld [vmem:[#allocation5 + $0xa08] sm:$0xff] }
 0x124   :  { %3475 = vmatpush1.bf16.msra.mxu0 %v4855_v56  ;;  %3516 = vmatpush1.bf16.msra.mxu1 %v4983_v57  ;;  %v425_v54 = vld [vmem:[#allocation5 + $0xa28] sm:$0xff]  ;;  %v4927_v57 = vcombine.low %v429_v44, %v433_v45  ;;  %v262_v45 = vld [vmem:[#allocation5 + $0x510] sm:$0xff] }
 0x125   :  { %3476 = vmatprep.subr.bf16.mxu0 %v4976_v60  ;;  %3517 = vmatprep.subr.bf16.mxu1 %v5104_v61  ;;  %v549_v55 = vld [vmem:[#allocation5 + $0xe08] sm:$0xff]  ;;  %v5555_v60 = vshrl.u32 %v614_v49, 7  ;;  %v5055_v61 = vcombine.low %v557_v46, %v561_v47  ;;  %v4920_v62 = vcombine.high %v421_v53, %v425_v54  ;;  %v266_v46 = vld [vmem:[#allocation5 + $0x530] sm:$0xff] }
 0x126   :  { %v553_v56 = vld [vmem:[#allocation5 + $0xe28] sm:$0xff]  ;;  %v4761_v0 = vcombine.low %v262_v45, %v266_v46 }
 0x127   :  { %v5048_v63 = vcombine.high %v549_v55, %v553_v56  ;;  %v5047_v6 = vcombine.low %v549_v55, %v553_v56  ;;  %v4762_v55 = vcombine.high %v262_v45, %v266_v46  ;;  %v126_v56 = vld [vmem:[#allocation5 + $0xd0] sm:$0xff] }
 0x128   :  { %3477 = vmatpush2.bf16.msra.mxu0 %v4975_v2  ;;  %3518 = vmatpush2.bf16.msra.mxu1 %v5103_v3  ;;  %v286_v2 = vld [vmem:[#allocation5 + $0x5d0] sm:$0xff] }
 0x129   :  { %3478 = vmatprep.subr.bf16.mxu0 %v4968_v4  ;;  %3519 = vmatprep.subr.bf16.mxu1 %v5096_v5  ;;  %v290_v3 = vld [vmem:[#allocation5 + $0x5f0] sm:$0xff]  ;;  %v4919_v4 = vcombine.low %v421_v53, %v425_v54  ;;  %v616_v5 = vsub.s32 0, %v5555_v60 }
 0x12a   :  { %v4786_v9 = vcombine.high %v286_v2, %v290_v3  ;;  %v4785_v18 = vcombine.low %v286_v2, %v290_v3  ;;  %v118_v3 = vld [vmem:[#allocation5 + $0x90] sm:$0xff] }
 0x12b   :  { %v617_v15 = vrot.slane %v5558_v7, %v616_v5  ;;  %v246_v5 = vld [vmem:[#allocation5 + $0x490] sm:$0xff] }
 0x12c   :  { %3479 = vmatpush2.bf16.msra.mxu0 %v4967_v10  ;;  %3520 = vmatpush2.bf16.msra.mxu1 %v5095_v11  ;;  %v620_v10 = vsub.s32 1, %v5555_v60  ;;  %v150_v11 = vld [vmem:[#allocation5 + $0x190] sm:$0xff] }
 0x12d   :  { %3480 = vmatprep.subr.bf16.mxu0 %v4960_v12  ;;  %3521 = vmatprep.subr.bf16.mxu1 %v5088_v13  ;;  %v154_v12 = vld [vmem:[#allocation5 + $0x1b0] sm:$0xff] }
 0x12e   :  { %v278_v13 = vld [vmem:[#allocation5 + $0x590] sm:$0xff] }
 0x12f   :  { %v4777_v34 = vcombine.low %v278_v13, %v282_v14  ;;  %v342_v45 = vld [vmem:[#allocation5 + $0x790] sm:$0xff] }
 0x130   :  { %3481 = vmatpush2.bf16.msra.mxu0 %v4959_v19  ;;  %3522 = vmatpush2.bf16.msra.mxu1 %v5087_v21  ;;  %v4650_v19 = vcombine.high %v150_v11, %v154_v12  ;;  %v621_v21 = vrot.slane %v5558_v7, %v620_v10  ;;  %v346_v46 = vld [vmem:[#allocation5 + $0x7b0] sm:$0xff] }
 0x131   :  { %3482 = vmatprep.subr.bf16.mxu0 %v4952_v22  ;;  %3523 = vmatprep.subr.bf16.mxu1 %v5080_v23  ;;  %v4778_v22 = vcombine.high %v278_v13, %v282_v14  ;;  %v142_v23 = vld [vmem:[#allocation5 + $0x150] sm:$0xff] }
 0x132   :  { %v4642_v35 = vcombine.high %v142_v23, %v146_v24  ;;  %v114_v13 = vld [vmem:[#allocation5 + $0x70] sm:$0xff] }
 0x133   :  { %v238_v14 = vld [vmem:[#allocation5 + $0x450] sm:$0xff] }
 0x134   :  { %3483 = vmatpush2.bf16.msra.mxu0 %v4951_v29  ;;  %3524 = vmatpush2.bf16.msra.mxu1 %v5079_v30 }
 0x135   :  { %3484 = vmatprep.subr.bf16.mxu0 %v4944_v32  ;;  %3525 = vmatprep.subr.bf16.mxu1 %v5072_v33  ;;  %v4649_v32 = vcombine.low %v150_v11, %v154_v12  ;;  %v110_v12 = vld [vmem:[#allocation5 + $0x50] sm:$0xff] }
 0x138   :  { %3485 = vmatpush2.bf16.msra.mxu0 %v4943_v40  ;;  %3526 = vmatpush2.bf16.msra.mxu1 %v5071_v41  ;;  %v4770_v41 = vcombine.high %v270_v26, %v274_v27 }
 0x139   :  { %3486 = vmatprep.subr.bf16.mxu0 %v4936_v42  ;;  %3527 = vmatprep.subr.bf16.mxu1 %v5064_v43  ;;  %v134_v42 = vld [vmem:[#allocation5 + $0x110] sm:$0xff] }
 0x13a   :  { %v138_v43 = vld [vmem:[#allocation5 + $0x130] sm:$0xff] }
 0x13b   :  { %v4634_v53 = vcombine.high %v134_v42, %v138_v43 }
 0x13c   :  { %3487 = vmatpush2.bf16.msra.mxu0 %v4935_v48  ;;  %3528 = vmatpush2.bf16.msra.mxu1 %v5063_v50  ;;  %v4641_v50 = vcombine.low %v142_v23, %v146_v24  ;;  %v106_v23 = vld [vmem:[#allocation5 + $0x30] sm:$0xff] }
 0x13d   :  { %3488 = vmatprep.subr.bf16.mxu0 %v4928_v51  ;;  %3529 = vmatprep.subr.bf16.mxu1 %v5056_v52  ;;  %v4769_v52 = vcombine.low %v270_v26, %v274_v27  ;;  %v230_v24 = vld [vmem:[#allocation5 + $0x410] sm:$0xff]  ;;  %v4609_v26 = vcombine.low %v110_v12, %v114_v13 }
 0x140   :  { %3489 = vmatpush2.bf16.msra.mxu0 %v4927_v57  ;;  %3530 = vmatpush2.bf16.msra.mxu1 %v5055_v61  ;;  %v130_v57 = vld [vmem:[#allocation5 + $0xf0] sm:$0xff] }
 0x141   :  { %3490 = vmatprep.subr.bf16.mxu0 %v4920_v62  ;;  %3531 = vmatprep.subr.bf16.mxu1 %v5048_v63  ;;  %v254_v61 = vld [vmem:[#allocation5 + $0x4d0] sm:$0xff]  ;;  %v4633_v63 = vcombine.low %v134_v42, %v138_v43  ;;  %v4626_v1 = vcombine.high %v126_v56, %v130_v57 }
 0x142   :  { %v258_v62 = vld [vmem:[#allocation5 + $0x4f0] sm:$0xff] }
 0x143   :  { %v4754_v2 = vcombine.high %v254_v61, %v258_v62  ;;  %v214_v43 = vld [vmem:[#allocation5 + $0x390] sm:$0xff] }
 0x144   :  { %3491 = vmatpush2.bf16.msra.mxu0 %v4919_v4  ;;  %3532 = vmatpush2.bf16.msra.mxu1 %v5047_v6  ;;  %v122_v4 = vld [vmem:[#allocation5 + $0xb0] sm:$0xff] }
 0x145   :  { %3542 = vmatprep.subr.bf16.mxu0 %v4658_v8  ;;  %3583 = vmatprep.subr.bf16.mxu1 %v4786_v9  ;;  %v250_v6 = vld [vmem:[#allocation5 + $0x4b0] sm:$0xff]  ;;  %v4625_v8 = vcombine.low %v126_v56, %v130_v57  ;;  %v4753_v9 = vcombine.low %v254_v61, %v258_v62  ;;  %v4618_v10 = vcombine.high %v118_v3, %v122_v4 }
 0x146   :  { %v3289_v30 = vpop.f32.mrf.mxu1  ;;  %v4746_v11 = vcombine.high %v246_v5, %v250_v6  ;;  %v338_v56 = vld [vmem:[#allocation5 + $0x770] sm:$0xff]  ;;  %v4841_v61 = vcombine.low %v342_v45, %v346_v46 }
 0x147   :  { %v3248_v25 = vpop.f32.mrf.mxu0  ;;  %3493 = vmatmul.mubr.bf16.vlgmr.msra.gmra.mxu0 %v5542_v38  ;;  %3534 = vmatmul.mubr.bf16.vlgmr.msra.gmra.mxu1 %v5544_v39 }
 0x148   :  { %v3249_v29 = vadd.f32 %v3248_v25, %v617_v15  ;;  %3543 = vmatpush1.bf16.msra.mxu0 %v4657_v17  ;;  %3584 = vmatpush1.bf16.msra.mxu1 %v4785_v18  ;;  %v3291_v40 = vpop.f32.mrf.mxu1  ;;  %v242_v15 = vld [vmem:[#allocation5 + $0x470] sm:$0xff]  ;;  %v4617_v17 = vcombine.low %v118_v3, %v122_v4  ;;  %v4745_v18 = vcombine.low %v246_v5, %v250_v6 }
 0x149   :  { %v3250_v33 = vpop.f32.mrf.mxu0  ;;  %3544 = vmatprep.subr.bf16.mxu0 %v4650_v19  ;;  %3585 = vmatprep.subr.bf16.mxu1 %v4778_v22  ;;  %v4610_v19 = vcombine.high %v110_v12, %v114_v13  ;;  %v102_v22 = vld [vmem:[#allocation5 + $0x10] sm:$0xff]  ;;  %v4737_v27 = vcombine.low %v238_v14, %v242_v15 }
 0x14a   :  { %v5565_v36 = vadd.f32 %v3289_v30, %v3249_v29  ;;  %v3251_v37 = vadd.f32 %v3250_v33, %v621_v21  ;;  %3574 = vmatprep.mubr.bf16.mxu0 %v5524_v58  ;;  %3615 = vmatprep.mubr.bf16.mxu1 %v5526_v59  ;;  %v3293_v48 = vpop.f32.mrf.mxu1  ;;  %v4738_v21 = vcombine.high %v238_v14, %v242_v15  ;;  %v234_v25 = vld [vmem:[#allocation5 + $0x430] sm:$0xff] }
 0x14b   :  { %v3252_v44 = vpop.f32.mrf.mxu0  ;;  %v4602_v29 = vcombine.high %v102_v22, %v106_v23  ;;  %v4730_v30 = vcombine.high %v230_v24, %v234_v25  ;;  %v226_v33 = vld [vmem:[#allocation5 + $0x3f0] sm:$0xff] }
 0x14c   :  { %v5569_v47 = vadd.f32 %v3291_v40, %v3251_v37  ;;  %3545 = vmatpush1.bf16.msra.mxu0 %v4649_v32  ;;  %3586 = vmatpush1.bf16.msra.mxu1 %v4777_v34  ;;  %v3294_v54 = vpop.f32.mrf.mxu1  ;;  %v222_v32 = vld [vmem:[#allocation5 + $0x3d0] sm:$0xff]  ;;  %v4601_v37 = vcombine.low %v102_v22, %v106_v23  ;;  %v4729_v40 = vcombine.low %v230_v24, %v234_v25 }
 0x14d   :  { %v3253_v51 = vpop.f32.mrf.mxu0  ;;  %3546 = vmatprep.subr.bf16.mxu0 %v4642_v35  ;;  %3587 = vmatprep.subr.bf16.mxu1 %v4770_v41  ;;  %v350_v34 = vld [vmem:[#allocation5 + $0x7d0] sm:$0xff]  ;;  %v4722_v41 = vcombine.high %v222_v32, %v226_v33  ;;  %v4721_v48 = vcombine.low %v222_v32, %v226_v33 }
 0x14e   :  { %v354_v35 = vld [vmem:[#allocation5 + $0x7f0] sm:$0xff] }
 0x14f   :  { %v4850_v42 = vcombine.high %v350_v34, %v354_v35  ;;  %v218_v44 = vld [vmem:[#allocation5 + $0x3b0] sm:$0xff] }
 0x150   :  { %3547 = vmatpush1.bf16.msra.mxu0 %v4641_v50  ;;  %3588 = vmatpush1.bf16.msra.mxu1 %v4769_v52  ;;  %v4849_v50 = vcombine.low %v350_v34, %v354_v35  ;;  %v4714_v51 = vcombine.high %v214_v43, %v218_v44  ;;  %v4842_v52 = vcombine.high %v342_v45, %v346_v46  ;;  %v210_v54 = vld [vmem:[#allocation5 + $0x370] sm:$0xff] }
 0x151   :  { %3548 = vmatprep.subr.bf16.mxu0 %v4634_v53  ;;  %3589 = vmatprep.subr.bf16.mxu1 %v4762_v55  ;;  %v206_v53 = vld [vmem:[#allocation5 + $0x350] sm:$0xff]  ;;  %v4713_v57 = vcombine.low %v214_v43, %v218_v44 }
 0x152   :  { %v334_v55 = vld [vmem:[#allocation5 + $0x750] sm:$0xff]  ;;  %v4706_v62 = vcombine.high %v206_v53, %v210_v54  ;;  %v4705_v4 = vcombine.low %v206_v53, %v210_v54 }
 0x153   :  { %v330_v3 = vld [vmem:[#allocation5 + $0x730] sm:$0xff]  ;;  %v4833_v5 = vcombine.low %v334_v55, %v338_v56 }
 0x154   :  { %3549 = vmatpush1.bf16.msra.mxu0 %v4633_v63  ;;  %3590 = vmatpush1.bf16.msra.mxu1 %v4761_v0  ;;  %v4834_v63 = vcombine.high %v334_v55, %v338_v56  ;;  %v198_v0 = vld [vmem:[#allocation5 + $0x310] sm:$0xff] }
 0x155   :  { %3550 = vmatprep.subr.bf16.mxu0 %v4626_v1  ;;  %3591 = vmatprep.subr.bf16.mxu1 %v4754_v2  ;;  %v202_v1 = vld [vmem:[#allocation5 + $0x330] sm:$0xff] }
 0x156   :  { %v326_v2 = vld [vmem:[#allocation5 + $0x710] sm:$0xff]  ;;  %v4698_v6 = vcombine.high %v198_v0, %v202_v1  ;;  %v4697_v13 = vcombine.low %v198_v0, %v202_v1 }
 0x157   :  { %v322_v12 = vld [vmem:[#allocation5 + $0x6f0] sm:$0xff]  ;;  %v4825_v14 = vcombine.low %v326_v2, %v330_v3 }
 0x158   :  { %3551 = vmatpush1.bf16.msra.mxu0 %v4625_v8  ;;  %3592 = vmatpush1.bf16.msra.mxu1 %v4753_v9  ;;  %v4826_v8 = vcombine.high %v326_v2, %v330_v3  ;;  %v190_v9 = vld [vmem:[#allocation5 + $0x2d0] sm:$0xff] }
 0x159   :  { %3552 = vmatprep.subr.bf16.mxu0 %v4618_v10  ;;  %3593 = vmatprep.subr.bf16.mxu1 %v4746_v11  ;;  %v194_v10 = vld [vmem:[#allocation5 + $0x2f0] sm:$0xff] }
 0x15a   :  { %v318_v11 = vld [vmem:[#allocation5 + $0x6d0] sm:$0xff]  ;;  %v4690_v15 = vcombine.high %v190_v9, %v194_v10  ;;  %v4689_v23 = vcombine.low %v190_v9, %v194_v10 }
 0x15b   :  { %v314_v22 = vld [vmem:[#allocation5 + $0x6b0] sm:$0xff]  ;;  %v4817_v24 = vcombine.low %v318_v11, %v322_v12 }
 0x15c   :  { %3553 = vmatpush1.bf16.msra.mxu0 %v4617_v17  ;;  %3594 = vmatpush1.bf16.msra.mxu1 %v4745_v18  ;;  %v4818_v17 = vcombine.high %v318_v11, %v322_v12  ;;  %v182_v18 = vld [vmem:[#allocation5 + $0x290] sm:$0xff] }
 0x15d   :  { %3554 = vmatprep.subr.bf16.mxu0 %v4610_v19  ;;  %3595 = vmatprep.subr.bf16.mxu1 %v4738_v21  ;;  %v186_v19 = vld [vmem:[#allocation5 + $0x2b0] sm:$0xff] }
 0x15e   :  { %v310_v21 = vld [vmem:[#allocation5 + $0x690] sm:$0xff]  ;;  %v4682_v25 = vcombine.high %v182_v18, %v186_v19  ;;  %v4681_v33 = vcombine.low %v182_v18, %v186_v19 }
 0x15f   :  { %v306_v32 = vld [vmem:[#allocation5 + $0x670] sm:$0xff]  ;;  %v4809_v34 = vcombine.low %v310_v21, %v314_v22 }
 0x160   :  { %3555 = vmatpush1.bf16.msra.mxu0 %v4609_v26  ;;  %3596 = vmatpush1.bf16.msra.mxu1 %v4737_v27  ;;  %v4810_v26 = vcombine.high %v310_v21, %v314_v22  ;;  %v174_v27 = vld [vmem:[#allocation5 + $0x250] sm:$0xff] }
 0x161   :  { %3556 = vmatprep.subr.bf16.mxu0 %v4602_v29  ;;  %3597 = vmatprep.subr.bf16.mxu1 %v4730_v30  ;;  %v178_v29 = vld [vmem:[#allocation5 + $0x270] sm:$0xff] }
 0x162   :  { %v302_v30 = vld [vmem:[#allocation5 + $0x650] sm:$0xff]  ;;  %v4674_v35 = vcombine.high %v174_v27, %v178_v29  ;;  %v4673_v44 = vcombine.low %v174_v27, %v178_v29 }
 0x163   :  { %v298_v43 = vld [vmem:[#allocation5 + $0x630] sm:$0xff]  ;;  %v4801_v45 = vcombine.low %v302_v30, %v306_v32 }
 0x164   :  { %3557 = vmatpush1.bf16.msra.mxu0 %v4601_v37  ;;  %3598 = vmatpush1.bf16.msra.mxu1 %v4729_v40  ;;  %v4802_v37 = vcombine.high %v302_v30, %v306_v32  ;;  %v166_v40 = vld [vmem:[#allocation5 + $0x210] sm:$0xff] }
 0x165   :  { %3558 = vmatprep.subr.bf16.mxu0 %v4722_v41  ;;  %3599 = vmatprep.subr.bf16.mxu1 %v4850_v42  ;;  %v170_v41 = vld [vmem:[#allocation5 + $0x230] sm:$0xff] }
 0x166   :  { %v294_v42 = vld [vmem:[#allocation5 + $0x610] sm:$0xff]  ;;  %v4666_v46 = vcombine.high %v166_v40, %v170_v41  ;;  %v4665_v54 = vcombine.low %v166_v40, %v170_v41 }
 0x167   :  { %v546_v53 = vld [vmem:[#allocation5 + $0xdf0] sm:$0xff]  ;;  %v4793_v55 = vcombine.low %v294_v42, %v298_v43 }
 0x168   :  { %3559 = vmatpush2.bf16.msra.mxu0 %v4721_v48  ;;  %3600 = vmatpush2.bf16.msra.mxu1 %v4849_v50  ;;  %v4794_v48 = vcombine.high %v294_v42, %v298_v43  ;;  %v414_v50 = vld [vmem:[#allocation5 + $0x9d0] sm:$0xff] }
 0x169   :  { %3560 = vmatprep.subr.bf16.mxu0 %v4714_v51  ;;  %3601 = vmatprep.subr.bf16.mxu1 %v4842_v52  ;;  %v418_v51 = vld [vmem:[#allocation5 + $0x9f0] sm:$0xff] }
 0x16a   :  { %v542_v52 = vld [vmem:[#allocation5 + $0xdd0] sm:$0xff]  ;;  %v4914_v56 = vcombine.high %v414_v50, %v418_v51  ;;  %v4913_v1 = vcombine.low %v414_v50, %v418_v51 }
 0x16b   :  { %v538_v0 = vld [vmem:[#allocation5 + $0xdb0] sm:$0xff]  ;;  %v5041_v2 = vcombine.low %v542_v52, %v546_v53 }
 0x16c   :  { %3561 = vmatpush2.bf16.msra.mxu0 %v4713_v57  ;;  %3602 = vmatpush2.bf16.msra.mxu1 %v4841_v61  ;;  %v5042_v57 = vcombine.high %v542_v52, %v546_v53  ;;  %v406_v61 = vld [vmem:[#allocation5 + $0x990] sm:$0xff] }
 0x16d   :  { %3562 = vmatprep.subr.bf16.mxu0 %v4706_v62  ;;  %3603 = vmatprep.subr.bf16.mxu1 %v4834_v63  ;;  %v410_v62 = vld [vmem:[#allocation5 + $0x9b0] sm:$0xff] }
 0x16e   :  { %v534_v63 = vld [vmem:[#allocation5 + $0xd90] sm:$0xff]  ;;  %v4906_v3 = vcombine.high %v406_v61, %v410_v62 }
 0x16f   :  { %v526_v9 = vld [vmem:[#allocation5 + $0xd50] sm:$0xff] }
 0x170   :  { %3563 = vmatpush2.bf16.msra.mxu0 %v4705_v4  ;;  %3604 = vmatpush2.bf16.msra.mxu1 %v4833_v5  ;;  %v5034_v4 = vcombine.high %v534_v63, %v538_v0  ;;  %v398_v5 = vld [vmem:[#allocation5 + $0x950] sm:$0xff] }
 0x171   :  { %3564 = vmatprep.subr.bf16.mxu0 %v4698_v6  ;;  %3605 = vmatprep.subr.bf16.mxu1 %v4826_v8  ;;  %v402_v6 = vld [vmem:[#allocation5 + $0x970] sm:$0xff] }
 0x172   :  { %v530_v10 = vld [vmem:[#allocation5 + $0xd70] sm:$0xff]  ;;  %v4897_v30 = vcombine.low %v398_v5, %v402_v6 }
 0x173   :  { %v5026_v22 = vcombine.high %v526_v9, %v530_v10  ;;  %v386_v40 = vld [vmem:[#allocation5 + $0x8f0] sm:$0xff] }
 0x174   :  { %3565 = vmatpush2.bf16.msra.mxu0 %v4697_v13  ;;  %3606 = vmatpush2.bf16.msra.mxu1 %v4825_v14  ;;  %v4905_v13 = vcombine.low %v406_v61, %v410_v62  ;;  %v510_v41 = vld [vmem:[#allocation5 + $0xcd0] sm:$0xff] }
 0x175   :  { %3566 = vmatprep.subr.bf16.mxu0 %v4690_v15  ;;  %3607 = vmatprep.subr.bf16.mxu1 %v4818_v17  ;;  %v5033_v15 = vcombine.low %v534_v63, %v538_v0  ;;  %v4898_v17 = vcombine.high %v398_v5, %v402_v6  ;;  %v514_v42 = vld [vmem:[#allocation5 + $0xcf0] sm:$0xff] }
 0x176   :  { %v378_v50 = vld [vmem:[#allocation5 + $0x8b0] sm:$0xff] }
 0x177   :  { %v502_v51 = vld [vmem:[#allocation5 + $0xc90] sm:$0xff] }
 0x178   :  { %3567 = vmatpush2.bf16.msra.mxu0 %v4689_v23  ;;  %3608 = vmatpush2.bf16.msra.mxu1 %v4817_v24  ;;  %v390_v23 = vld [vmem:[#allocation5 + $0x910] sm:$0xff] }
 0x179   :  { %3568 = vmatprep.subr.bf16.mxu0 %v4682_v25  ;;  %3609 = vmatprep.subr.bf16.mxu1 %v4810_v26  ;;  %v394_v24 = vld [vmem:[#allocation5 + $0x930] sm:$0xff] }
 0x17a   :  { %v518_v25 = vld [vmem:[#allocation5 + $0xd10] sm:$0xff]  ;;  %v4889_v43 = vcombine.low %v390_v23, %v394_v24 }
 0x17b   :  { %v522_v26 = vld [vmem:[#allocation5 + $0xd30] sm:$0xff] }
 0x17c   :  { %3569 = vmatpush2.bf16.msra.mxu0 %v4681_v33  ;;  %3610 = vmatpush2.bf16.msra.mxu1 %v4809_v34  ;;  %v4890_v33 = vcombine.high %v390_v23, %v394_v24  ;;  %v506_v52 = vld [vmem:[#allocation5 + $0xcb0] sm:$0xff] }
 0x17d   :  { %3570 = vmatprep.subr.bf16.mxu0 %v4674_v35  ;;  %3611 = vmatprep.subr.bf16.mxu1 %v4802_v37  ;;  %v5018_v35 = vcombine.high %v518_v25, %v522_v26  ;;  %v382_v37 = vld [vmem:[#allocation5 + $0x8d0] sm:$0xff] }
 0x17e   :  { %v4881_v53 = vcombine.low %v382_v37, %v386_v40  ;;  %v370_v61 = vld [vmem:[#allocation5 + $0x870] sm:$0xff] }
 0x17f   :  { %v494_v62 = vld [vmem:[#allocation5 + $0xc50] sm:$0xff] }
 0x180   :  { %3571 = vmatpush2.bf16.msra.mxu0 %v4673_v44  ;;  %3612 = vmatpush2.bf16.msra.mxu1 %v4801_v45  ;;  %v5017_v44 = vcombine.low %v518_v25, %v522_v26  ;;  %v4882_v45 = vcombine.high %v382_v37, %v386_v40  ;;  %v498_v63 = vld [vmem:[#allocation5 + $0xc70] sm:$0xff] }
 0x181   :  { %3572 = vmatprep.subr.bf16.mxu0 %v4666_v46  ;;  %3613 = vmatprep.subr.bf16.mxu1 %v4794_v48  ;;  %v5010_v46 = vcombine.high %v510_v41, %v514_v42  ;;  %v374_v48 = vld [vmem:[#allocation5 + $0x890] sm:$0xff] }
 0x182   :  { %v4873_v0 = vcombine.low %v374_v48, %v378_v50  ;;  %v362_v5 = vld [vmem:[#allocation5 + $0x830] sm:$0xff] }
 0x183   :  { %v486_v6 = vld [vmem:[#allocation5 + $0xc10] sm:$0xff] }
 0x184   :  { %3573 = vmatpush2.bf16.msra.mxu0 %v4665_v54  ;;  %3614 = vmatpush2.bf16.msra.mxu1 %v4793_v55  ;;  %v5009_v54 = vcombine.low %v510_v41, %v514_v42  ;;  %v4874_v55 = vcombine.high %v374_v48, %v378_v50  ;;  %v470_v24 = vld [vmem:[#allocation5 + $0xb90] sm:$0xff] }
 0x185   :  { %3624 = vmatprep.subr.bf16.mxu0 %v4914_v56  ;;  %3665 = vmatprep.subr.bf16.mxu1 %v5042_v57  ;;  %v5002_v56 = vcombine.high %v502_v51, %v506_v52  ;;  %v366_v57 = vld [vmem:[#allocation5 + $0x850] sm:$0xff] }
 0x186   :  { %v598_v25 = vld [vmem:[#allocation5 + $0xf90] sm:$0xff] }
 0x187   :  { %v3330_v8 = vpop.f32.mrf.mxu0  ;;  %3575 = vmatmul.mubr.bf16.vlgmr.msra.gmra.mxu0 %v5530_v16  ;;  %v3371_v12 = vpop.f32.mrf.mxu1  ;;  %3616 = vmatmul.mubr.bf16.vlgmr.msra.gmra.mxu1 %v5532_v20  ;;  %v602_v26 = vld [vmem:[#allocation5 + $0xfb0] sm:$0xff] }
 0x188   :  { %v3331_v11 = vadd.f32 %v3330_v8, %v5565_v36  ;;  %3625 = vmatpush1.bf16.msra.mxu0 %v4913_v1  ;;  %3666 = vmatpush1.bf16.msra.mxu1 %v5041_v2  ;;  %v5001_v1 = vcombine.low %v502_v51, %v506_v52  ;;  %v4866_v2 = vcombine.high %v366_v57, %v370_v61  ;;  %v490_v8 = vld [vmem:[#allocation5 + $0xc30] sm:$0xff] }
 0x189   :  { %v3332_v14 = vpop.f32.mrf.mxu0  ;;  %3626 = vmatprep.subr.bf16.mxu0 %v4906_v3  ;;  %v3373_v21 = vpop.f32.mrf.mxu1  ;;  %3667 = vmatprep.subr.bf16.mxu1 %v5034_v4  ;;  %v4994_v3 = vcombine.high %v494_v62, %v498_v63  ;;  %v358_v4 = vld [vmem:[#allocation5 + $0x810] sm:$0xff]  ;;  %v5097_v41 = vcombine.low %v598_v25, %v602_v26 }
 0x18a   :  { %v5574_v18 = vadd.f32 %v3371_v12, %v3331_v11  ;;  %v3333_v19 = vadd.f32 %v3332_v14, %v5569_v47  ;;  %3656 = vmatprep.mubr.bf16.mxu0 %v5534_v28  ;;  %3697 = vmatprep.mubr.bf16.mxu1 %v5537_v31  ;;  %v5025_v47 = vcombine.low %v526_v9, %v530_v10  ;;  %v482_v14 = vld [vmem:[#allocation5 + $0xbf0] sm:$0xff] }
 0x18b   :  { %v3334_v36 = vpop.f32.mrf.mxu0  ;;  %v3375_v29 = vpop.f32.mrf.mxu1  ;;  %v4865_v9 = vcombine.low %v366_v57, %v370_v61  ;;  %v4993_v10 = vcombine.low %v494_v62, %v498_v63  ;;  %v4858_v11 = vcombine.high %v358_v4, %v362_v5  ;;  %v4986_v12 = vcombine.high %v486_v6, %v490_v8  ;;  %v594_v37 = vld [vmem:[#allocation5 + $0xf70] sm:$0xff] }
 0x18c   :  { %v5579_v27 = vadd.f32 %v3373_v21, %v3333_v19  ;;  %3627 = vmatpush1.bf16.msra.mxu0 %v4905_v13  ;;  %3668 = vmatpush1.bf16.msra.mxu1 %v5033_v15  ;;  %v478_v13 = vld [vmem:[#allocation5 + $0xbd0] sm:$0xff]  ;;  %v4857_v19 = vcombine.low %v358_v4, %v362_v5  ;;  %v4985_v21 = vcombine.low %v486_v6, %v490_v8 }
 0x18d   :  { %v3335_v32 = vpop.f32.mrf.mxu0  ;;  %3628 = vmatprep.subr.bf16.mxu0 %v4898_v17  ;;  %v3376_v34 = vpop.f32.mrf.mxu1  ;;  %3669 = vmatprep.subr.bf16.mxu1 %v5026_v22  ;;  %v606_v15 = vld [vmem:[#allocation5 + $0xfd0] sm:$0xff]  ;;  %v4978_v22 = vcombine.high %v478_v13, %v482_v14  ;;  %v4977_v29 = vcombine.low %v478_v13, %v482_v14 }
 0x18e   :  { %v610_v17 = vld [vmem:[#allocation5 + $0xff0] sm:$0xff] }
 0x18f   :  { %v5106_v23 = vcombine.high %v606_v15, %v610_v17  ;;  %v474_v36 = vld [vmem:[#allocation5 + $0xbb0] sm:$0xff] }
 0x190   :  { %3629 = vmatpush1.bf16.msra.mxu0 %v4897_v30  ;;  %3670 = vmatpush1.bf16.msra.mxu1 %v5025_v47  ;;  %v5105_v30 = vcombine.low %v606_v15, %v610_v17  ;;  %v4970_v32 = vcombine.high %v470_v24, %v474_v36  ;;  %v5098_v47 = vcombine.high %v598_v25, %v602_v26  ;;  %v466_v34 = vld [vmem:[#allocation5 + $0xb70] sm:$0xff] }
 0x191   :  { %3630 = vmatprep.subr.bf16.mxu0 %v4890_v33  ;;  %3671 = vmatprep.subr.bf16.mxu1 %v5018_v35  ;;  %v462_v33 = vld [vmem:[#allocation5 + $0xb50] sm:$0xff]  ;;  %v4969_v40 = vcombine.low %v470_v24, %v474_v36 }
 0x192   :  { %v590_v35 = vld [vmem:[#allocation5 + $0xf50] sm:$0xff]  ;;  %v4962_v42 = vcombine.high %v462_v33, %v466_v34  ;;  %v4961_v50 = vcombine.low %v462_v33, %v466_v34  ;;  %v291_v33 = vld [vmem:[#allocation5 + $0x5f8] sm:$0xff] }
 0x193   :  { %v586_v48 = vld [vmem:[#allocation5 + $0xf30] sm:$0xff]  ;;  %v5089_v51 = vcombine.low %v590_v35, %v594_v37 }
 0x194   :  { %3631 = vmatpush1.bf16.msra.mxu0 %v4889_v43  ;;  %3672 = vmatpush1.bf16.msra.mxu1 %v5017_v44  ;;  %v5090_v43 = vcombine.high %v590_v35, %v594_v37  ;;  %v454_v44 = vld [vmem:[#allocation5 + $0xb10] sm:$0xff]  ;;  %v624_v35 = vsub.s32 2, %v5555_v60 }
 0x195   :  { %3632 = vmatprep.subr.bf16.mxu0 %v4882_v45  ;;  %3673 = vmatprep.subr.bf16.mxu1 %v5010_v46  ;;  %v458_v45 = vld [vmem:[#allocation5 + $0xb30] sm:$0xff] }
 0x196   :  { %v582_v46 = vld [vmem:[#allocation5 + $0xf10] sm:$0xff]  ;;  %v4954_v52 = vcombine.high %v454_v44, %v458_v45  ;;  %v4953_v61 = vcombine.low %v454_v44, %v458_v45  ;;  %v155_v44 = vld [vmem:[#allocation5 + $0x1b8] sm:$0xff] }
 0x197   :  { %v578_v57 = vld [vmem:[#allocation5 + $0xef0] sm:$0xff]  ;;  %v5081_v62 = vcombine.low %v582_v46, %v586_v48  ;;  %v279_v45 = vld [vmem:[#allocation5 + $0x598] sm:$0xff] }
 0x198   :  { %3633 = vmatpush1.bf16.msra.mxu0 %v4881_v53  ;;  %3674 = vmatpush1.bf16.msra.mxu1 %v5009_v54  ;;  %v5082_v53 = vcombine.high %v582_v46, %v586_v48  ;;  %v446_v54 = vld [vmem:[#allocation5 + $0xad0] sm:$0xff]  ;;  %v283_v46 = vld [vmem:[#allocation5 + $0x5b8] sm:$0xff]  ;;  %v625_v48 = vrot.slane %v5558_v7, %v624_v35 }
 0x199   :  { %3634 = vmatprep.subr.bf16.mxu0 %v4874_v55  ;;  %3675 = vmatprep.subr.bf16.mxu1 %v5002_v56  ;;  %v450_v55 = vld [vmem:[#allocation5 + $0xaf0] sm:$0xff]  ;;  %v251_v35 = vld [vmem:[#allocation5 + $0x4b8] sm:$0xff] }
 0x19a   :  { %v574_v56 = vld [vmem:[#allocation5 + $0xed0] sm:$0xff]  ;;  %v4946_v63 = vcombine.high %v446_v54, %v450_v55  ;;  %v4945_v5 = vcombine.low %v446_v54, %v450_v55  ;;  %v4780_v54 = vcombine.high %v279_v45, %v283_v46  ;;  %v143_v55 = vld [vmem:[#allocation5 + $0x158] sm:$0xff] }
 0x19b   :  { %v570_v4 = vld [vmem:[#allocation5 + $0xeb0] sm:$0xff]  ;;  %v5073_v6 = vcombine.low %v574_v56, %v578_v57 }
 0x19c   :  { %3635 = vmatpush1.bf16.msra.mxu0 %v4873_v0  ;;  %3676 = vmatpush1.bf16.msra.mxu1 %v5001_v1  ;;  %v5074_v0 = vcombine.high %v574_v56, %v578_v57  ;;  %v438_v1 = vld [vmem:[#allocation5 + $0xa90] sm:$0xff]  ;;  %v147_v56 = vld [vmem:[#allocation5 + $0x178] sm:$0xff] }
 0x19d   :  { %3636 = vmatprep.subr.bf16.mxu0 %v4866_v2  ;;  %3677 = vmatprep.subr.bf16.mxu1 %v4994_v3  ;;  %v442_v2 = vld [vmem:[#allocation5 + $0xab0] sm:$0xff] }
 0x19e   :  { %v566_v3 = vld [vmem:[#allocation5 + $0xe90] sm:$0xff]  ;;  %v4938_v8 = vcombine.high %v438_v1, %v442_v2  ;;  %v4937_v14 = vcombine.low %v438_v1, %v442_v2 }
 0x19f   :  { %v562_v13 = vld [vmem:[#allocation5 + $0xe70] sm:$0xff]  ;;  %v5065_v15 = vcombine.low %v566_v3, %v570_v4 }
 0x1a0   :  { %3637 = vmatpush1.bf16.msra.mxu0 %v4865_v9  ;;  %3678 = vmatpush1.bf16.msra.mxu1 %v4993_v10  ;;  %v5066_v9 = vcombine.high %v566_v3, %v570_v4  ;;  %v430_v10 = vld [vmem:[#allocation5 + $0xa50] sm:$0xff]  ;;  %v4779_v3 = vcombine.low %v279_v45, %v283_v46  ;;  %v4644_v4 = vcombine.high %v143_v55, %v147_v56  ;;  %v239_v45 = vld [vmem:[#allocation5 + $0x458] sm:$0xff] }
 0x1a1   :  { %3638 = vmatprep.subr.bf16.mxu0 %v4858_v11  ;;  %3679 = vmatprep.subr.bf16.mxu1 %v4986_v12  ;;  %v434_v11 = vld [vmem:[#allocation5 + $0xa70] sm:$0xff]  ;;  %v243_v46 = vld [vmem:[#allocation5 + $0x478] sm:$0xff] }
 0x1a2   :  { %v558_v12 = vld [vmem:[#allocation5 + $0xe50] sm:$0xff]  ;;  %v4930_v17 = vcombine.high %v430_v10, %v434_v11  ;;  %v4929_v36 = vcombine.low %v430_v10, %v434_v11  ;;  %v139_v10 = vld [vmem:[#allocation5 + $0x138] sm:$0xff] }
 0x1a3   :  { %v554_v24 = vld [vmem:[#allocation5 + $0xe30] sm:$0xff]  ;;  %v5057_v25 = vcombine.low %v558_v12, %v562_v13 }
 0x1a4   :  { %3639 = vmatpush1.bf16.msra.mxu0 %v4857_v19  ;;  %3680 = vmatpush1.bf16.msra.mxu1 %v4985_v21  ;;  %v5058_v19 = vcombine.high %v558_v12, %v562_v13  ;;  %v422_v21 = vld [vmem:[#allocation5 + $0xa10] sm:$0xff]  ;;  %v263_v12 = vld [vmem:[#allocation5 + $0x518] sm:$0xff] }
 0x1a5   :  { %3640 = vmatprep.subr.bf16.mxu0 %v4978_v22  ;;  %3681 = vmatprep.subr.bf16.mxu1 %v5106_v23  ;;  %v426_v22 = vld [vmem:[#allocation5 + $0xa30] sm:$0xff]  ;;  %v267_v13 = vld [vmem:[#allocation5 + $0x538] sm:$0xff] }
 0x1a6   :  { %v550_v23 = vld [vmem:[#allocation5 + $0xe10] sm:$0xff]  ;;  %v4922_v26 = vcombine.high %v422_v21, %v426_v22  ;;  %v4921_v34 = vcombine.low %v422_v21, %v426_v22 }
 0x1a7   :  { %v5049_v37 = vcombine.low %v550_v23, %v554_v24 }
 0x1a8   :  { %3641 = vmatpush2.bf16.msra.mxu0 %v4977_v29  ;;  %3682 = vmatpush2.bf16.msra.mxu1 %v5105_v30  ;;  %v5050_v29 = vcombine.high %v550_v23, %v554_v24  ;;  %v159_v30 = vld [vmem:[#allocation5 + $0x1d8] sm:$0xff]  ;;  %v4764_v24 = vcombine.high %v263_v12, %v267_v13 }
 0x1a9   :  { %3642 = vmatprep.subr.bf16.mxu0 %v4970_v32  ;;  %3683 = vmatprep.subr.bf16.mxu1 %v5098_v47  ;;  %v163_v32 = vld [vmem:[#allocation5 + $0x1f8] sm:$0xff] }
 0x1aa   :  { %v287_v47 = vld [vmem:[#allocation5 + $0x5d8] sm:$0xff] }
 0x1ac   :  { %3643 = vmatpush2.bf16.msra.mxu0 %v4969_v40  ;;  %3684 = vmatpush2.bf16.msra.mxu1 %v5097_v41  ;;  %v4660_v40 = vcombine.high %v159_v30, %v163_v32  ;;  %v4788_v41 = vcombine.high %v287_v47, %v291_v33 }
 0x1ad   :  { %3644 = vmatprep.subr.bf16.mxu0 %v4962_v42  ;;  %3685 = vmatprep.subr.bf16.mxu1 %v5090_v43  ;;  %v628_v42 = vsub.s32 3, %v5555_v60  ;;  %v151_v43 = vld [vmem:[#allocation5 + $0x198] sm:$0xff] }
 0x1ae   :  { %v4651_v1 = vcombine.low %v151_v43, %v155_v44 }
 0x1b0   :  { %3645 = vmatpush2.bf16.msra.mxu0 %v4961_v50  ;;  %3686 = vmatpush2.bf16.msra.mxu1 %v5089_v51  ;;  %v4659_v50 = vcombine.low %v159_v30, %v163_v32  ;;  %v4787_v51 = vcombine.low %v287_v47, %v291_v33  ;;  %v119_v47 = vld [vmem:[#allocation5 + $0x98] sm:$0xff] }
 0x1b1   :  { %3646 = vmatprep.subr.bf16.mxu0 %v4954_v52  ;;  %3687 = vmatprep.subr.bf16.mxu1 %v5082_v53  ;;  %v4652_v52 = vcombine.high %v151_v43, %v155_v44  ;;  %v629_v53 = vrot.slane %v5558_v7, %v628_v42  ;;  %v123_v33 = vld [vmem:[#allocation5 + $0xb8] sm:$0xff] }
 0x1b2   :  { %v111_v43 = vld [vmem:[#allocation5 + $0x58] sm:$0xff] }
 0x1b3   :  { %v115_v44 = vld [vmem:[#allocation5 + $0x78] sm:$0xff] }
 0x1b4   :  { %3647 = vmatpush2.bf16.msra.mxu0 %v4953_v61  ;;  %3688 = vmatpush2.bf16.msra.mxu1 %v5081_v62  ;;  %v271_v61 = vld [vmem:[#allocation5 + $0x558] sm:$0xff] }
 0x1b5   :  { %3648 = vmatprep.subr.bf16.mxu0 %v4946_v63  ;;  %3689 = vmatprep.subr.bf16.mxu1 %v5074_v0  ;;  %v275_v62 = vld [vmem:[#allocation5 + $0x578] sm:$0xff] }
 0x1b6   :  { %v4771_v21 = vcombine.low %v271_v61, %v275_v62 }
 0x1b8   :  { %3649 = vmatpush2.bf16.msra.mxu0 %v4945_v5  ;;  %3690 = vmatpush2.bf16.msra.mxu1 %v5073_v6 }
 0x1b9   :  { %3650 = vmatprep.subr.bf16.mxu0 %v4938_v8  ;;  %3691 = vmatprep.subr.bf16.mxu1 %v5066_v9  ;;  %v4772_v8 = vcombine.high %v271_v61, %v275_v62  ;;  %v135_v9 = vld [vmem:[#allocation5 + $0x118] sm:$0xff]  ;;  %v4739_v61 = vcombine.low %v239_v45, %v243_v46 }
 0x1ba   :  { %v4636_v22 = vcombine.high %v135_v9, %v139_v10 }
 0x1bc   :  { %3651 = vmatpush2.bf16.msra.mxu0 %v4937_v14  ;;  %3692 = vmatpush2.bf16.msra.mxu1 %v5065_v15 }
 0x1bd   :  { %3652 = vmatprep.subr.bf16.mxu0 %v4930_v17  ;;  %3693 = vmatprep.subr.bf16.mxu1 %v5058_v19  ;;  %v4643_v17 = vcombine.low %v143_v55, %v147_v56  ;;  %v231_v55 = vld [vmem:[#allocation5 + $0x418] sm:$0xff] }
 0x1be   :  { %v235_v56 = vld [vmem:[#allocation5 + $0x438] sm:$0xff] }
 0x1c0   :  { %3653 = vmatpush2.bf16.msra.mxu0 %v4929_v36  ;;  %3694 = vmatpush2.bf16.msra.mxu1 %v5057_v25  ;;  %v127_v36 = vld [vmem:[#allocation5 + $0xd8] sm:$0xff] }
 0x1c1   :  { %3654 = vmatprep.subr.bf16.mxu0 %v4922_v26  ;;  %3695 = vmatprep.subr.bf16.mxu1 %v5050_v29  ;;  %v255_v25 = vld [vmem:[#allocation5 + $0x4d8] sm:$0xff]  ;;  %v4635_v29 = vcombine.low %v135_v9, %v139_v10 }
 0x1c2   :  { %v259_v26 = vld [vmem:[#allocation5 + $0x4f8] sm:$0xff] }
 0x1c3   :  { %v4756_v32 = vcombine.high %v255_v25, %v259_v26  ;;  %v215_v9 = vld [vmem:[#allocation5 + $0x398] sm:$0xff] }
 0x1c4   :  { %3655 = vmatpush2.bf16.msra.mxu0 %v4921_v34  ;;  %3696 = vmatpush2.bf16.msra.mxu1 %v5049_v37  ;;  %v247_v34 = vld [vmem:[#allocation5 + $0x498] sm:$0xff] }
 0x1c5   :  { %3706 = vmatprep.subr.bf16.mxu0 %v4660_v40  ;;  %3747 = vmatprep.subr.bf16.mxu1 %v4788_v41  ;;  %v4755_v40 = vcombine.low %v255_v25, %v259_v26  ;;  %v4620_v41 = vcombine.high %v119_v47, %v123_v33  ;;  %v4748_v42 = vcombine.high %v247_v34, %v251_v35  ;;  %v219_v10 = vld [vmem:[#allocation5 + $0x3b8] sm:$0xff] }
 0x1c7   :  { %v3412_v57 = vpop.f32.mrf.mxu0  ;;  %3657 = vmatmul.mubr.bf16.vlgmr.msra.gmra.mxu0 %v5542_v38  ;;  %v3453_v0 = vpop.f32.mrf.mxu1  ;;  %3698 = vmatmul.mubr.bf16.vlgmr.msra.gmra.mxu1 %v5544_v39 }
 0x1c8   :  { %v3413_v63 = vadd.f32 %v3412_v57, %v625_v48  ;;  %3707 = vmatpush1.bf16.msra.mxu0 %v4659_v50  ;;  %3748 = vmatpush1.bf16.msra.mxu1 %v4787_v51  ;;  %v4619_v48 = vcombine.low %v119_v47, %v123_v33  ;;  %v4747_v50 = vcombine.low %v247_v34, %v251_v35 }
 0x1c9   :  { %v3414_v2 = vpop.f32.mrf.mxu0  ;;  %3708 = vmatprep.subr.bf16.mxu0 %v4652_v52  ;;  %v3455_v6 = vpop.f32.mrf.mxu1  ;;  %3749 = vmatprep.subr.bf16.mxu1 %v4780_v54  ;;  %v4612_v51 = vcombine.high %v111_v43, %v115_v44  ;;  %v4740_v52 = vcombine.high %v239_v45, %v243_v46  ;;  %v107_v54 = vld [vmem:[#allocation5 + $0x38] sm:$0xff]  ;;  %v4611_v57 = vcombine.low %v111_v43, %v115_v44 }
 0x1ca   :  { %v5587_v7 = vadd.f32 %v3453_v0, %v3413_v63  ;;  %v3415_v5 = vadd.f32 %v3414_v2, %v629_v53  ;;  %3738 = vmatprep.mubr.bf16.mxu0 %v5524_v58  ;;  %3779 = vmatprep.mubr.bf16.mxu1 %v5526_v59  ;;  %v131_v58 = vld [vmem:[#allocation5 + $0xf8] sm:$0xff]  ;;  %v4763_v59 = vcombine.low %v263_v12, %v267_v13 }
 0x1cb   :  { %v3416_v11 = vpop.f32.mrf.mxu0  ;;  %v3457_v15 = vpop.f32.mrf.mxu1  ;;  %v4628_v30 = vcombine.high %v127_v36, %v131_v58  ;;  %v4627_v37 = vcombine.low %v127_v36, %v131_v58  ;;  %v103_v53 = vld [vmem:[#allocation5 + $0x18] sm:$0xff]  ;;  %v4732_v63 = vcombine.high %v231_v55, %v235_v56  ;;  %v4715_v36 = vcombine.low %v215_v9, %v219_v10 }
 0x1cc   :  { %v5591_v14 = vadd.f32 %v3455_v6, %v3415_v5  ;;  %3709 = vmatpush1.bf16.msra.mxu0 %v4651_v1  ;;  %3750 = vmatpush1.bf16.msra.mxu1 %v4779_v3  ;;  %v4604_v62 = vcombine.high %v103_v53, %v107_v54  ;;  %v223_v0 = vld [vmem:[#allocation5 + $0x3d8] sm:$0xff]  ;;  %v4731_v5 = vcombine.low %v231_v55, %v235_v56 }
 0x1cd   :  { %v3417_v19 = vpop.f32.mrf.mxu0  ;;  %3710 = vmatprep.subr.bf16.mxu0 %v4644_v4  ;;  %v3458_v23 = vpop.f32.mrf.mxu1  ;;  %3751 = vmatprep.subr.bf16.mxu1 %v4772_v8  ;;  %v227_v1 = vld [vmem:[#allocation5 + $0x3f8] sm:$0xff]  ;;  %v4603_v4 = vcombine.low %v103_v53, %v107_v54 }
 0x1ce   :  { %v351_v2 = vld [vmem:[#allocation5 + $0x7d8] sm:$0xff]  ;;  %v4724_v6 = vcombine.high %v223_v0, %v227_v1  ;;  %v4723_v13 = vcombine.low %v223_v0, %v227_v1 }
 0x1cf   :  { %v355_v3 = vld [vmem:[#allocation5 + $0x7f8] sm:$0xff] }
 0x1d0   :  { %3711 = vmatpush1.bf16.msra.mxu0 %v4643_v17  ;;  %3752 = vmatpush1.bf16.msra.mxu1 %v4771_v21  ;;  %v4852_v8 = vcombine.high %v351_v2, %v355_v3  ;;  %v343_v11 = vld [vmem:[#allocation5 + $0x798] sm:$0xff]  ;;  %v4851_v15 = vcombine.low %v351_v2, %v355_v3  ;;  %v4716_v17 = vcombine.high %v215_v9, %v219_v10 }
 0x1d1   :  { %3712 = vmatprep.subr.bf16.mxu0 %v4636_v22  ;;  %3753 = vmatprep.subr.bf16.mxu1 %v4764_v24  ;;  %v347_v12 = vld [vmem:[#allocation5 + $0x7b8] sm:$0xff] }
 0x1d2   :  { %v4844_v19 = vcombine.high %v343_v11, %v347_v12  ;;  %v207_v21 = vld [vmem:[#allocation5 + $0x358] sm:$0xff]  ;;  %v4843_v58 = vcombine.low %v343_v11, %v347_v12 }
 0x1d3   :  { %v211_v22 = vld [vmem:[#allocation5 + $0x378] sm:$0xff] }
 0x1d4   :  { %3713 = vmatpush1.bf16.msra.mxu0 %v4635_v29  ;;  %3754 = vmatpush1.bf16.msra.mxu1 %v4763_v59  ;;  %v335_v23 = vld [vmem:[#allocation5 + $0x758] sm:$0xff]  ;;  %v4708_v25 = vcombine.high %v207_v21, %v211_v22  ;;  %v4707_v47 = vcombine.low %v207_v21, %v211_v22 }
 0x1d5   :  { %3714 = vmatprep.subr.bf16.mxu0 %v4628_v30  ;;  %3755 = vmatprep.subr.bf16.mxu1 %v4756_v32  ;;  %v339_v24 = vld [vmem:[#allocation5 + $0x778] sm:$0xff] }
 0x1d6   :  { %v4836_v26 = vcombine.high %v335_v23, %v339_v24  ;;  %v199_v29 = vld [vmem:[#allocation5 + $0x318] sm:$0xff]  ;;  %v4835_v33 = vcombine.low %v335_v23, %v339_v24 }
 0x1d7   :  { %v203_v59 = vld [vmem:[#allocation5 + $0x338] sm:$0xff] }
 0x1d8   :  { %3715 = vmatpush1.bf16.msra.mxu0 %v4627_v37  ;;  %3756 = vmatpush1.bf16.msra.mxu1 %v4755_v40  ;;  %v327_v30 = vld [vmem:[#allocation5 + $0x718] sm:$0xff]  ;;  %v4700_v34 = vcombine.high %v199_v29, %v203_v59  ;;  %v4699_v43 = vcombine.low %v199_v29, %v203_v59 }
 0x1d9   :  { %3716 = vmatprep.subr.bf16.mxu0 %v4620_v41  ;;  %3757 = vmatprep.subr.bf16.mxu1 %v4748_v42  ;;  %v331_v32 = vld [vmem:[#allocation5 + $0x738] sm:$0xff] }
 0x1da   :  { %v4828_v35 = vcombine.high %v327_v30, %v331_v32  ;;  %v191_v37 = vld [vmem:[#allocation5 + $0x2d8] sm:$0xff]  ;;  %v4827_v44 = vcombine.low %v327_v30, %v331_v32 }
 0x1db   :  { %v195_v40 = vld [vmem:[#allocation5 + $0x2f8] sm:$0xff] }
 0x1dc   :  { %3717 = vmatpush1.bf16.msra.mxu0 %v4619_v48  ;;  %3758 = vmatpush1.bf16.msra.mxu1 %v4747_v50  ;;  %v319_v41 = vld [vmem:[#allocation5 + $0x6d8] sm:$0xff]  ;;  %v4692_v45 = vcombine.high %v191_v37, %v195_v40  ;;  %v4691_v53 = vcombine.low %v191_v37, %v195_v40 }
 0x1dd   :  { %3718 = vmatprep.subr.bf16.mxu0 %v4612_v51  ;;  %3759 = vmatprep.subr.bf16.mxu1 %v4740_v52  ;;  %v323_v42 = vld [vmem:[#allocation5 + $0x6f8] sm:$0xff] }
 0x1de   :  { %v4820_v46 = vcombine.high %v319_v41, %v323_v42  ;;  %v183_v48 = vld [vmem:[#allocation5 + $0x298] sm:$0xff]  ;;  %v4819_v54 = vcombine.low %v319_v41, %v323_v42 }
 0x1df   :  { %v187_v50 = vld [vmem:[#allocation5 + $0x2b8] sm:$0xff] }
 0x1e0   :  { %3719 = vmatpush1.bf16.msra.mxu0 %v4611_v57  ;;  %3760 = vmatpush1.bf16.msra.mxu1 %v4739_v61  ;;  %v311_v51 = vld [vmem:[#allocation5 + $0x698] sm:$0xff]  ;;  %v4684_v55 = vcombine.high %v183_v48, %v187_v50  ;;  %v4683_v0 = vcombine.low %v183_v48, %v187_v50 }
 0x1e1   :  { %3720 = vmatprep.subr.bf16.mxu0 %v4604_v62  ;;  %3761 = vmatprep.subr.bf16.mxu1 %v4732_v63  ;;  %v315_v52 = vld [vmem:[#allocation5 + $0x6b8] sm:$0xff] }
 0x1e2   :  { %v4812_v56 = vcombine.high %v311_v51, %v315_v52  ;;  %v175_v57 = vld [vmem:[#allocation5 + $0x258] sm:$0xff]  ;;  %v4811_v1 = vcombine.low %v311_v51, %v315_v52 }
 0x1e3   :  { %v179_v61 = vld [vmem:[#allocation5 + $0x278] sm:$0xff] }
 0x1e4   :  { %3721 = vmatpush1.bf16.msra.mxu0 %v4603_v4  ;;  %3762 = vmatpush1.bf16.msra.mxu1 %v4731_v5  ;;  %v303_v62 = vld [vmem:[#allocation5 + $0x658] sm:$0xff]  ;;  %v4676_v2 = vcombine.high %v175_v57, %v179_v61  ;;  %v4675_v9 = vcombine.low %v175_v57, %v179_v61 }
 0x1e5   :  { %3722 = vmatprep.subr.bf16.mxu0 %v4724_v6  ;;  %3763 = vmatprep.subr.bf16.mxu1 %v4852_v8  ;;  %v307_v63 = vld [vmem:[#allocation5 + $0x678] sm:$0xff] }
 0x1e6   :  { %v4804_v3 = vcombine.high %v303_v62, %v307_v63  ;;  %v167_v4 = vld [vmem:[#allocation5 + $0x218] sm:$0xff]  ;;  %v4803_v10 = vcombine.low %v303_v62, %v307_v63 }
 0x1e7   :  { %v171_v5 = vld [vmem:[#allocation5 + $0x238] sm:$0xff] }
 0x1e8   :  { %3723 = vmatpush2.bf16.msra.mxu0 %v4723_v13  ;;  %3764 = vmatpush2.bf16.msra.mxu1 %v4851_v15  ;;  %v295_v6 = vld [vmem:[#allocation5 + $0x618] sm:$0xff]  ;;  %v4668_v11 = vcombine.high %v167_v4, %v171_v5  ;;  %v4667_v21 = vcombine.low %v167_v4, %v171_v5 }
 0x1e9   :  { %3724 = vmatprep.subr.bf16.mxu0 %v4716_v17  ;;  %3765 = vmatprep.subr.bf16.mxu1 %v4844_v19  ;;  %v299_v8 = vld [vmem:[#allocation5 + $0x638] sm:$0xff] }
 0x1ea   :  { %v4796_v12 = vcombine.high %v295_v6, %v299_v8  ;;  %v415_v13 = vld [vmem:[#allocation5 + $0x9d8] sm:$0xff]  ;;  %v4795_v22 = vcombine.low %v295_v6, %v299_v8 }
 0x1eb   :  { %v419_v15 = vld [vmem:[#allocation5 + $0x9f8] sm:$0xff] }
 0x1ec   :  { %3725 = vmatpush2.bf16.msra.mxu0 %v4715_v36  ;;  %3766 = vmatpush2.bf16.msra.mxu1 %v4843_v58  ;;  %v543_v17 = vld [vmem:[#allocation5 + $0xdd8] sm:$0xff]  ;;  %v4916_v23 = vcombine.high %v415_v13, %v419_v15  ;;  %v4915_v29 = vcombine.low %v415_v13, %v419_v15 }
 0x1ed   :  { %3726 = vmatprep.subr.bf16.mxu0 %v4708_v25  ;;  %3767 = vmatprep.subr.bf16.mxu1 %v4836_v26  ;;  %v547_v19 = vld [vmem:[#allocation5 + $0xdf8] sm:$0xff] }
 0x1ee   :  { %v5044_v24 = vcombine.high %v543_v17, %v547_v19  ;;  %v407_v36 = vld [vmem:[#allocation5 + $0x998] sm:$0xff]  ;;  %v5043_v59 = vcombine.low %v543_v17, %v547_v19 }
 0x1ef   :  { %v411_v58 = vld [vmem:[#allocation5 + $0x9b8] sm:$0xff] }
 0x1f0   :  { %3727 = vmatpush2.bf16.msra.mxu0 %v4707_v47  ;;  %3768 = vmatpush2.bf16.msra.mxu1 %v4835_v33  ;;  %v535_v25 = vld [vmem:[#allocation5 + $0xd98] sm:$0xff]  ;;  %v4908_v30 = vcombine.high %v407_v36, %v411_v58  ;;  %v4907_v42 = vcombine.low %v407_v36, %v411_v58 }
 0x1f1   :  { %3728 = vmatprep.subr.bf16.mxu0 %v4700_v34  ;;  %3769 = vmatprep.subr.bf16.mxu1 %v4828_v35  ;;  %v539_v26 = vld [vmem:[#allocation5 + $0xdb8] sm:$0xff] }
 0x1f2   :  { %v5036_v32 = vcombine.high %v535_v25, %v539_v26  ;;  %v399_v47 = vld [vmem:[#allocation5 + $0x958] sm:$0xff] }
 0x1f3   :  { %v403_v33 = vld [vmem:[#allocation5 + $0x978] sm:$0xff] }
 0x1f4   :  { %3729 = vmatpush2.bf16.msra.mxu0 %v4699_v43  ;;  %3770 = vmatpush2.bf16.msra.mxu1 %v4827_v44  ;;  %v527_v35 = vld [vmem:[#allocation5 + $0xd58] sm:$0xff]  ;;  %v5035_v44 = vcombine.low %v535_v25, %v539_v26 }
 0x1f5   :  { %3730 = vmatprep.subr.bf16.mxu0 %v4692_v45  ;;  %3771 = vmatprep.subr.bf16.mxu1 %v4820_v46  ;;  %v531_v37 = vld [vmem:[#allocation5 + $0xd78] sm:$0xff]  ;;  %v4900_v45 = vcombine.high %v399_v47, %v403_v33 }
 0x1f6   :  { %v391_v50 = vld [vmem:[#allocation5 + $0x918] sm:$0xff] }
 0x1f7   :  { %v395_v51 = vld [vmem:[#allocation5 + $0x938] sm:$0xff] }
 0x1f8   :  { %3731 = vmatpush2.bf16.msra.mxu0 %v4691_v53  ;;  %3772 = vmatpush2.bf16.msra.mxu1 %v4819_v54  ;;  %v523_v52 = vld [vmem:[#allocation5 + $0xd38] sm:$0xff]  ;;  %v4899_v54 = vcombine.low %v399_v47, %v403_v33  ;;  %v4892_v57 = vcombine.high %v391_v50, %v395_v51 }
 0x1f9   :  { %3732 = vmatprep.subr.bf16.mxu0 %v4684_v55  ;;  %3773 = vmatprep.subr.bf16.mxu1 %v4812_v56  ;;  %v5027_v56 = vcombine.low %v527_v35, %v531_v37  ;;  %v383_v63 = vld [vmem:[#allocation5 + $0x8d8] sm:$0xff] }
 0x1fa   :  { %v375_v5 = vld [vmem:[#allocation5 + $0x898] sm:$0xff] }
 0x1fb   :  { %v379_v6 = vld [vmem:[#allocation5 + $0x8b8] sm:$0xff] }
 0x1fc   :  { %3733 = vmatpush2.bf16.msra.mxu0 %v4683_v0  ;;  %3774 = vmatpush2.bf16.msra.mxu1 %v4811_v1  ;;  %v387_v0 = vld [vmem:[#allocation5 + $0x8f8] sm:$0xff] }
 0x1fd   :  { %3734 = vmatprep.subr.bf16.mxu0 %v4676_v2  ;;  %3775 = vmatprep.subr.bf16.mxu1 %v4804_v3  ;;  %v511_v1 = vld [vmem:[#allocation5 + $0xcd8] sm:$0xff]  ;;  %v4891_v2 = vcombine.low %v391_v50, %v395_v51  ;;  %v4884_v3 = vcombine.high %v383_v63, %v387_v0 }
 0x1fe   :  { %v503_v8 = vld [vmem:[#allocation5 + $0xc98] sm:$0xff] }
 0x1ff   :  { %v367_v15 = vld [vmem:[#allocation5 + $0x858] sm:$0xff] }
 0x200   :  { %3735 = vmatpush2.bf16.msra.mxu0 %v4675_v9  ;;  %3776 = vmatpush2.bf16.msra.mxu1 %v4803_v10  ;;  %v507_v9 = vld [vmem:[#allocation5 + $0xcb8] sm:$0xff]  ;;  %v4883_v10 = vcombine.low %v383_v63, %v387_v0 }
 0x201   :  { %3736 = vmatprep.subr.bf16.mxu0 %v4668_v11  ;;  %3777 = vmatprep.subr.bf16.mxu1 %v4796_v12  ;;  %v4876_v12 = vcombine.high %v375_v5, %v379_v6  ;;  %v5004_v13 = vcombine.high %v503_v8, %v507_v9  ;;  %v371_v17 = vld [vmem:[#allocation5 + $0x878] sm:$0xff] }
 0x202   :  { %v495_v19 = vld [vmem:[#allocation5 + $0xc58] sm:$0xff] }
 0x203   :  { %v359_v58 = vld [vmem:[#allocation5 + $0x818] sm:$0xff] }
 0x204   :  { %3737 = vmatpush2.bf16.msra.mxu0 %v4667_v21  ;;  %3778 = vmatpush2.bf16.msra.mxu1 %v4795_v22  ;;  %v499_v21 = vld [vmem:[#allocation5 + $0xc78] sm:$0xff]  ;;  %v4875_v22 = vcombine.low %v375_v5, %v379_v6 }
 0x205   :  { %3788 = vmatprep.subr.bf16.mxu0 %v4916_v23  ;;  %3829 = vmatprep.subr.bf16.mxu1 %v5044_v24  ;;  %v5003_v23 = vcombine.low %v503_v8, %v507_v9  ;;  %v4868_v24 = vcombine.high %v367_v15, %v371_v17  ;;  %v4996_v36 = vcombine.high %v495_v19, %v499_v21  ;;  %v363_v25 = vld [vmem:[#allocation5 + $0x838] sm:$0xff] }
 0x206   :  { %v487_v26 = vld [vmem:[#allocation5 + $0xc18] sm:$0xff] }
 0x207   :  { %v3494_v34 = vpop.f32.mrf.mxu0  ;;  %3739 = vmatmul.mubr.bf16.vlgmr.msra.gmra.mxu0 %v5530_v16  ;;  %v3535_v41 = vpop.f32.mrf.mxu1  ;;  %3780 = vmatmul.mubr.bf16.vlgmr.msra.gmra.mxu1 %v5532_v20  ;;  %v5028_v16 = vcombine.high %v527_v35, %v531_v37  ;;  %v519_v20 = vld [vmem:[#allocation5 + $0xd18] sm:$0xff] }
 0x208   :  { %v3495_v40 = vadd.f32 %v3494_v34, %v5587_v7  ;;  %3789 = vmatpush1.bf16.msra.mxu0 %v4915_v29  ;;  %3830 = vmatpush1.bf16.msra.mxu1 %v5043_v59  ;;  %v5020_v62 = vcombine.high %v519_v20, %v523_v52  ;;  %v491_v29 = vld [vmem:[#allocation5 + $0xc38] sm:$0xff]  ;;  %v4867_v59 = vcombine.low %v367_v15, %v371_v17 }
 0x209   :  { %v5596_v43 = vpop.f32.mrf.mxu0  ;;  %3790 = vmatprep.subr.bf16.mxu0 %v4908_v30  ;;  %v5600_v48 = vpop.f32.mrf.mxu1  ;;  %3831 = vmatprep.subr.bf16.mxu1 %v5036_v32  ;;  %v4995_v30 = vcombine.low %v495_v19, %v499_v21  ;;  %v4860_v32 = vcombine.high %v359_v58, %v363_v25  ;;  %v4988_v47 = vcombine.high %v487_v26, %v491_v29  ;;  %v479_v33 = vld [vmem:[#allocation5 + $0xbd8] sm:$0xff] }
 0x20a   :  { %v5598_v46 = vadd.f32 %v3535_v41, %v3495_v40  ;;  %3820 = vmatprep.mubr.bf16.mxu0 %v5534_v28  ;;  %3861 = vmatprep.mubr.bf16.mxu1 %v5537_v31  ;;  %v515_v28 = vld [vmem:[#allocation5 + $0xcf8] sm:$0xff]  ;;  %v5019_v31 = vcombine.low %v519_v20, %v523_v52  ;;  %v4859_v40 = vcombine.low %v359_v58, %v363_v25 }
 0x20b   :  { %v3498_v7 = vpop.f32.mrf.mxu0  ;;  %v3539_v53 = vpop.f32.mrf.mxu1  ;;  %v5012_v4 = vcombine.high %v511_v1, %v515_v28  ;;  %v5011_v11 = vcombine.low %v511_v1, %v515_v28  ;;  %v483_v34 = vld [vmem:[#allocation5 + $0xbf8] sm:$0xff]  ;;  %v4987_v41 = vcombine.low %v487_v26, %v491_v29 }
 0x20c   :  { %3791 = vmatpush1.bf16.msra.mxu0 %v4907_v42  ;;  %3832 = vmatpush1.bf16.msra.mxu1 %v5035_v44  ;;  %v607_v35 = vld [vmem:[#allocation5 + $0xfd8] sm:$0xff]  ;;  %v4980_v42 = vcombine.high %v479_v33, %v483_v34  ;;  %v4979_v7 = vcombine.low %v479_v33, %v483_v34 }
 0x20d   :  { %v3499_v55 = vpop.f32.mrf.mxu0  ;;  %3792 = vmatprep.subr.bf16.mxu0 %v4900_v45  ;;  %v3540_v61 = vpop.f32.mrf.mxu1  ;;  %3833 = vmatprep.subr.bf16.mxu1 %v5028_v16  ;;  %v611_v37 = vld [vmem:[#allocation5 + $0xff8] sm:$0xff] }
 0x20e   :  { %v5108_v44 = vcombine.high %v607_v35, %v611_v37  ;;  %v471_v45 = vld [vmem:[#allocation5 + $0xb98] sm:$0xff]  ;;  %v5107_v20 = vcombine.low %v607_v35, %v611_v37 }
 0x20f   :  { %v475_v16 = vld [vmem:[#allocation5 + $0xbb8] sm:$0xff] }
 0x210   :  { %3793 = vmatpush1.bf16.msra.mxu0 %v4899_v54  ;;  %3834 = vmatpush1.bf16.msra.mxu1 %v5027_v56  ;;  %v599_v50 = vld [vmem:[#allocation5 + $0xf98] sm:$0xff]  ;;  %v4972_v52 = vcombine.high %v471_v45, %v475_v16  ;;  %v4971_v61 = vcombine.low %v471_v45, %v475_v16 }
 0x211   :  { %3794 = vmatprep.subr.bf16.mxu0 %v4892_v57  ;;  %3835 = vmatprep.subr.bf16.mxu1 %v5020_v62  ;;  %v603_v51 = vld [vmem:[#allocation5 + $0xfb8] sm:$0xff] }
 0x212   :  { %v5100_v53 = vcombine.high %v599_v50, %v603_v51  ;;  %v463_v54 = vld [vmem:[#allocation5 + $0xb58] sm:$0xff]  ;;  %v5099_v62 = vcombine.low %v599_v50, %v603_v51 }
 0x213   :  { %v467_v55 = vld [vmem:[#allocation5 + $0xb78] sm:$0xff] }
 0x214   :  { %3795 = vmatpush1.bf16.msra.mxu0 %v4891_v2  ;;  %3836 = vmatpush1.bf16.msra.mxu1 %v5019_v31  ;;  %v591_v56 = vld [vmem:[#allocation5 + $0xf58] sm:$0xff]  ;;  %v4964_v63 = vcombine.high %v463_v54, %v467_v55 }
 0x215   :  { %3796 = vmatprep.subr.bf16.mxu0 %v4884_v3  ;;  %3837 = vmatprep.subr.bf16.mxu1 %v5012_v4  ;;  %v595_v57 = vld [vmem:[#allocation5 + $0xf78] sm:$0xff]  ;;  %v4963_v3 = vcombine.low %v463_v54, %v467_v55  ;;  %v5274_v54 = vld [vmem:[#allocation8 + $0x38] sm:$0xff]  }
 0x216   :  { %v5092_v0 = vcombine.high %v591_v56, %v595_v57  ;;  %v455_v1 = vld [vmem:[#allocation5 + $0xb18] sm:$0xff]  ;;  %v5091_v4 = vcombine.low %v591_v56, %v595_v57  ;;  %v5275_v55 = vld [vmem:[#allocation8 + $0xb8] sm:$0xff]  }
 0x217   :  { %v459_v28 = vld [vmem:[#allocation5 + $0xb38] sm:$0xff] }
 0x218   :  { %3797 = vmatpush1.bf16.msra.mxu0 %v4883_v10  ;;  %3838 = vmatpush1.bf16.msra.mxu1 %v5011_v11  ;;  %v583_v2 = vld [vmem:[#allocation5 + $0xf18] sm:$0xff]  ;;  %v4956_v5 = vcombine.high %v455_v1, %v459_v28 }
 0x219   :  { %3798 = vmatprep.subr.bf16.mxu0 %v4876_v12  ;;  %3839 = vmatprep.subr.bf16.mxu1 %v5004_v13  ;;  %v587_v31 = vld [vmem:[#allocation5 + $0xf38] sm:$0xff]  ;;  %v4955_v12 = vcombine.low %v455_v1, %v459_v28  ;;  %v5280_v28 = vld [vmem:[#allocation8 + $0x68] sm:$0xff]  }
 0x21a   :  { %v5084_v6 = vcombine.high %v583_v2, %v587_v31  ;;  %v447_v8 = vld [vmem:[#allocation5 + $0xad8] sm:$0xff]  ;;  %v5083_v13 = vcombine.low %v583_v2, %v587_v31  ;;  %v5281_v31 = vld [vmem:[#allocation8 + $0xe8] sm:$0xff]  }
 0x21b   :  { %v451_v9 = vld [vmem:[#allocation5 + $0xaf8] sm:$0xff] }
 0x21c   :  { %3799 = vmatpush1.bf16.msra.mxu0 %v4875_v22  ;;  %3840 = vmatpush1.bf16.msra.mxu1 %v5003_v23  ;;  %v575_v10 = vld [vmem:[#allocation5 + $0xed8] sm:$0xff]  ;;  %v4948_v15 = vcombine.high %v447_v8, %v451_v9 }
 0x21d   :  { %3800 = vmatprep.subr.bf16.mxu0 %v4868_v24  ;;  %3841 = vmatprep.subr.bf16.mxu1 %v4996_v36  ;;  %v579_v11 = vld [vmem:[#allocation5 + $0xef8] sm:$0xff]  ;;  %v4947_v24 = vcombine.low %v447_v8, %v451_v9  ;;  %v5285_v9 = vld [vmem:[#allocation8 + $0xe0] sm:$0xff]  }
 0x21e   :  { %v5076_v17 = vcombine.high %v575_v10, %v579_v11  ;;  %v439_v19 = vld [vmem:[#allocation5 + $0xa98] sm:$0xff]  ;;  %v5075_v36 = vcombine.low %v575_v10, %v579_v11  ;;  %v5286_v10 = vld [vmem:[#allocation8 + $0x20] sm:$0xff]  }
 0x21f   :  { %v443_v21 = vld [vmem:[#allocation5 + $0xab8] sm:$0xff]  ;;  %v5287_v11 = vld [vmem:[#allocation8 + $0xa0] sm:$0xff]  }
 0x220   :  { %3801 = vmatpush1.bf16.msra.mxu0 %v4867_v59  ;;  %3842 = vmatpush1.bf16.msra.mxu1 %v4995_v30  ;;  %v567_v22 = vld [vmem:[#allocation5 + $0xe98] sm:$0xff]  ;;  %v4940_v58 = vcombine.high %v439_v19, %v443_v21 }
 0x221   :  { %3802 = vmatprep.subr.bf16.mxu0 %v4860_v32  ;;  %3843 = vmatprep.subr.bf16.mxu1 %v4988_v47  ;;  %v571_v23 = vld [vmem:[#allocation5 + $0xeb8] sm:$0xff]  ;;  %v4939_v32 = vcombine.low %v439_v19, %v443_v21 }
 0x222   :  { %v5068_v25 = vcombine.high %v567_v22, %v571_v23  ;;  %v431_v26 = vld [vmem:[#allocation5 + $0xa58] sm:$0xff]  ;;  %v5067_v47 = vcombine.low %v567_v22, %v571_v23 }
 0x223   :  { %v435_v29 = vld [vmem:[#allocation5 + $0xa78] sm:$0xff] }
 0x224   :  { %3803 = vmatpush1.bf16.msra.mxu0 %v4859_v40  ;;  %3844 = vmatpush1.bf16.msra.mxu1 %v4987_v41  ;;  %v559_v59 = vld [vmem:[#allocation5 + $0xe58] sm:$0xff]  ;;  %v4932_v33 = vcombine.high %v431_v26, %v435_v29 }
 0x225   :  { %3804 = vmatprep.subr.bf16.mxu0 %v4980_v42  ;;  %3845 = vmatprep.subr.bf16.mxu1 %v5108_v44  ;;  %v563_v30 = vld [vmem:[#allocation5 + $0xe78] sm:$0xff]  ;;  %v3497_v42 = vadd.f32 %v5596_v43, %v5591_v14  ;;  %v4931_v44 = vcombine.low %v431_v26, %v435_v29  ;;  %v3871_v14 = vmax.f32 %v5579_v27, 0.0  ;;  %v5300_v26 = vld [vmem:[#allocation8 + $0x40] sm:$0xff]  }
 0x226   :  { %v5060_v34 = vcombine.high %v559_v59, %v563_v30  ;;  %v423_v35 = vld [vmem:[#allocation5 + $0xa18] sm:$0xff]  ;;  %v5059_v45 = vcombine.low %v559_v59, %v563_v30  ;;  %v5301_v29 = vld [vmem:[#allocation8 + $0xc0] sm:$0xff]   ;;  %v3870_v30 = vmax.f32 %v5574_v18, 0.0 }
 0x227   :  { %v427_v37 = vld [vmem:[#allocation5 + $0xa38] sm:$0xff]  ;;  %v3538_v51 = vadd.f32 %v5600_v48, %v3497_v42  ;;  %v3879_v57 = vpack.c.bf16 %v3871_v14, %v3871_v14  ;;  %v5302_v59 = vld [vmem:[#allocation8] sm:$0xff]  }
 0x228   :  { %3805 = vmatpush2.bf16.msra.mxu0 %v4979_v7  ;;  %3846 = vmatpush2.bf16.msra.mxu1 %v5107_v20  ;;  %v551_v40 = vld [vmem:[#allocation5 + $0xe18] sm:$0xff]  ;;  %v4924_v16 = vcombine.high %v423_v35, %v427_v37  ;;  %v4923_v7 = vcombine.low %v423_v35, %v427_v37  ;;  %v5305_v35 = vld [vmem:[#allocation8 + $0x138] sm:$0xff]   ;;  %v3878_v37 = vpack.c.bf16 %v3870_v30, %v3870_v30  ;;  %v5327_v14 = vld [vmem:[#allocation8 + $0x1a0] sm:$0xff]  }
 0x229   :  { %3806 = vmatprep.subr.bf16.mxu0 %v4972_v52  ;;  %3847 = vmatprep.subr.bf16.mxu1 %v5100_v53  ;;  %v555_v41 = vld [vmem:[#allocation5 + $0xe38] sm:$0xff]  ;;  %v5272_v52 = vld [vmem:[#allocation8 + $0x78] sm:$0xff]   ;;  %v3873_v43 = vmax.f32 %v3538_v51, 0.0  ;;  %v5310_v51 = vld [vmem:[#allocation8 + $0x160] sm:$0xff]  }
 0x22a   :  { %v5052_v50 = vcombine.high %v551_v40, %v555_v41  ;;  %v5051_v20 = vcombine.low %v551_v40, %v555_v41  ;;  %v5273_v53 = vld [vmem:[#allocation8 + $0xf8] sm:$0xff]   ;;  %v5276_v56 = vld [vmem:[#allocation8 + $0x70] sm:$0xff]  }
 0x22b   :  { %v5278_v27 = vld [vmem:[#allocation8 + $0x30] sm:$0xff]   ;;  %v5321_v41 = vld [vmem:[#allocation8 + $0x1b8] sm:$0xff]  }
 0x22c   :  { %3807 = vmatpush2.bf16.msra.mxu0 %v4971_v61  ;;  %3848 = vmatpush2.bf16.msra.mxu1 %v5099_v62  ;;  %v5277_v61 = vld [vmem:[#allocation8 + $0xf0] sm:$0xff]   ;;  %v3881_v62 = vpack.c.bf16 %v3873_v43, %v3873_v43  ;;  %v5328_v43 = vld [vmem:[#allocation8 + $0x1d8] sm:$0xff]  }
 0x22d   :  { %3808 = vmatprep.subr.bf16.mxu0 %v4964_v63  ;;  %3849 = vmatprep.subr.bf16.mxu1 %v5092_v0  ;;  %v5279_v1 = vld [vmem:[#allocation8 + $0xb0] sm:$0xff]  }
 0x22e   :  { %v5292_v19 = vld [vmem:[#allocation8 + $0x50] sm:$0xff]  }
 0x22f   :  { %v5293_v21 = vld [vmem:[#allocation8 + $0xd0] sm:$0xff]  }
 0x230   :  { %3809 = vmatpush2.bf16.msra.mxu0 %v4963_v3  ;;  %3850 = vmatpush2.bf16.msra.mxu1 %v5091_v4  ;;  %v5282_v4 = vld [vmem:[#allocation8 + $0x28] sm:$0xff]   ;;  %v5294_v22 = vld [vmem:[#allocation8 + $0x10] sm:$0xff]  }
 0x231   :  { %3810 = vmatprep.subr.bf16.mxu0 %v4956_v5  ;;  %3851 = vmatprep.subr.bf16.mxu1 %v5084_v6  ;;  %v5283_v5 = vld [vmem:[#allocation8 + $0xa8] sm:$0xff]   ;;  %v5284_v6 = vld [vmem:[#allocation8 + $0x60] sm:$0xff]   ;;  %v5295_v23 = vld [vmem:[#allocation8 + $0x90] sm:$0xff]  }
 0x232   :  { %v5306_v40 = vld [vmem:[#allocation8 + $0x170] sm:$0xff]  }
 0x233   :  { %v5307_v18 = vld [vmem:[#allocation8 + $0x130] sm:$0xff]  }
 0x234   :  { %3811 = vmatpush2.bf16.msra.mxu0 %v4955_v12  ;;  %3852 = vmatpush2.bf16.msra.mxu1 %v5083_v13  ;;  %v5288_v12 = vld [vmem:[#allocation8 + $0x58] sm:$0xff]  }
 0x235   :  { %3812 = vmatprep.subr.bf16.mxu0 %v4948_v15  ;;  %3853 = vmatprep.subr.bf16.mxu1 %v5076_v17  ;;  %v5289_v13 = vld [vmem:[#allocation8 + $0xd8] sm:$0xff]  }
 0x236   :  { %v5290_v15 = vld [vmem:[#allocation8 + $0x18] sm:$0xff]  }
 0x237   :  { %v5291_v17 = vld [vmem:[#allocation8 + $0x98] sm:$0xff]  }
 0x238   :  { %3813 = vmatpush2.bf16.msra.mxu0 %v4947_v24  ;;  %3854 = vmatpush2.bf16.msra.mxu1 %v5075_v36  ;;  %v5296_v24 = vld [vmem:[#allocation8 + $0x48] sm:$0xff]  }
 0x239   :  { %3814 = vmatprep.subr.bf16.mxu0 %v4940_v58  ;;  %3855 = vmatprep.subr.bf16.mxu1 %v5068_v25  ;;  %v5297_v36 = vld [vmem:[#allocation8 + $0xc8] sm:$0xff]  }
 0x23a   :  { %v5298_v58 = vld [vmem:[#allocation8 + $0x8] sm:$0xff]  }
 0x23b   :  { %v5299_v25 = vld [vmem:[#allocation8 + $0x88] sm:$0xff]  }
 0x23c   :  { %3815 = vmatpush2.bf16.msra.mxu0 %v4939_v32  ;;  %3856 = vmatpush2.bf16.msra.mxu1 %v5067_v47  ;;  %v5303_v32 = vld [vmem:[#allocation8 + $0x80] sm:$0xff]   ;;  %v5304_v47 = vld [vmem:[#allocation8 + $0x178] sm:$0xff]  }
 0x23d   :  { %3816 = vmatprep.subr.bf16.mxu0 %v4932_v33  ;;  %3857 = vmatprep.subr.bf16.mxu1 %v5060_v34  ;;  %v3872_v33 = vmax.f32 %v5598_v46, 0.0  ;;  %v5320_v34 = vld [vmem:[#allocation8 + $0x1f8] sm:$0xff]   ;;  %v5323_v46 = vld [vmem:[#allocation8 + $0x1b0] sm:$0xff]  }
 0x23f   :  { %v3880_v42 = vpack.c.bf16 %v3872_v33, %v3872_v33 }
 0x240   :  { %3817 = vmatpush2.bf16.msra.mxu0 %v4931_v44  ;;  %3858 = vmatpush2.bf16.msra.mxu1 %v5059_v45  ;;  %v5322_v44 = vld [vmem:[#allocation8 + $0x1f0] sm:$0xff]   ;;  %v5308_v45 = vld [vmem:[#allocation8 + $0x168] sm:$0xff]  }
 0x241   :  { %3818 = vmatprep.subr.bf16.mxu0 %v4924_v16  ;;  %3859 = vmatprep.subr.bf16.mxu1 %v5052_v50  ;;  %v5324_v16 = vld [vmem:[#allocation8 + $0x1e8] sm:$0xff]  }
 0x242   :  { %v5309_v50 = vld [vmem:[#allocation8 + $0x128] sm:$0xff]  }
 0x244   :  { %3819 = vmatpush2.bf16.msra.mxu0 %v4923_v7  ;;  %3860 = vmatpush2.bf16.msra.mxu1 %v5051_v20  ;;  %v5325_v7 = vld [vmem:[#allocation8 + $0x1a8] sm:$0xff]   ;;  %v5326_v20 = vld [vmem:[#allocation8 + $0x1e0] sm:$0xff]  }
 0x245   :  { %5174 = vmatprep.subr.bf16.mxu0 %v5272_v52  ;;  %5196 = vmatprep.subr.bf16.mxu1 %v5273_v53  ;;  %v5311_v52 = vld [vmem:[#allocation8 + $0x120] sm:$0xff]   ;;  %v5312_v53 = vld [vmem:[#allocation8 + $0x158] sm:$0xff]  }
 0x247   :  { %v5608_v48 = vpop.f32.mrf.mxu0  ;;  %3821 = vmatmul.mubr.bf16.vlgmr.msra.gmra.mxu0 %v5542_v38  ;;  %v5611_v63 = vpop.f32.mrf.mxu1  ;;  %3862 = vmatmul.mubr.bf16.vlgmr.msra.gmra.mxu1 %v5544_v39 }
 0x248   :  { %5175 = vmatpush3.bf16.msra.mxu0 %v5274_v54  ;;  %4437 = vmatprep.mubr.bf16.mxu0 %v3879_v57  ;;  %v5313_v54 = vld [vmem:[#allocation8 + $0x118] sm:$0xff]   ;;  %v5315_v57 = vld [vmem:[#allocation8 + $0x110] sm:$0xff]  }
 0x249   :  { %5197 = vmatpush3.bf16.msra.mxu1 %v5275_v55  ;;  %v5614_v0 = vpop.f32.mrf.mxu0  ;;  %4477 = vmatprep.mubr.bf16.mxu1 %v3881_v62  ;;  %v5616_v2 = vpop.f32.mrf.mxu1  ;;  %v5314_v55 = vld [vmem:[#allocation8 + $0x150] sm:$0xff]   ;;  %v632_v62 = vsub.s32 4, %v5555_v60 }
 0x24a   :  { %5176 = vmatprep.subr.bf16.mxu0 %v5276_v56  ;;  %5198 = vmatprep.subr.bf16.mxu1 %v5277_v61  ;;  %v5329_v56 = vld [vmem:[#allocation8 + $0x198] sm:$0xff]   ;;  %v5316_v61 = vld [vmem:[#allocation8 + $0x148] sm:$0xff]  }
 0x24b   :  { %v3580_v38 = vpop.f32.mrf.mxu0  ;;  %v3621_v3 = vpop.f32.mrf.mxu1 }
 0x24c   :  { %5177 = vmatpush3.bf16.msra.mxu0 %v5278_v27  ;;  %v636_v27 = vsub.s32 5, %v5555_v60 }
 0x24d   :  { %5199 = vmatpush3.bf16.msra.mxu1 %v5279_v1  ;;  %v3581_v39 = vpop.f32.mrf.mxu0  ;;  %5178 = vmatprep.subr.bf16.mxu0 %v5280_v28  ;;  %v3622_v8 = vpop.f32.mrf.mxu1  ;;  %v5317_v1 = vld [vmem:[#allocation8 + $0x108] sm:$0xff]   ;;  %v5318_v28 = vld [vmem:[#allocation8 + $0x140] sm:$0xff]  }
 0x24e   :  { %5200 = vmatprep.subr.bf16.mxu1 %v5281_v31  ;;  %v5340_v31 = vld [vmem:[#allocation7] sm:$0xff] }
 0x24f   :  { %v633_v38 = vrot.slane %v5340_v31, %v632_v62  ;;  %v637_v3 = vrot.slane %v5340_v31, %v636_v27 }
 0x250   :  { %5179 = vmatpush3.bf16.msra.mxu0 %v5282_v4  ;;  %v5319_v4 = vld [vmem:[#allocation8 + $0x100] sm:$0xff]  }
 0x251   :  { %5201 = vmatpush3.bf16.msra.mxu1 %v5283_v5  ;;  %5180 = vmatprep.subr.bf16.mxu0 %v5284_v6  ;;  %v3577_v39 = vadd.f32 %v5608_v48, %v633_v38  ;;  %v3579_v5 = vadd.f32 %v5614_v0, %v637_v3  ;;  %v5332_v48 = vld [vmem:[#allocation8 + $0x1c8] sm:$0xff]   ;;  %v5109_v38 = vld [vmem:[#allocation10] ss:$0 sm:$0xff] }
 0x252   :  { %5202 = vmatprep.subr.bf16.mxu1 %v5285_v9  ;;  %v5330_v9 = vld [vmem:[#allocation8 + $0x1d0] sm:$0xff]  }
 0x253   :  { %v3618_v6 = vadd.f32 %v5611_v63, %v3577_v39 }
 0x254   :  { %5181 = vmatpush3.bf16.msra.mxu0 %v5286_v10  ;;  %v3620_v10 = vadd.f32 %v5616_v2, %v3579_v5  ;;  %v5334_v2 = vld [vmem:[#allocation8 + $0x1c0] sm:$0xff]  }
 0x255   :  { %5203 = vmatpush3.bf16.msra.mxu1 %v5287_v11  ;;  %5182 = vmatprep.subr.bf16.mxu0 %v5288_v12 }
 0x256   :  { %5204 = vmatprep.subr.bf16.mxu1 %v5289_v13  ;;  %v5331_v13 = vld [vmem:[#allocation8 + $0x190] sm:$0xff]  }
 0x258   :  { %5183 = vmatpush3.bf16.msra.mxu0 %v5290_v15 }
 0x259   :  { %5205 = vmatpush3.bf16.msra.mxu1 %v5291_v17  ;;  %5184 = vmatprep.subr.bf16.mxu0 %v5292_v19 }
 0x25a   :  { %5206 = vmatprep.subr.bf16.mxu1 %v5293_v21 }
 0x25c   :  { %5185 = vmatpush3.bf16.msra.mxu0 %v5294_v22 }
 0x25d   :  { %5207 = vmatpush3.bf16.msra.mxu1 %v5295_v23  ;;  %5186 = vmatprep.subr.bf16.mxu0 %v5296_v24  ;;  %v5333_v24 = vld [vmem:[#allocation8 + $0x188] sm:$0xff]  }
 0x25e   :  { %5208 = vmatprep.subr.bf16.mxu1 %v5297_v36 }
 0x260   :  { %5187 = vmatpush3.bf16.msra.mxu0 %v5298_v58 }
 0x261   :  { %5209 = vmatpush3.bf16.msra.mxu1 %v5299_v25  ;;  %5188 = vmatprep.subr.bf16.mxu0 %v5300_v26 }
 0x262   :  { %5210 = vmatprep.subr.bf16.mxu1 %v5301_v29  ;;  %v5335_v29 = vld [vmem:[#allocation8 + $0x180] sm:$0xff]  }
 0x264   :  { %5189 = vmatpush3.bf16.msra.mxu0 %v5302_v59 }
 0x265   :  { %5211 = vmatpush3.bf16.msra.mxu1 %v5303_v32  ;;  %5218 = vmatprep.subr.bf16.mxu0 %v5304_v47 }
 0x266   :  { %5240 = vmatprep.subr.bf16.mxu1 %v5320_v34 }
 0x267   :  { %4438 = vmatmul.mubr.bf16.vlgmr.msra.gmra.mxu0 %v3878_v37 }
 0x268   :  { %4478 = vmatmul.mubr.bf16.vlgmr.msra.gmra.mxu1 %v3880_v42  ;;  %5219 = vmatpush3.bf16.msra.mxu0 %v5305_v35  ;;  %v644_v42 = vsub.s32 7, %v5555_v60 }
 0x269   :  { %5220 = vmatprep.subr.bf16.mxu0 %v5306_v40  ;;  %5241 = vmatpush3.bf16.msra.mxu1 %v5321_v41  ;;  %v640_v41 = vsub.s32 6, %v5555_v60 }
 0x26a   :  { %5242 = vmatprep.subr.bf16.mxu1 %v5322_v44 }
 0x26b   :  { %v641_v44 = vrot.slane %v5340_v31, %v640_v41 }
 0x26c   :  { %5221 = vmatpush3.bf16.msra.mxu0 %v5307_v18  ;;  %v645_v18 = vrot.slane %v5340_v31, %v644_v42 }
 0x26d   :  { %5222 = vmatprep.subr.bf16.mxu0 %v5308_v45  ;;  %5243 = vmatpush3.bf16.msra.mxu1 %v5323_v46 }
 0x26e   :  { %5244 = vmatprep.subr.bf16.mxu1 %v5324_v16 }
 0x270   :  { %5223 = vmatpush3.bf16.msra.mxu0 %v5309_v50 }
 0x271   :  { %5224 = vmatprep.subr.bf16.mxu0 %v5310_v51  ;;  %5245 = vmatpush3.bf16.msra.mxu1 %v5325_v7 }
 0x272   :  { %5246 = vmatprep.subr.bf16.mxu1 %v5326_v20 }
 0x274   :  { %5225 = vmatpush3.bf16.msra.mxu0 %v5311_v52 }
 0x275   :  { %5226 = vmatprep.subr.bf16.mxu0 %v5312_v53  ;;  %5247 = vmatpush3.bf16.msra.mxu1 %v5327_v14 }
 0x276   :  { %5248 = vmatprep.subr.bf16.mxu1 %v5328_v43 }
 0x278   :  { %5227 = vmatpush3.bf16.msra.mxu0 %v5313_v54 }
 0x279   :  { %5228 = vmatprep.subr.bf16.mxu0 %v5314_v55  ;;  %5249 = vmatpush3.bf16.msra.mxu1 %v5329_v56 }
 0x27a   :  { %5250 = vmatprep.subr.bf16.mxu1 %v5330_v9 }
 0x27c   :  { %5229 = vmatpush3.bf16.msra.mxu0 %v5315_v57 }
 0x27d   :  { %5230 = vmatprep.subr.bf16.mxu0 %v5316_v61  ;;  %5251 = vmatpush3.bf16.msra.mxu1 %v5331_v13 }
 0x27e   :  { %5252 = vmatprep.subr.bf16.mxu1 %v5332_v48 }
 0x280   :  { %5231 = vmatpush3.bf16.msra.mxu0 %v5317_v1 }
 0x281   :  { %5232 = vmatprep.subr.bf16.mxu0 %v5318_v28  ;;  %5253 = vmatpush3.bf16.msra.mxu1 %v5333_v24 }
 0x282   :  { %5254 = vmatprep.subr.bf16.mxu1 %v5334_v2 }
 0x284   :  { %5233 = vmatpush3.bf16.msra.mxu0 %v5319_v4 }
 0x285   :  { %5255 = vmatpush3.bf16.msra.mxu1 %v5335_v29 }
 0x287   :  { %v3658_v8 = vpop.f32.mrf.mxu0  ;;  %v3699_v12 = vpop.f32.mrf.mxu1 }
 0x288   :  { %v3659_v11 = vadd.f32 %v3658_v8, %v3618_v6 }
 0x289   :  { %v3660_v15 = vpop.f32.mrf.mxu0  ;;  %v3701_v21 = vpop.f32.mrf.mxu1 }
 0x28a   :  { %v3700_v17 = vadd.f32 %v3699_v12, %v3659_v11  ;;  %v3661_v19 = vadd.f32 %v3660_v15, %v3620_v10 }
 0x28b   :  { %v3662_v22 = vpop.f32.mrf.mxu0  ;;  %v3703_v0 = vpop.f32.mrf.mxu1 }
 0x28c   :  { %v3702_v23 = vadd.f32 %v3701_v21, %v3661_v19  ;;  %v3874_v36 = vmax.f32 %v3700_v17, 0.0  ;;  %v4567_v0 = vand.u32 127, %v614_v49 }
 0x28d   :  { %v3663_v63 = vpop.f32.mrf.mxu0  ;;  %v3704_v25 = vpop.f32.mrf.mxu1 }
 0x28e   :  { %v3875_v58 = vmax.f32 %v3702_v23, 0.0  ;;  %v3882_v59 = vpack.c.bf16 %v3874_v36, %v3874_v36  ;;  %vm4568_vm0 = vcmp.lt.s32.totalorder %v4567_v0, 10 }
 0x290   :  { %v3883_v26 = vpack.c.bf16 %v3875_v58, %v3875_v58 }
 0x292   :  { %4517 = vmatprep.mubr.bf16.mxu0 %v3883_v26 }
 0x293   :  { %4518 = vmatmul.mubr.bf16.vlgmr.msra.gmra.mxu0 %v3882_v59 }
 0x2c7   :  { %v3740_v30 = vpop.f32.mrf.mxu0  ;;  %v3781_v32 = vpop.f32.mrf.mxu1 }
 0x2c8   :  { %v3741_v45 = vadd.f32 %v3740_v30, %v641_v44 }
 0x2c9   :  { %v3742_v47 = vpop.f32.mrf.mxu0  ;;  %v3783_v33 = vpop.f32.mrf.mxu1 }
 0x2ca   :  { %v3743_v46 = vadd.f32 %v3742_v47, %v645_v18  ;;  %v3782_v16 = vadd.f32 %v3781_v32, %v3741_v45 }
 0x2cb   :  { %v3744_v34 = vpop.f32.mrf.mxu0  ;;  %v3785_v35 = vpop.f32.mrf.mxu1 }
 0x2cc   :  { %v3784_v51 = vadd.f32 %v3783_v33, %v3743_v46 }
 0x2cd   :  { %v3745_v37 = vpop.f32.mrf.mxu0  ;;  %v3786_v40 = vpop.f32.mrf.mxu1 }
 0x307   :  { %v3822_v50 = vpop.f32.mrf.mxu0  ;;  %v3863_v20 = vpop.f32.mrf.mxu1 }
 0x308   :  { %v3823_v7 = vadd.f32 %v3822_v50, %v3782_v16 }
 0x309   :  { %v3824_v52 = vpop.f32.mrf.mxu0  ;;  %v3865_v43 = vpop.f32.mrf.mxu1 }
 0x30a   :  { %v3864_v53 = vadd.f32 %v3863_v20, %v3823_v7  ;;  %v3825_v14 = vadd.f32 %v3824_v52, %v3784_v51 }
 0x30b   :  { %v3826_v54 = vpop.f32.mrf.mxu0  ;;  %v3867_v56 = vpop.f32.mrf.mxu1 }
 0x30c   :  { %v3866_v55 = vadd.f32 %v3865_v43, %v3825_v14  ;;  %v3876_v57 = vmax.f32 %v3864_v53, 0.0 }
 0x30d   :  { %v3827_v61 = vpop.f32.mrf.mxu0  ;;  %v3868_v60 = vpop.f32.mrf.mxu1 }
 0x30e   :  { %v3877_v62 = vmax.f32 %v3866_v55, 0.0  ;;  %v3884_v1 = vpack.c.bf16 %v3876_v57, %v3876_v57 }
 0x310   :  { %v3885_v27 = vpack.c.bf16 %v3877_v62, %v3877_v62 }
 0x312   :  { %4557 = vmatprep.mubr.bf16.mxu1 %v3885_v27 }
 0x313   :  { %4558 = vmatmul.mubr.bf16.vlgmr.msra.gmra.mxu1 %v3884_v1 }
 0x327   :  { %v5190_v28 = vpop.f32.mrf.mxu0 }
 0x328   :  { %v5212_v31 = vpop.f32.mrf.mxu1 }
 0x329   :  { %v5191_v3 = vpop.f32.mrf.mxu0 }
 0x32a   :  { %v5192_v4 = vadd.f32 %v5191_v3, %v5190_v28  ;;  %v5213_v39 = vpop.f32.mrf.mxu1 }
 0x32b   :  { %v5214_v5 = vadd.f32 %v5213_v39, %v5212_v31  ;;  %v5193_v6 = vpop.f32.mrf.mxu0 }
 0x32c   :  { %v4440_v8 = vadd.f32 %v5192_v4, %v5109_v38  ;;  %v5215_v9 = vpop.f32.mrf.mxu1 }
 0x32d   :  { %v5194_v10 = vpop.f32.mrf.mxu0 }
 0x32e   :  { %v4480_v11 = vadd.f32 %v5214_v5, %v4440_v8  ;;  %v5216_v12 = vpop.f32.mrf.mxu1 }
 0x353   :  { %v5234_v13 = vpop.f32.mrf.mxu0 }
 0x355   :  { %v5235_v15 = vpop.f32.mrf.mxu0 }
 0x356   :  { %v5236_v17 = vadd.f32 %v5235_v15, %v5234_v13 }
 0x357   :  { %v5237_v19 = vpop.f32.mrf.mxu0 }
 0x358   :  { %v4520_v21 = vadd.f32 %v5236_v17, %v4480_v11 }
 0x359   :  { %v5238_v22 = vpop.f32.mrf.mxu0 }
 0x3d3   :  { %v5256_v48 = vpop.f32.mrf.mxu1 }
 0x3d5   :  { %v5257_v23 = vpop.f32.mrf.mxu1 }
 0x3d6   :  { %v5258_v24 = vadd.f32 %v5257_v23, %v5256_v48 }
 0x3d7   :  { %v5259_v36 = vpop.f32.mrf.mxu1 }
 0x3d8   :  { %v4560_v63 = vadd.f32 %v5258_v24, %v4520_v21 }
 0x3d9   :  { %v5260_v58 = vpop.f32.mrf.mxu1 }
 0x3da   :  { %v4565_v25 = vmax.f32 %v4560_v63, 0.0 }
 0x3dc   :  { %v4569_v2 = vsel %vm4568_vm0, %v4565_v25, -inf }
 0x3dd   :  { %4570 = vmax.xlane.f32.xlu0 %v4569_v2 }
 0x466   :  { %v4571_v26 = vpop.xlane.xlu0 %4570 }
 0x467   :  { %v4572_v29 = vsub.f32 %v4569_v2, %v4571_v26 }
 0x469   :  { %v4573_v59 = vmul.f32 1.442695, %v4572_v29 }
 0x46b   :  { %5336 = vpow2.f32 %v4573_v59 }
 0x478   :  { %v5337_v30 = vpop.eup %5336 }
 0x479   :  { %4575 = vadd.xlane.f32.xlu0 %v5337_v30 }
 0x502   :  { %v4576_v32 = vpop.xlane.xlu0 %4575 }
 0x503   :  { %5338 = vrcp.f32 %v4576_v32 }
 0x510   :  { %v5339_v47 = vpop.eup %5338 }
 0x511   :  { %v4578_v49 = vmul.f32 %v5339_v47, %v5337_v30 }
 0x513   :  { %4579 = vst [vmem:[#allocation11] sm:$0xff] %v4578_v49 }
 0x514   :  { %5452 = shalt.err (!%p5449_p1)
}
 0x515   :  { %4589 = dma.vmem_to_hbm [thread:$0]  %s4587_s4, 128, %s5637_s5, [#allocation4]  }
 0x516   :  { %5467 = dma.done.wait [#allocation4], 128  }
 0x517   :  { %5468 = vsyncadd [#allocation4], 4294967168 }
 0x518   :  { %4593 = vsyncpa [#allocation3], 1 }
 0x519   :  { %4594 = vsyncpa [#allocation6], 1 }
 0x51a   :  { %4595 = vsyncpa [#allocation9], 1 }
 0x51b   :  { %4596 = vsyncpa [#allocation4], 1 }

</bundles_post_ra>
